<compile_context>
chip_gen: v6e
topology: v6e:2x2x1
jax: 0.10.0
libtpu: 0.0.40
codegen_flags: <defaults>
</compile_context>

<pallas_src>
import functools

import jax
import jax.numpy as jnp
from jax import lax
from jax.experimental import pallas as pl
from jax.experimental.pallas import tpu as pltpu

_EPS = 1e-5
_PAD = 8  # sublane-aligned zero-pad rows for the width-shift scratch buffer


# ----------------------------------------------------------------------------
# In-kernel helpers
# ----------------------------------------------------------------------------
def _hardswish(v):
    return v * jnp.clip(v + 3.0, 0.0, 6.0) * (1.0 / 6.0)


def _leaky(v):  # LeakyReLU(0.1)
    return jnp.maximum(v, 0.1 * v)


def _affine(y, sb):  # sb: (2, C) -> row0 scale, row1 bias
    return y * sb[0:1, :] + sb[1:2, :]


# ----------------------------------------------------------------------------
# Fused YOLOC4 kernel (one grid step == one batch image)
# ----------------------------------------------------------------------------
def _yoloc4_kernel(x_ref, mwm_ref, mwp_ref,
                   w1_ref, w2_ref, wa_ref, wb_ref, w3_ref, w4a_ref, w4b_ref,
                   sb1_ref, sba_ref, sbb_ref, sbn1_ref, sbn2_ref, sb4_ref,
                   o_ref, pbuf, qbuf, *, H, W):
    HW = H * W
    f32 = jnp.float32
    dot = functools.partial(jnp.dot, preferred_element_type=f32)

    x = x_ref[0].astype(f32)            # (HW, c1)
    mwm = mwm_ref[...]                  # (HW, 1) valid-mask for the w-1 tap
    mwp = mwp_ref[...]                  # (HW, 1) valid-mask for the w+1 tap

    # --- cv1: 1x1 conv + BN + hardswish -> t ; cv2: plain 1x1 conv -> y2 ------
    t = _hardswish(_affine(dot(x, w1_ref[...]), sb1_ref[...]))     # (HW, c_)
    y2 = dot(x, w2_ref[...])                                       # (HW, c_)

    # --- CrossConv.cv1: (1,3) conv along W, pad (0,1), BN + hardswish ---------
    pbuf[...] = jnp.zeros_like(pbuf)
    pbuf[pl.ds(_PAD, HW), :] = t
    p = pbuf[...]
    acc = dot(p[_PAD - 1:_PAD - 1 + HW, :] * mwm, wa_ref[0])       # tap w-1
    acc = acc + dot(t, wa_ref[1])                                  # tap w
    acc = acc + dot(p[_PAD + 1:_PAD + 1 + HW, :] * mwp, wa_ref[2])  # tap w+1
    a = _hardswish(_affine(acc, sba_ref[...]))                     # (HW, c_)

    # --- CrossConv.cv2: (3,1) conv along H, pad (1,0), BN + hardswish ---------
    qbuf[...] = jnp.zeros_like(qbuf)
    qbuf[pl.ds(W, HW), :] = a
    q = qbuf[...]
    acc = dot(q[0:HW, :], wb_ref[0])                               # tap h-1
    acc = acc + dot(a, wb_ref[1])                                  # tap h
    acc = acc + dot(q[2 * W:2 * W + HW, :], wb_ref[2])             # tap h+1
    bb = _hardswish(_affine(acc, sbb_ref[...]))

    tm = t + bb                          # CrossConv shortcut add

    # --- y1 = cv3(tm) (1x1, no bias); post-concat BN + LeakyReLU(0.1) ---------
    y1 = dot(tm, w3_ref[...])
    z1 = _leaky(_affine(y1, sbn1_ref[...]))   # BN channels [:c_]
    z2 = _leaky(_affine(y2, sbn2_ref[...]))   # BN channels [c_:]

    # --- cv4 over concat([z1, z2]) realized as split matmul + BN + hardswish --
    out = dot(z1, w4a_ref[...]) + dot(z2, w4b_ref[...])
    out = _hardswish(_affine(out, sb4_ref[...]))

    o_ref[0] = out.astype(o_ref.dtype)


# ----------------------------------------------------------------------------
# Parameter preparation (glue)
# ----------------------------------------------------------------------------
def fold_bn(gamma, beta, mean, var, eps=_EPS):
    scale = gamma / jnp.sqrt(var + eps)
    return scale, beta - mean * scale


def _pack_sb(scale, bias):  # -> (2, C): row0 scale, row1 bias
    return jnp.stack([scale, bias]).astype(jnp.float32)


def w1x1_to_mat(w):   # (Cout, Cin, 1, 1) -> (Cin, Cout)
    return jnp.transpose(w[:, :, 0, 0], (1, 0))


def w1xk_taps(w):     # (Cout, Cin, 1, K) -> (K, Cin, Cout)
    return jnp.transpose(w[:, :, 0, :], (2, 1, 0))


def wkx1_taps(w):     # (Cout, Cin, K, 1) -> (K, Cin, Cout)
    return jnp.transpose(w[:, :, :, 0], (2, 1, 0))


def make_params(key, c1, c2, e=0.5):
    c_ = int(c2 * e)
    ks = jax.random.split(key, 11)

    def w(k, shape):
        return 0.1 * jax.random.normal(k, shape, jnp.float32)

    def bnp(k, c):
        k1, k2, k3, k4 = jax.random.split(k, 4)
        return (1.0 + 0.1 * jax.random.normal(k1, (c,), jnp.float32),   # gamma
                0.1 * jax.random.normal(k2, (c,), jnp.float32),         # beta
                0.1 * jax.random.normal(k3, (c,), jnp.float32),         # running_mean
                0.5 + 0.1 * jnp.abs(jax.random.normal(k4, (c,), jnp.float32)))  # var

    return {
        'cv1_w': w(ks[0], (c_, c1, 1, 1)), 'cv1_bn': bnp(ks[1], c_),   # ConvBnAct 1x1
        'cv2_w': w(ks[2], (c_, c1, 1, 1)),                              # 1x1, no bias
        'cv3_w': w(ks[3], (c_, c_, 1, 1)),                              # 1x1, no bias
        'cv4_w': w(ks[4], (c2, 2 * c_, 1, 1)), 'cv4_bn': bnp(ks[5], c2),  # ConvBnAct 1x1
        'bn': bnp(ks[6], 2 * c_),                                       # post-concat BN
        'm_cv1_w': w(ks[7], (c_, c_, 1, 3)), 'm_cv1_bn': bnp(ks[8], c_),  # CrossConv (1,3)
        'm_cv2_w': w(ks[9], (c_, c_, 3, 1)), 'm_cv2_bn': bnp(ks[10], c_),  # CrossConv (3,1)
    }


# ----------------------------------------------------------------------------
# Forward pass (YOLOC4, n=1, g=1, shortcut=True, act=hardswish)
# ----------------------------------------------------------------------------
def yoloc4_forward(x_nchw, raw, *, c2, e=0.5):
    n, c1, h, w = x_nchw.shape
    c_ = int(c2 * e)
    hw = h * w

    x = jnp.transpose(x_nchw, (0, 2, 3, 1)).reshape(n, hw, c1)   # NHWC, flat spatial

    # valid-masks for the width-conv halo taps (zero where the tap would wrap rows)
    col = jnp.arange(hw, dtype=jnp.int32) % w
    mwm = (col != 0).astype(jnp.float32).reshape(hw, 1)
    mwp = (col != w - 1).astype(jnp.float32).reshape(hw, 1)

    w1 = w1x1_to_mat(raw['cv1_w'])
    w2 = w1x1_to_mat(raw['cv2_w'])
    w3 = w1x1_to_mat(raw['cv3_w'])
    w4 = w1x1_to_mat(raw['cv4_w'])            # (2*c_, c2)
    w4a, w4b = w4[:c_], w4[c_:]
    wa = w1xk_taps(raw['m_cv1_w'])            # (3, c_, c_)
    wb = wkx1_taps(raw['m_cv2_w'])            # (3, c_, c_)

    sb1 = _pack_sb(*fold_bn(*raw['cv1_bn']))
    sba = _pack_sb(*fold_bn(*raw['m_cv1_bn']))
    sbb = _pack_sb(*fold_bn(*raw['m_cv2_bn']))
    bns, bnb = fold_bn(*raw['bn'])
    sbn1 = _pack_sb(bns[:c_], bnb[:c_])
    sbn2 = _pack_sb(bns[c_:], bnb[c_:])
    sb4 = _pack_sb(*fold_bn(*raw['cv4_bn']))

    kernel = functools.partial(_yoloc4_kernel, H=h, W=w)

    def cvec(c):
        return pl.BlockSpec((2, c), lambda i: (0, 0))

    out = pl.pallas_call(
        kernel,
        out_shape=jax.ShapeDtypeStruct((n, hw, c2), x_nchw.dtype),
        grid_spec=pltpu.PrefetchScalarGridSpec(
            num_scalar_prefetch=0,
            grid=(n,),
            in_specs=[
                pl.BlockSpec((1, hw, c1), lambda i: (i, 0, 0)),   # x
                pl.BlockSpec((hw, 1), lambda i: (0, 0)),          # mask w-1
                pl.BlockSpec((hw, 1), lambda i: (0, 0)),          # mask w+1
                pl.BlockSpec((c1, c_), lambda i: (0, 0)),         # w1 (cv1)
                pl.BlockSpec((c1, c_), lambda i: (0, 0)),         # w2 (cv2)
                pl.BlockSpec((3, c_, c_), lambda i: (0, 0, 0)),   # wa (CrossConv 1x3)
                pl.BlockSpec((3, c_, c_), lambda i: (0, 0, 0)),   # wb (CrossConv 3x1)
                pl.BlockSpec((c_, c_), lambda i: (0, 0)),         # w3 (cv3)
                pl.BlockSpec((c_, c2), lambda i: (0, 0)),         # w4a
                pl.BlockSpec((c_, c2), lambda i: (0, 0)),         # w4b
                cvec(c_), cvec(c_), cvec(c_), cvec(c_), cvec(c_),  # sb1 sba sbb sbn1 sbn2
                cvec(c2),                                          # sb4
            ],
            out_specs=pl.BlockSpec((1, hw, c2), lambda i: (i, 0, 0)),
            scratch_shapes=[
                pltpu.VMEM((hw + 2 * _PAD, c_), jnp.float32),  # width-halo buffer
                pltpu.VMEM((hw + 2 * w, c_), jnp.float32),     # height-halo buffer
            ],
        ),
        compiler_params=pltpu.CompilerParams(
            dimension_semantics=("parallel",)),
    )(x, mwm, mwp, w1, w2, wa, wb, w3, w4a, w4b,
      sb1, sba, sbb, sbn1, sbn2, sb4)

    return jnp.transpose(out.reshape(n, h, w, c2), (0, 3, 1, 2))   # back to NCHW


# ----------------------------------------------------------------------------
# Pure-JAX reference (lax.conv) for verification
# ----------------------------------------------------------------------------
def ref_forward(x, raw, *, c2, e=0.5, eps=_EPS):
    def conv(a, wt, pad=((0, 0), (0, 0))):
        return lax.conv_general_dilated(
            a, wt, (1, 1), pad, dimension_numbers=('NCHW', 'OIHW', 'NCHW'))

    def bn(a, p):
        gamma, beta, mean, var = p
        s = gamma / jnp.sqrt(var + eps)
        return a * s[None, :, None, None] + (beta - mean * s)[None, :, None, None]

    hswish = lambda v: v * jnp.clip(v + 3.0, 0.0, 6.0) / 6.0
    leaky = lambda v: jnp.where(v > 0, v, 0.1 * v)

    t = hswish(bn(conv(x, raw['cv1_w']), raw['cv1_bn']))
    a = hswish(bn(conv(t, raw['m_cv1_w'], pad=((0, 0), (1, 1))), raw['m_cv1_bn']))
    b = hswish(bn(conv(a, raw['m_cv2_w'], pad=((1, 1), (0, 0))), raw['m_cv2_bn']))
    tm = t + b                      # CrossConv shortcut
    y1 = conv(tm, raw['cv3_w'])
    y2 = conv(x, raw['cv2_w'])
    z = leaky(bn(jnp.concatenate([y1, y2], axis=1), raw['bn']))
    return hswish(bn(conv(z, raw['cv4_w']), raw['cv4_bn']))


if __name__ == "__main__":
    key = jax.random.PRNGKey(0)
    kx, kp = jax.random.split(key)

    N, C1, H, W = 4, 16, 16, 16
    C2, E = 16, 0.5                 # c_ = 8, concat width = 16

    x = jax.random.normal(kx, (N, C1, H, W), jnp.float32)
    raw = make_params(kp, C1, C2, e=E)

    fwd = jax.jit(functools.partial(yoloc4_forward, c2=C2, e=E))
    out = jax.block_until_ready(fwd(x, raw))

    ref = ref_forward(x, raw, c2=C2, e=E)
    assert out.shape == ref.shape == (N, C2, H, W)
    max_err = float(jnp.max(jnp.abs(out - ref)))
    assert jnp.allclose(out, ref, atol=1e-3, rtol=1e-3), f"max_err={max_err}"

    print("KERNEL_OK")
</pallas_src>

<mosaic_0001>
module attributes {stable_mosaic.version = 11 : i64} {
  func.func @_yoloc4_kernel(%arg0: i32, %arg1: memref<1x256x16xf32, #tpu.memory_space<vmem>>, %arg2: memref<256x1xf32, #tpu.memory_space<vmem>>, %arg3: memref<256x1xf32, #tpu.memory_space<vmem>>, %arg4: memref<16x8xf32, #tpu.memory_space<vmem>>, %arg5: memref<16x8xf32, #tpu.memory_space<vmem>>, %arg6: memref<3x8x8xf32, #tpu.memory_space<vmem>>, %arg7: memref<3x8x8xf32, #tpu.memory_space<vmem>>, %arg8: memref<8x8xf32, #tpu.memory_space<vmem>>, %arg9: memref<8x16xf32, #tpu.memory_space<vmem>>, %arg10: memref<8x16xf32, #tpu.memory_space<vmem>>, %arg11: memref<2x8xf32, #tpu.memory_space<vmem>>, %arg12: memref<2x8xf32, #tpu.memory_space<vmem>>, %arg13: memref<2x8xf32, #tpu.memory_space<vmem>>, %arg14: memref<2x8xf32, #tpu.memory_space<vmem>>, %arg15: memref<2x8xf32, #tpu.memory_space<vmem>>, %arg16: memref<2x16xf32, #tpu.memory_space<vmem>>, %arg17: memref<1x256x16xf32, #tpu.memory_space<vmem>>, %arg18: memref<272x8xf32, #tpu.memory_space<vmem>>, %arg19: memref<288x8xf32, #tpu.memory_space<vmem>>) attributes {dimension_semantics = [#tpu.dimension_semantics<parallel>], iteration_bounds = array<i64: 4>, scalar_prefetch = 0 : i64, scratch_operands = 2 : i64, tpu.core_type = #tpu.core_type<tc>, window_params = [{transform_indices = @transform_0, window_bounds = array<i64: 1, 256, 16>}, {pipeline_mode = #tpu.pipeline_mode<synchronous>, transform_indices = @transform_1, window_bounds = array<i64: 256, 1>}, {pipeline_mode = #tpu.pipeline_mode<synchronous>, transform_indices = @transform_2, window_bounds = array<i64: 256, 1>}, {pipeline_mode = #tpu.pipeline_mode<synchronous>, transform_indices = @transform_3, window_bounds = array<i64: 16, 8>}, {pipeline_mode = #tpu.pipeline_mode<synchronous>, transform_indices = @transform_4, window_bounds = array<i64: 16, 8>}, {pipeline_mode = #tpu.pipeline_mode<synchronous>, transform_indices = @transform_5, window_bounds = array<i64: 3, 8, 8>}, {pipeline_mode = #tpu.pipeline_mode<synchronous>, transform_indices = @transform_6, window_bounds = array<i64: 3, 8, 8>}, {pipeline_mode = #tpu.pipeline_mode<synchronous>, transform_indices = @transform_7, window_bounds = array<i64: 8, 8>}, {pipeline_mode = #tpu.pipeline_mode<synchronous>, transform_indices = @transform_8, window_bounds = array<i64: 8, 16>}, {pipeline_mode = #tpu.pipeline_mode<synchronous>, transform_indices = @transform_9, window_bounds = array<i64: 8, 16>}, {pipeline_mode = #tpu.pipeline_mode<synchronous>, transform_indices = @transform_10, window_bounds = array<i64: 2, 8>}, {pipeline_mode = #tpu.pipeline_mode<synchronous>, transform_indices = @transform_11, window_bounds = array<i64: 2, 8>}, {pipeline_mode = #tpu.pipeline_mode<synchronous>, transform_indices = @transform_12, window_bounds = array<i64: 2, 8>}, {pipeline_mode = #tpu.pipeline_mode<synchronous>, transform_indices = @transform_13, window_bounds = array<i64: 2, 8>}, {pipeline_mode = #tpu.pipeline_mode<synchronous>, transform_indices = @transform_14, window_bounds = array<i64: 2, 8>}, {pipeline_mode = #tpu.pipeline_mode<synchronous>, transform_indices = @transform_15, window_bounds = array<i64: 2, 16>}, {transform_indices = @transform_16, window_bounds = array<i64: 1, 256, 16>}]} {
    %c0 = arith.constant 0 : index
    %c0_0 = arith.constant 0 : index
    %c0_1 = arith.constant 0 : index
    %0 = vector.load %arg1[%c0, %c0_0, %c0_1] : memref<1x256x16xf32, #tpu.memory_space<vmem>>, vector<1x256x16xf32>
    %1 = vector.shape_cast %0 : vector<1x256x16xf32> to vector<256x16xf32>
    %c0_2 = arith.constant 0 : index
    %c0_3 = arith.constant 0 : index
    %2 = vector.load %arg2[%c0_2, %c0_3] : memref<256x1xf32, #tpu.memory_space<vmem>>, vector<256x1xf32>
    %c0_4 = arith.constant 0 : index
    %c0_5 = arith.constant 0 : index
    %3 = vector.load %arg3[%c0_4, %c0_5] : memref<256x1xf32, #tpu.memory_space<vmem>>, vector<256x1xf32>
    %c0_6 = arith.constant 0 : index
    %c0_7 = arith.constant 0 : index
    %4 = vector.load %arg4[%c0_6, %c0_7] : memref<16x8xf32, #tpu.memory_space<vmem>>, vector<16x8xf32>
    %cst = arith.constant dense<0.000000e+00> : vector<256x8xf32>
    %5 = tpu.matmul %1, %4, %cst {dimension_numbers = #tpu.dot_dimension_numbers<[1], [0], [0], [1], [0, 0, 1, 1], [], []>} : vector<256x16xf32>, vector<16x8xf32>, vector<256x8xf32> -> vector<256x8xf32>
    %c0_8 = arith.constant 0 : index
    %c0_9 = arith.constant 0 : index
    %6 = vector.load %arg11[%c0_8, %c0_9] : memref<2x8xf32, #tpu.memory_space<vmem>>, vector<2x8xf32>
    %7 = vector.extract_strided_slice %6 {offsets = [0, 0], sizes = [1, 8], strides = [1, 1]} : vector<2x8xf32> to vector<1x8xf32>
    %8 = vector.broadcast %7 : vector<1x8xf32> to vector<256x8xf32>
    %9 = arith.mulf %5, %8 : vector<256x8xf32>
    %10 = vector.extract_strided_slice %6 {offsets = [1, 0], sizes = [1, 8], strides = [1, 1]} : vector<2x8xf32> to vector<1x8xf32>
    %11 = vector.broadcast %10 : vector<1x8xf32> to vector<256x8xf32>
    %12 = arith.addf %9, %11 : vector<256x8xf32>
    %cst_10 = arith.constant 3.000000e+00 : f32
    %13 = vector.broadcast %cst_10 : f32 to vector<256x8xf32>
    %14 = arith.addf %12, %13 : vector<256x8xf32>
    %cst_11 = arith.constant 0.000000e+00 : f32
    %cst_12 = arith.constant 6.000000e+00 : f32
    %15 = vector.broadcast %cst_11 : f32 to vector<256x8xf32>
    %16 = arith.maximumf %15, %14 : vector<256x8xf32>
    %17 = vector.broadcast %cst_12 : f32 to vector<256x8xf32>
    %18 = arith.minimumf %17, %16 : vector<256x8xf32>
    %19 = arith.mulf %12, %18 : vector<256x8xf32>
    %cst_13 = arith.constant 0.166666672 : f32
    %20 = vector.broadcast %cst_13 : f32 to vector<256x8xf32>
    %21 = arith.mulf %19, %20 : vector<256x8xf32>
    %c0_14 = arith.constant 0 : index
    %c0_15 = arith.constant 0 : index
    %22 = vector.load %arg5[%c0_14, %c0_15] : memref<16x8xf32, #tpu.memory_space<vmem>>, vector<16x8xf32>
    %cst_16 = arith.constant dense<0.000000e+00> : vector<256x8xf32>
    %23 = tpu.matmul %1, %22, %cst_16 {dimension_numbers = #tpu.dot_dimension_numbers<[1], [0], [0], [1], [0, 0, 1, 1], [], []>} : vector<256x16xf32>, vector<16x8xf32>, vector<256x8xf32> -> vector<256x8xf32>
    %cst_17 = arith.constant 0.000000e+00 : f32
    %24 = vector.broadcast %cst_17 : f32 to vector<272x8xf32>
    %c0_18 = arith.constant 0 : index
    %c0_19 = arith.constant 0 : index
    %25 = vector.load %arg18[%c0_18, %c0_19] : memref<272x8xf32, #tpu.memory_space<vmem>>, vector<272x8xf32>
    tpu.vector_store %arg18[%c0_18, %c0_19], %24 {strides = array<i32>} : memref<272x8xf32, #tpu.memory_space<vmem>>, vector<272x8xf32>,
    %c8 = arith.constant 8 : index
    %c0_20 = arith.constant 0 : index
    %26 = vector.load %arg18[%c8, %c0_20] : memref<272x8xf32, #tpu.memory_space<vmem>>, vector<256x8xf32>
    tpu.vector_store %arg18[%c8, %c0_20], %21 {strides = array<i32>} : memref<272x8xf32, #tpu.memory_space<vmem>>, vector<256x8xf32>,
    %c0_21 = arith.constant 0 : index
    %c0_22 = arith.constant 0 : index
    %27 = vector.load %arg18[%c0_21, %c0_22] : memref<272x8xf32, #tpu.memory_space<vmem>>, vector<272x8xf32>
    %28 = vector.extract_strided_slice %27 {offsets = [7, 0], sizes = [256, 8], strides = [1, 1]} : vector<272x8xf32> to vector<256x8xf32>
    %29 = vector.broadcast %2 : vector<256x1xf32> to vector<256x8xf32>
    %30 = arith.mulf %28, %29 : vector<256x8xf32>
    %c0_23 = arith.constant 0 : index
    %c0_24 = arith.constant 0 : index
    %c0_25 = arith.constant 0 : index
    %31 = vector.load %arg6[%c0_23, %c0_24, %c0_25] : memref<3x8x8xf32, #tpu.memory_space<vmem>>, vector<1x8x8xf32>
    %32 = vector.shape_cast %31 : vector<1x8x8xf32> to vector<8x8xf32>
    %cst_26 = arith.constant dense<0.000000e+00> : vector<256x8xf32>
    %33 = tpu.matmul %30, %32, %cst_26 {dimension_numbers = #tpu.dot_dimension_numbers<[1], [0], [0], [1], [0, 0, 1, 1], [], []>} : vector<256x8xf32>, vector<8x8xf32>, vector<256x8xf32> -> vector<256x8xf32>
    %c1 = arith.constant 1 : index
    %c0_27 = arith.constant 0 : index
    %c0_28 = arith.constant 0 : index
    %34 = vector.load %arg6[%c1, %c0_27, %c0_28] : memref<3x8x8xf32, #tpu.memory_space<vmem>>, vector<1x8x8xf32>
    %35 = vector.shape_cast %34 : vector<1x8x8xf32> to vector<8x8xf32>
    %cst_29 = arith.constant dense<0.000000e+00> : vector<256x8xf32>
    %36 = tpu.matmul %21, %35, %cst_29 {dimension_numbers = #tpu.dot_dimension_numbers<[1], [0], [0], [1], [0, 0, 1, 1], [], []>} : vector<256x8xf32>, vector<8x8xf32>, vector<256x8xf32> -> vector<256x8xf32>
    %37 = arith.addf %33, %36 : vector<256x8xf32>
    %38 = vector.extract_strided_slice %27 {offsets = [9, 0], sizes = [256, 8], strides = [1, 1]} : vector<272x8xf32> to vector<256x8xf32>
    %39 = vector.broadcast %3 : vector<256x1xf32> to vector<256x8xf32>
    %40 = arith.mulf %38, %39 : vector<256x8xf32>
    %c2 = arith.constant 2 : index
    %c0_30 = arith.constant 0 : index
    %c0_31 = arith.constant 0 : index
    %41 = vector.load %arg6[%c2, %c0_30, %c0_31] : memref<3x8x8xf32, #tpu.memory_space<vmem>>, vector<1x8x8xf32>
    %42 = vector.shape_cast %41 : vector<1x8x8xf32> to vector<8x8xf32>
    %cst_32 = arith.constant dense<0.000000e+00> : vector<256x8xf32>
    %43 = tpu.matmul %40, %42, %cst_32 {dimension_numbers = #tpu.dot_dimension_numbers<[1], [0], [0], [1], [0, 0, 1, 1], [], []>} : vector<256x8xf32>, vector<8x8xf32>, vector<256x8xf32> -> vector<256x8xf32>
    %44 = arith.addf %37, %43 : vector<256x8xf32>
    %c0_33 = arith.constant 0 : index
    %c0_34 = arith.constant 0 : index
    %45 = vector.load %arg12[%c0_33, %c0_34] : memref<2x8xf32, #tpu.memory_space<vmem>>, vector<2x8xf32>
    %46 = vector.extract_strided_slice %45 {offsets = [0, 0], sizes = [1, 8], strides = [1, 1]} : vector<2x8xf32> to vector<1x8xf32>
    %47 = vector.broadcast %46 : vector<1x8xf32> to vector<256x8xf32>
    %48 = arith.mulf %44, %47 : vector<256x8xf32>
    %49 = vector.extract_strided_slice %45 {offsets = [1, 0], sizes = [1, 8], strides = [1, 1]} : vector<2x8xf32> to vector<1x8xf32>
    %50 = vector.broadcast %49 : vector<1x8xf32> to vector<256x8xf32>
    %51 = arith.addf %48, %50 : vector<256x8xf32>
    %cst_35 = arith.constant 3.000000e+00 : f32
    %52 = vector.broadcast %cst_35 : f32 to vector<256x8xf32>
    %53 = arith.addf %51, %52 : vector<256x8xf32>
    %cst_36 = arith.constant 0.000000e+00 : f32
    %cst_37 = arith.constant 6.000000e+00 : f32
    %54 = vector.broadcast %cst_36 : f32 to vector<256x8xf32>
    %55 = arith.maximumf %54, %53 : vector<256x8xf32>
    %56 = vector.broadcast %cst_37 : f32 to vector<256x8xf32>
    %57 = arith.minimumf %56, %55 : vector<256x8xf32>
    %58 = arith.mulf %51, %57 : vector<256x8xf32>
    %cst_38 = arith.constant 0.166666672 : f32
    %59 = vector.broadcast %cst_38 : f32 to vector<256x8xf32>
    %60 = arith.mulf %58, %59 : vector<256x8xf32>
    %cst_39 = arith.constant 0.000000e+00 : f32
    %61 = vector.broadcast %cst_39 : f32 to vector<288x8xf32>
    %c0_40 = arith.constant 0 : index
    %c0_41 = arith.constant 0 : index
    %62 = vector.load %arg19[%c0_40, %c0_41] : memref<288x8xf32, #tpu.memory_space<vmem>>, vector<288x8xf32>
    tpu.vector_store %arg19[%c0_40, %c0_41], %61 {strides = array<i32>} : memref<288x8xf32, #tpu.memory_space<vmem>>, vector<288x8xf32>,
    %c16 = arith.constant 16 : index
    %c0_42 = arith.constant 0 : index
    %63 = vector.load %arg19[%c16, %c0_42] : memref<288x8xf32, #tpu.memory_space<vmem>>, vector<256x8xf32>
    tpu.vector_store %arg19[%c16, %c0_42], %60 {strides = array<i32>} : memref<288x8xf32, #tpu.memory_space<vmem>>, vector<256x8xf32>,
    %c0_43 = arith.constant 0 : index
    %c0_44 = arith.constant 0 : index
    %64 = vector.load %arg19[%c0_43, %c0_44] : memref<288x8xf32, #tpu.memory_space<vmem>>, vector<288x8xf32>
    %65 = vector.extract_strided_slice %64 {offsets = [0, 0], sizes = [256, 8], strides = [1, 1]} : vector<288x8xf32> to vector<256x8xf32>
    %c0_45 = arith.constant 0 : index
    %c0_46 = arith.constant 0 : index
    %c0_47 = arith.constant 0 : index
    %66 = vector.load %arg7[%c0_45, %c0_46, %c0_47] : memref<3x8x8xf32, #tpu.memory_space<vmem>>, vector<1x8x8xf32>
    %67 = vector.shape_cast %66 : vector<1x8x8xf32> to vector<8x8xf32>
    %cst_48 = arith.constant dense<0.000000e+00> : vector<256x8xf32>
    %68 = tpu.matmul %65, %67, %cst_48 {dimension_numbers = #tpu.dot_dimension_numbers<[1], [0], [0], [1], [0, 0, 1, 1], [], []>} : vector<256x8xf32>, vector<8x8xf32>, vector<256x8xf32> -> vector<256x8xf32>
    %c1_49 = arith.constant 1 : index
    %c0_50 = arith.constant 0 : index
    %c0_51 = arith.constant 0 : index
    %69 = vector.load %arg7[%c1_49, %c0_50, %c0_51] : memref<3x8x8xf32, #tpu.memory_space<vmem>>, vector<1x8x8xf32>
    %70 = vector.shape_cast %69 : vector<1x8x8xf32> to vector<8x8xf32>
    %cst_52 = arith.constant dense<0.000000e+00> : vector<256x8xf32>
    %71 = tpu.matmul %60, %70, %cst_52 {dimension_numbers = #tpu.dot_dimension_numbers<[1], [0], [0], [1], [0, 0, 1, 1], [], []>} : vector<256x8xf32>, vector<8x8xf32>, vector<256x8xf32> -> vector<256x8xf32>
    %72 = arith.addf %68, %71 : vector<256x8xf32>
    %73 = vector.extract_strided_slice %64 {offsets = [32, 0], sizes = [256, 8], strides = [1, 1]} : vector<288x8xf32> to vector<256x8xf32>
    %c2_53 = arith.constant 2 : index
    %c0_54 = arith.constant 0 : index
    %c0_55 = arith.constant 0 : index
    %74 = vector.load %arg7[%c2_53, %c0_54, %c0_55] : memref<3x8x8xf32, #tpu.memory_space<vmem>>, vector<1x8x8xf32>
    %75 = vector.shape_cast %74 : vector<1x8x8xf32> to vector<8x8xf32>
    %cst_56 = arith.constant dense<0.000000e+00> : vector<256x8xf32>
    %76 = tpu.matmul %73, %75, %cst_56 {dimension_numbers = #tpu.dot_dimension_numbers<[1], [0], [0], [1], [0, 0, 1, 1], [], []>} : vector<256x8xf32>, vector<8x8xf32>, vector<256x8xf32> -> vector<256x8xf32>
    %77 = arith.addf %72, %76 : vector<256x8xf32>
    %c0_57 = arith.constant 0 : index
    %c0_58 = arith.constant 0 : index
    %78 = vector.load %arg13[%c0_57, %c0_58] : memref<2x8xf32, #tpu.memory_space<vmem>>, vector<2x8xf32>
    %79 = vector.extract_strided_slice %78 {offsets = [0, 0], sizes = [1, 8], strides = [1, 1]} : vector<2x8xf32> to vector<1x8xf32>
    %80 = vector.broadcast %79 : vector<1x8xf32> to vector<256x8xf32>
    %81 = arith.mulf %77, %80 : vector<256x8xf32>
    %82 = vector.extract_strided_slice %78 {offsets = [1, 0], sizes = [1, 8], strides = [1, 1]} : vector<2x8xf32> to vector<1x8xf32>
    %83 = vector.broadcast %82 : vector<1x8xf32> to vector<256x8xf32>
    %84 = arith.addf %81, %83 : vector<256x8xf32>
    %cst_59 = arith.constant 3.000000e+00 : f32
    %85 = vector.broadcast %cst_59 : f32 to vector<256x8xf32>
    %86 = arith.addf %84, %85 : vector<256x8xf32>
    %cst_60 = arith.constant 0.000000e+00 : f32
    %cst_61 = arith.constant 6.000000e+00 : f32
    %87 = vector.broadcast %cst_60 : f32 to vector<256x8xf32>
    %88 = arith.maximumf %87, %86 : vector<256x8xf32>
    %89 = vector.broadcast %cst_61 : f32 to vector<256x8xf32>
    %90 = arith.minimumf %89, %88 : vector<256x8xf32>
    %91 = arith.mulf %84, %90 : vector<256x8xf32>
    %cst_62 = arith.constant 0.166666672 : f32
    %92 = vector.broadcast %cst_62 : f32 to vector<256x8xf32>
    %93 = arith.mulf %91, %92 : vector<256x8xf32>
    %94 = arith.addf %21, %93 : vector<256x8xf32>
    %c0_63 = arith.constant 0 : index
    %c0_64 = arith.constant 0 : index
    %95 = vector.load %arg8[%c0_63, %c0_64] : memref<8x8xf32, #tpu.memory_space<vmem>>, vector<8x8xf32>
    %cst_65 = arith.constant dense<0.000000e+00> : vector<256x8xf32>
    %96 = tpu.matmul %94, %95, %cst_65 {dimension_numbers = #tpu.dot_dimension_numbers<[1], [0], [0], [1], [0, 0, 1, 1], [], []>} : vector<256x8xf32>, vector<8x8xf32>, vector<256x8xf32> -> vector<256x8xf32>
    %c0_66 = arith.constant 0 : index
    %c0_67 = arith.constant 0 : index
    %97 = vector.load %arg14[%c0_66, %c0_67] : memref<2x8xf32, #tpu.memory_space<vmem>>, vector<2x8xf32>
    %98 = vector.extract_strided_slice %97 {offsets = [0, 0], sizes = [1, 8], strides = [1, 1]} : vector<2x8xf32> to vector<1x8xf32>
    %99 = vector.broadcast %98 : vector<1x8xf32> to vector<256x8xf32>
    %100 = arith.mulf %96, %99 : vector<256x8xf32>
    %101 = vector.extract_strided_slice %97 {offsets = [1, 0], sizes = [1, 8], strides = [1, 1]} : vector<2x8xf32> to vector<1x8xf32>
    %102 = vector.broadcast %101 : vector<1x8xf32> to vector<256x8xf32>
    %103 = arith.addf %100, %102 : vector<256x8xf32>
    %cst_68 = arith.constant 1.000000e-01 : f32
    %104 = vector.broadcast %cst_68 : f32 to vector<256x8xf32>
    %105 = arith.mulf %104, %103 : vector<256x8xf32>
    %106 = arith.maximumf %103, %105 : vector<256x8xf32>
    %c0_69 = arith.constant 0 : index
    %c0_70 = arith.constant 0 : index
    %107 = vector.load %arg15[%c0_69, %c0_70] : memref<2x8xf32, #tpu.memory_space<vmem>>, vector<2x8xf32>
    %108 = vector.extract_strided_slice %107 {offsets = [0, 0], sizes = [1, 8], strides = [1, 1]} : vector<2x8xf32> to vector<1x8xf32>
    %109 = vector.broadcast %108 : vector<1x8xf32> to vector<256x8xf32>
    %110 = arith.mulf %23, %109 : vector<256x8xf32>
    %111 = vector.extract_strided_slice %107 {offsets = [1, 0], sizes = [1, 8], strides = [1, 1]} : vector<2x8xf32> to vector<1x8xf32>
    %112 = vector.broadcast %111 : vector<1x8xf32> to vector<256x8xf32>
    %113 = arith.addf %110, %112 : vector<256x8xf32>
    %cst_71 = arith.constant 1.000000e-01 : f32
    %114 = vector.broadcast %cst_71 : f32 to vector<256x8xf32>
    %115 = arith.mulf %114, %113 : vector<256x8xf32>
    %116 = arith.maximumf %113, %115 : vector<256x8xf32>
    %c0_72 = arith.constant 0 : index
    %c0_73 = arith.constant 0 : index
    %117 = vector.load %arg9[%c0_72, %c0_73] : memref<8x16xf32, #tpu.memory_space<vmem>>, vector<8x16xf32>
    %cst_74 = arith.constant dense<0.000000e+00> : vector<256x16xf32>
    %118 = tpu.matmul %106, %117, %cst_74 {dimension_numbers = #tpu.dot_dimension_numbers<[1], [0], [0], [1], [0, 0, 1, 1], [], []>} : vector<256x8xf32>, vector<8x16xf32>, vector<256x16xf32> -> vector<256x16xf32>
    %c0_75 = arith.constant 0 : index
    %c0_76 = arith.constant 0 : index
    %119 = vector.load %arg10[%c0_75, %c0_76] : memref<8x16xf32, #tpu.memory_space<vmem>>, vector<8x16xf32>
    %cst_77 = arith.constant dense<0.000000e+00> : vector<256x16xf32>
    %120 = tpu.matmul %116, %119, %cst_77 {dimension_numbers = #tpu.dot_dimension_numbers<[1], [0], [0], [1], [0, 0, 1, 1], [], []>} : vector<256x8xf32>, vector<8x16xf32>, vector<256x16xf32> -> vector<256x16xf32>
    %121 = arith.addf %118, %120 : vector<256x16xf32>
    %c0_78 = arith.constant 0 : index
    %c0_79 = arith.constant 0 : index
    %122 = vector.load %arg16[%c0_78, %c0_79] : memref<2x16xf32, #tpu.memory_space<vmem>>, vector<2x16xf32>
    %123 = vector.extract_strided_slice %122 {offsets = [0, 0], sizes = [1, 16], strides = [1, 1]} : vector<2x16xf32> to vector<1x16xf32>
    %124 = vector.broadcast %123 : vector<1x16xf32> to vector<256x16xf32>
    %125 = arith.mulf %121, %124 : vector<256x16xf32>
    %126 = vector.extract_strided_slice %122 {offsets = [1, 0], sizes = [1, 16], strides = [1, 1]} : vector<2x16xf32> to vector<1x16xf32>
    %127 = vector.broadcast %126 : vector<1x16xf32> to vector<256x16xf32>
    %128 = arith.addf %125, %127 : vector<256x16xf32>
    %cst_80 = arith.constant 3.000000e+00 : f32
    %129 = vector.broadcast %cst_80 : f32 to vector<256x16xf32>
    %130 = arith.addf %128, %129 : vector<256x16xf32>
    %cst_81 = arith.constant 0.000000e+00 : f32
    %cst_82 = arith.constant 6.000000e+00 : f32
    %131 = vector.broadcast %cst_81 : f32 to vector<256x16xf32>
    %132 = arith.maximumf %131, %130 : vector<256x16xf32>
    %133 = vector.broadcast %cst_82 : f32 to vector<256x16xf32>
    %134 = arith.minimumf %133, %132 : vector<256x16xf32>
    %135 = arith.mulf %128, %134 : vector<256x16xf32>
    %cst_83 = arith.constant 0.166666672 : f32
    %136 = vector.broadcast %cst_83 : f32 to vector<256x16xf32>
    %137 = arith.mulf %135, %136 : vector<256x16xf32>
    %c0_84 = arith.constant 0 : index
    %c0_85 = arith.constant 0 : index
    %c0_86 = arith.constant 0 : index
    %138 = vector.load %arg17[%c0_84, %c0_85, %c0_86] : memref<1x256x16xf32, #tpu.memory_space<vmem>>, vector<1x256x16xf32>
    %139 = vector.shape_cast %138 : vector<1x256x16xf32> to vector<256x16xf32>
    %140 = vector.shape_cast %137 : vector<256x16xf32> to vector<1x256x16xf32>
    tpu.vector_store %arg17[%c0_84, %c0_85, %c0_86], %140 {strides = array<i32>} : memref<1x256x16xf32, #tpu.memory_space<vmem>>, vector<1x256x16xf32>,
    return
  }
  func.func @transform_0(%arg0: i32) -> (i32, i32, i32) {
    %c0_i32 = arith.constant 0 : i32
    %c0_i32_0 = arith.constant 0 : i32
    %c0_i32_1 = arith.constant 0 : i32
    return %arg0, %c0_i32, %c0_i32_0 : i32, i32, i32
  }
  func.func @transform_1(%arg0: i32) -> (i32, i32) {
    %c0_i32 = arith.constant 0 : i32
    %c0_i32_0 = arith.constant 0 : i32
    %c0_i32_1 = arith.constant 0 : i32
    return %c0_i32, %c0_i32_0 : i32, i32
  }
  func.func @transform_2(%arg0: i32) -> (i32, i32) {
    %c0_i32 = arith.constant 0 : i32
    %c0_i32_0 = arith.constant 0 : i32
    %c0_i32_1 = arith.constant 0 : i32
    return %c0_i32, %c0_i32_0 : i32, i32
  }
  func.func @transform_3(%arg0: i32) -> (i32, i32) {
    %c0_i32 = arith.constant 0 : i32
    %c0_i32_0 = arith.constant 0 : i32
    %c0_i32_1 = arith.constant 0 : i32
    return %c0_i32, %c0_i32_0 : i32, i32
  }
  func.func @transform_4(%arg0: i32) -> (i32, i32) {
    %c0_i32 = arith.constant 0 : i32
    %c0_i32_0 = arith.constant 0 : i32
    %c0_i32_1 = arith.constant 0 : i32
    return %c0_i32, %c0_i32_0 : i32, i32
  }
  func.func @transform_5(%arg0: i32) -> (i32, i32, i32) {
    %c0_i32 = arith.constant 0 : i32
    %c0_i32_0 = arith.constant 0 : i32
    %c0_i32_1 = arith.constant 0 : i32
    %c0_i32_2 = arith.constant 0 : i32
    return %c0_i32, %c0_i32_0, %c0_i32_1 : i32, i32, i32
  }
  func.func @transform_6(%arg0: i32) -> (i32, i32, i32) {
    %c0_i32 = arith.constant 0 : i32
    %c0_i32_0 = arith.constant 0 : i32
    %c0_i32_1 = arith.constant 0 : i32
    %c0_i32_2 = arith.constant 0 : i32
    return %c0_i32, %c0_i32_0, %c0_i32_1 : i32, i32, i32
  }
  func.func @transform_7(%arg0: i32) -> (i32, i32) {
    %c0_i32 = arith.constant 0 : i32
    %c0_i32_0 = arith.constant 0 : i32
    %c0_i32_1 = arith.constant 0 : i32
    return %c0_i32, %c0_i32_0 : i32, i32
  }
  func.func @transform_8(%arg0: i32) -> (i32, i32) {
    %c0_i32 = arith.constant 0 : i32
    %c0_i32_0 = arith.constant 0 : i32
    %c0_i32_1 = arith.constant 0 : i32
    return %c0_i32, %c0_i32_0 : i32, i32
  }
  func.func @transform_9(%arg0: i32) -> (i32, i32) {
    %c0_i32 = arith.constant 0 : i32
    %c0_i32_0 = arith.constant 0 : i32
    %c0_i32_1 = arith.constant 0 : i32
    return %c0_i32, %c0_i32_0 : i32, i32
  }
  func.func @transform_10(%arg0: i32) -> (i32, i32) {
    %c0_i32 = arith.constant 0 : i32
    %c0_i32_0 = arith.constant 0 : i32
    %c0_i32_1 = arith.constant 0 : i32
    return %c0_i32, %c0_i32_0 : i32, i32
  }
  func.func @transform_11(%arg0: i32) -> (i32, i32) {
    %c0_i32 = arith.constant 0 : i32
    %c0_i32_0 = arith.constant 0 : i32
    %c0_i32_1 = arith.constant 0 : i32
    return %c0_i32, %c0_i32_0 : i32, i32
  }
  func.func @transform_12(%arg0: i32) -> (i32, i32) {
    %c0_i32 = arith.constant 0 : i32
    %c0_i32_0 = arith.constant 0 : i32
    %c0_i32_1 = arith.constant 0 : i32
    return %c0_i32, %c0_i32_0 : i32, i32
  }
  func.func @transform_13(%arg0: i32) -> (i32, i32) {
    %c0_i32 = arith.constant 0 : i32
    %c0_i32_0 = arith.constant 0 : i32
    %c0_i32_1 = arith.constant 0 : i32
    return %c0_i32, %c0_i32_0 : i32, i32
  }
  func.func @transform_14(%arg0: i32) -> (i32, i32) {
    %c0_i32 = arith.constant 0 : i32
    %c0_i32_0 = arith.constant 0 : i32
    %c0_i32_1 = arith.constant 0 : i32
    return %c0_i32, %c0_i32_0 : i32, i32
  }
  func.func @transform_15(%arg0: i32) -> (i32, i32) {
    %c0_i32 = arith.constant 0 : i32
    %c0_i32_0 = arith.constant 0 : i32
    %c0_i32_1 = arith.constant 0 : i32
    return %c0_i32, %c0_i32_0 : i32, i32
  }
  func.func @transform_16(%arg0: i32) -> (i32, i32, i32) {
    %c0_i32 = arith.constant 0 : i32
    %c0_i32_0 = arith.constant 0 : i32
    %c0_i32_1 = arith.constant 0 : i32
    return %arg0, %c0_i32, %c0_i32_0 : i32, i32, i32
  }
}

</mosaic_0001>

<bundles_post_ra>
// kernel: yoloc4_forward.1
= control target key start
LH: loop header
LB: loop body
LE: loop exit
PB: predicated region body
PF: predicated region fallthrough
CT: control target
= control target key end

     0   :  { %s7628_s21 = smov 0   ;;  %s10372_s0 = inlined_call_operand.vmem [shape: f32[4,256,16], index: 0, kind: input, shape index: {}]   ;;  %s10373_s1 = inlined_call_operand.vmem [shape: f32[256,1], index: 1, kind: input, shape index: {}]   ;;  %s10374_s2 = inlined_call_operand.vmem [shape: f32[256,1], index: 2, kind: input, shape index: {}]   ;;  %s10375_s3 = inlined_call_operand.vmem [shape: f32[16,8], index: 3, kind: input, shape index: {}]   ;;  %s10376_s4 = inlined_call_operand.vmem [shape: f32[16,8], index: 4, kind: input, shape index: {}]   ;;  %s10377_s5 = inlined_call_operand.vmem [shape: f32[3,8,8], index: 5, kind: input, shape index: {}]   ;;  %s10378_s6 = inlined_call_operand.vmem [shape: f32[3,8,8], index: 6, kind: input, shape index: {}]   ;;  %s10379_s7 = inlined_call_operand.vmem [shape: f32[8,8], index: 7, kind: input, shape index: {}]   ;;  %s10380_s8 = inlined_call_operand.vmem [shape: f32[8,16], index: 8, kind: input, shape index: {}]   ;;  %s10381_s9 = inlined_call_operand.vmem [shape: f32[8,16], index: 9, kind: input, shape index: {}]   ;;  %s10382_s10 = inlined_call_operand.vmem [shape: f32[2,8], index: 10, kind: input, shape index: {}]   ;;  %s10383_s11 = inlined_call_operand.vmem [shape: f32[2,8], index: 11, kind: input, shape index: {}]   ;;  %s10384_s12 = inlined_call_operand.vmem [shape: f32[2,8], index: 12, kind: input, shape index: {}]   ;;  %s10385_s13 = inlined_call_operand.vmem [shape: f32[2,8], index: 13, kind: input, shape index: {}]   ;;  %s10386_s14 = inlined_call_operand.vmem [shape: f32[2,8], index: 14, kind: input, shape index: {}]   ;;  %s10387_s15 = inlined_call_operand.vmem [shape: f32[2,16], index: 15, kind: input, shape index: {}]   ;;  %s10388_s16 = inlined_call_operand.vmem [shape: f32[4,256,16], index: 16, kind: output, shape index: {}]  }
   0x1   :  { %10440 = sst [smem:[#allocation79_spill]] %s10372_s0 }
   0x2 LB: > { %s6229_s22 = sadd.s32 4294967295, %s7539_s21   ;;  %p6233_p0 = scmp.ge.s32.totalorder %s7539_s21, 1  ;;  %s7539_s21 = sphi %s7628_s21, %s26_s21  }
   0x3   : > { %p462_p1 = scmp.lt.s32.totalorder %s7539_s21, 5 }
   0x5   : > { %p463_p2 = pnand %p6233_p0, %p462_p1 }
   0x7   : > { %466 = sbr.rel (%p463_p2) target bundleno = 1303 (0x517), region = 84 }
   0xc   : > { %v556_v0 = vld [vmem:[%s10373_s1 + $0x10] sm:$0xff]  ;;  %v554_v1 = vld [vmem:[%s10373_s1] sm:$0xff]  ;;  %v7645_v2 = vld [vmem:[%s10375_s3 + $0x8] sm:$0xff]  ;;  %p512_p3 = scmp.lt.s32.totalorder %s6229_s22, 3  ;;  %v7541_v3 = vmov 0   ;;  %vm1402_vm0 = vcmask 64512  }
   0xd   : > { %7532 = vset.pattern.permute.xlu1 %v7541_v3  ;;  %7531 = vset.pattern.permute.xlu0 %v7541_v3  ;;  %v7650_v4 = vld [vmem:[%s10375_s3] sm:$0xff]  ;;  %v7542_v5 = vmov 0.0   ;;  %v555_v7 = vld [vmem:[%s10373_s1 + $0x8] sm:$0xff]  ;;  %s10441_s25 = sld [smem:[#allocation79_spill]]  ;;  %vm620_vm1 = vcmask 130048   ;;  %v588_v12 = vld [vmem:[%s10374_s2 + $0x10] sm:$0xff] }
   0xe   : > { %1513 = vperm.xlu1 %7532, %v556_v0   ;;  %1505 = vperm.xlu0 %7531, %v554_v1   ;;  %s10672_s22 = smov (!%p512_p3, %s6229_s22), 3  ;;  %1403 = vst.msk [vmem:[#allocation2] sm:$0xff] %vm1402_vm0, %v7542_v5  ;;  %1404 = vst.msk [vmem:[#allocation2 + $0x8] sm:$0xff] %vm1402_vm0, %v7542_v5  ;;  %v586_v6 = vld [vmem:[%s10374_s2] sm:$0xff]  ;;  %v587_v13 = vld [vmem:[%s10374_s2 + $0x8] sm:$0xff]  ;;  %vm2118_vm2 = vcmask 1040384  }
   0xf   : > { %1405 = vst.msk [vmem:[#allocation2 + $0x10] sm:$0xff] %vm1402_vm0, %v7542_v5  ;;  %1406 = vst.msk [vmem:[#allocation2 + $0x18] sm:$0xff] %vm1402_vm0, %v7542_v5  ;;  %6963 = vmatprep.subr.mxu0 %v7645_v2  ;;  %7517 = vmatprep.subr.mxu1 %v7645_v2  ;;  %s6596_s20 = sshll.u32 %s10672_s22, 8  ;;  %v558_v18 = vld [vmem:[%s10373_s1 + $0x20] sm:$0xff]  ;;  %v557_v19 = vld [vmem:[%s10373_s1 + $0x18] sm:$0xff]  ;;  %vm1631_vm3 = vcmask 1046528  }
  0x10   : > { %1407 = vst.msk [vmem:[#allocation2 + $0x20] sm:$0xff] %vm1402_vm0, %v7542_v5  ;;  %1408 = vst.msk [vmem:[#allocation2 + $0x28] sm:$0xff] %vm1402_vm0, %v7542_v5  ;;  %6964 = vmatpush3.msra.mxu0 %v7645_v2  ;;  %7519 = vmatpush3.msra.mxu1 %v7645_v2  ;;  %v590_v24 = vld [vmem:[%s10374_s2 + $0x20] sm:$0xff]  ;;  %v589_v25 = vld [vmem:[%s10374_s2 + $0x18] sm:$0xff]  ;;  %s10214_s29 = scalar_lea.vmem %s10388_s16, %s6596_s20 }
  0x11   : > { %1409 = vst.msk [vmem:[#allocation2 + $0x30] sm:$0xff] %vm1402_vm0, %v7542_v5  ;;  %1410 = vst.msk [vmem:[#allocation2 + $0x38] sm:$0xff] %vm1402_vm0, %v7542_v5  ;;  %6965 = vmatprep.subr.mxu0 %v7650_v4  ;;  %7518 = vmatprep.subr.mxu1 %v7650_v4  ;;  %v560_v30 = vld [vmem:[%s10373_s1 + $0x30] sm:$0xff]  ;;  %v559_v31 = vld [vmem:[%s10373_s1 + $0x28] sm:$0xff] }
  0x12   : > { %1411 = vst.msk [vmem:[#allocation2 + $0x40] sm:$0xff] %vm1402_vm0, %v7542_v5  ;;  %1412 = vst.msk [vmem:[#allocation2 + $0x48] sm:$0xff] %vm1402_vm0, %v7542_v5  ;;  %2475 = vperm.xlu1 %7532, %v586_v6   ;;  %1509 = vperm.xlu0 %7531, %v555_v7   ;;  %v592_v36 = vld [vmem:[%s10374_s2 + $0x30] sm:$0xff]  ;;  %v591_v37 = vld [vmem:[%s10374_s2 + $0x28] sm:$0xff] }
  0x13   : > { %1413 = vst.msk [vmem:[#allocation2 + $0x50] sm:$0xff] %vm1402_vm0, %v7542_v5  ;;  %1414 = vst.msk [vmem:[#allocation2 + $0x58] sm:$0xff] %vm1402_vm0, %v7542_v5  ;;  %s7812_s26 = scalar_lea.vmem %s10441_s25, %s6596_s20  ;;  %6966 = vmatpush3.msra.mxu0 %v7650_v4  ;;  %7520 = vmatpush3.msra.mxu1 %v7650_v4  ;;  %v562_v42 = vld [vmem:[%s10373_s1 + $0x40] sm:$0xff]  ;;  %v561_v43 = vld [vmem:[%s10373_s1 + $0x38] sm:$0xff] }
  0x14   : > { %1415 = vst.msk [vmem:[#allocation2 + $0x60] sm:$0xff] %vm1402_vm0, %v7542_v5  ;;  %1416 = vst.msk [vmem:[#allocation2 + $0x68] sm:$0xff] %vm1402_vm0, %v7542_v5  ;;  %v7815_v8 = vld [vmem:[%s7812_s26] sm:$0xff]  ;;  %v7821_v10 = vld [vmem:[%s7812_s26 + $0x8] sm:$0xff] }
  0x15   : > { %1417 = vst.msk [vmem:[#allocation2 + $0x70] sm:$0xff] %vm1402_vm0, %v7542_v5  ;;  %1418 = vst.msk [vmem:[#allocation2 + $0x78] sm:$0xff] %vm1402_vm0, %v7542_v5  ;;  %v7818_v9 = vld [vmem:[%s7812_s26 + $0x80] sm:$0xff]  ;;  %v7826_v11 = vld [vmem:[%s7812_s26 + $0x88] sm:$0xff]  ;;  %6967 = vmatprep.mubr.msk.f32.mxu0 %vm620_vm1, %v7815_v8 }
  0x16   : > { %1419 = vst.msk [vmem:[#allocation2 + $0x80] sm:$0xff] %vm1402_vm0, %v7542_v5  ;;  %1420 = vst.msk [vmem:[#allocation2 + $0x88] sm:$0xff] %vm1402_vm0, %v7542_v5  ;;  %6991 = vmatprep.mubr.msk.f32.mxu1 %vm620_vm1, %v7818_v9  ;;  %v7839_v14 = vld [vmem:[%s7812_s26 + $0x10] sm:$0xff]  ;;  %6968 = vmatmul.mubr.msk.f32.vlgmr.msra.gmra.mxu0 %vm620_vm1, %v7821_v10  ;;  %v7849_v16 = vld [vmem:[%s7812_s26 + $0x18] sm:$0xff] }
  0x17   : > { %1421 = vst.msk [vmem:[#allocation2 + $0x90] sm:$0xff] %vm1402_vm0, %v7542_v5  ;;  %1422 = vst.msk [vmem:[#allocation2 + $0x98] sm:$0xff] %vm1402_vm0, %v7542_v5  ;;  %v7842_v15 = vld [vmem:[%s7812_s26 + $0x90] sm:$0xff]  ;;  %6992 = vmatmul.mubr.msk.f32.vlgmr.msra.gmra.mxu1 %vm620_vm1, %v7826_v11  ;;  %2483 = vperm.xlu1 %7532, %v588_v12   ;;  %v7852_v17 = vld [vmem:[%s7812_s26 + $0x98] sm:$0xff] }
  0x18   : > { %1423 = vst.msk [vmem:[#allocation2 + $0xa0] sm:$0xff] %vm1402_vm0, %v7542_v5  ;;  %1424 = vst.msk [vmem:[#allocation2 + $0xa8] sm:$0xff] %vm1402_vm0, %v7542_v5  ;;  %2479 = vperm.xlu0 %7531, %v587_v13   ;;  %6970 = vmatprep.mubr.msk.f32.mxu0 %vm620_vm1, %v7839_v14  ;;  %v7865_v20 = vld [vmem:[%s7812_s26 + $0x20] sm:$0xff]  ;;  %v7875_v22 = vld [vmem:[%s7812_s26 + $0x28] sm:$0xff] }
  0x19   : > { %1425 = vst.msk [vmem:[#allocation2 + $0xb0] sm:$0xff] %vm1402_vm0, %v7542_v5  ;;  %1426 = vst.msk [vmem:[#allocation2 + $0xb8] sm:$0xff] %vm1402_vm0, %v7542_v5  ;;  %6994 = vmatprep.mubr.msk.f32.mxu1 %vm620_vm1, %v7842_v15  ;;  %v7868_v21 = vld [vmem:[%s7812_s26 + $0xa0] sm:$0xff]  ;;  %v7878_v23 = vld [vmem:[%s7812_s26 + $0xa8] sm:$0xff] }
  0x1a   : > { %1427 = vst.msk [vmem:[#allocation2 + $0xc0] sm:$0xff] %vm1402_vm0, %v7542_v5  ;;  %1428 = vst.msk [vmem:[#allocation2 + $0xc8] sm:$0xff] %vm1402_vm0, %v7542_v5  ;;  %6971 = vmatmul.mubr.msk.f32.gmra.mxu0 %vm620_vm1, %v7849_v16  ;;  %v7891_v26 = vld [vmem:[%s7812_s26 + $0x30] sm:$0xff]  ;;  %v7901_v28 = vld [vmem:[%s7812_s26 + $0x38] sm:$0xff] }
  0x1b   : > { %1429 = vst.msk [vmem:[#allocation2 + $0xd0] sm:$0xff] %vm1402_vm0, %v7542_v5  ;;  %1430 = vst.msk [vmem:[#allocation2 + $0xd8] sm:$0xff] %vm1402_vm0, %v7542_v5  ;;  %6995 = vmatmul.mubr.msk.f32.gmra.mxu1 %vm620_vm1, %v7852_v17  ;;  %1521 = vperm.xlu1 %7532, %v558_v18   ;;  %v7894_v27 = vld [vmem:[%s7812_s26 + $0xb0] sm:$0xff]  ;;  %v7904_v29 = vld [vmem:[%s7812_s26 + $0xb8] sm:$0xff] }
  0x1c   : > { %1431 = vst.msk [vmem:[#allocation2 + $0xe0] sm:$0xff] %vm1402_vm0, %v7542_v5  ;;  %1432 = vst.msk [vmem:[#allocation2 + $0xe8] sm:$0xff] %vm1402_vm0, %v7542_v5  ;;  %1517 = vperm.xlu0 %7531, %v557_v19   ;;  %6973 = vmatprep.mubr.msk.f32.mxu0 %vm620_vm1, %v7865_v20  ;;  %v7917_v32 = vld [vmem:[%s7812_s26 + $0x40] sm:$0xff]  ;;  %v7927_v34 = vld [vmem:[%s7812_s26 + $0x48] sm:$0xff] }
  0x1d   : > { %1433 = vst.msk [vmem:[#allocation2 + $0xf0] sm:$0xff] %vm1402_vm0, %v7542_v5  ;;  %1434 = vst.msk [vmem:[#allocation2 + $0xf8] sm:$0xff] %vm1402_vm0, %v7542_v5  ;;  %6997 = vmatprep.mubr.msk.f32.mxu1 %vm620_vm1, %v7868_v21  ;;  %v7920_v33 = vld [vmem:[%s7812_s26 + $0xc0] sm:$0xff]  ;;  %v7930_v35 = vld [vmem:[%s7812_s26 + $0xc8] sm:$0xff] }
  0x1e   : > { %1435 = vst.msk [vmem:[#allocation2 + $0x100] sm:$0xff] %vm1402_vm0, %v7542_v5  ;;  %1436 = vst.msk [vmem:[#allocation2 + $0x108] sm:$0xff] %vm1402_vm0, %v7542_v5  ;;  %6974 = vmatmul.mubr.msk.f32.gmra.mxu0 %vm620_vm1, %v7875_v22  ;;  %v7943_v38 = vld [vmem:[%s7812_s26 + $0x50] sm:$0xff]  ;;  %v7953_v40 = vld [vmem:[%s7812_s26 + $0x58] sm:$0xff] }
  0x1f   : > { %3384 = vst.msk [vmem:[#allocation3] sm:$0xff] %vm1402_vm0, %v7542_v5  ;;  %3385 = vst.msk [vmem:[#allocation3 + $0x8] sm:$0xff] %vm1402_vm0, %v7542_v5  ;;  %6998 = vmatmul.mubr.msk.f32.gmra.mxu1 %vm620_vm1, %v7878_v23  ;;  %2491 = vperm.xlu1 %7532, %v590_v24   ;;  %v7946_v39 = vld [vmem:[%s7812_s26 + $0xd0] sm:$0xff]  ;;  %v7956_v41 = vld [vmem:[%s7812_s26 + $0xd8] sm:$0xff] }
  0x20   : > { %3386 = vst.msk [vmem:[#allocation3 + $0x10] sm:$0xff] %vm1402_vm0, %v7542_v5  ;;  %3387 = vst.msk [vmem:[#allocation3 + $0x18] sm:$0xff] %vm1402_vm0, %v7542_v5  ;;  %2487 = vperm.xlu0 %7531, %v589_v25   ;;  %6976 = vmatprep.mubr.msk.f32.mxu0 %vm620_vm1, %v7891_v26  ;;  %v7969_v44 = vld [vmem:[%s7812_s26 + $0x60] sm:$0xff]  ;;  %v7979_v46 = vld [vmem:[%s7812_s26 + $0x68] sm:$0xff] }
  0x21   : > { %3388 = vst.msk [vmem:[#allocation3 + $0x20] sm:$0xff] %vm1402_vm0, %v7542_v5  ;;  %3389 = vst.msk [vmem:[#allocation3 + $0x28] sm:$0xff] %vm1402_vm0, %v7542_v5  ;;  %7000 = vmatprep.mubr.msk.f32.mxu1 %vm620_vm1, %v7894_v27  ;;  %v7972_v45 = vld [vmem:[%s7812_s26 + $0xe0] sm:$0xff]  ;;  %v7982_v47 = vld [vmem:[%s7812_s26 + $0xe8] sm:$0xff] }
  0x22   : > { %3390 = vst.msk [vmem:[#allocation3 + $0x30] sm:$0xff] %vm1402_vm0, %v7542_v5  ;;  %3391 = vst.msk [vmem:[#allocation3 + $0x38] sm:$0xff] %vm1402_vm0, %v7542_v5  ;;  %6977 = vmatmul.mubr.msk.f32.gmra.mxu0 %vm620_vm1, %v7901_v28  ;;  %v594_v48 = vld [vmem:[%s10374_s2 + $0x40] sm:$0xff]  ;;  %v593_v49 = vld [vmem:[%s10374_s2 + $0x38] sm:$0xff] }
  0x23   : > { %3392 = vst.msk [vmem:[#allocation3 + $0x40] sm:$0xff] %vm1402_vm0, %v7542_v5  ;;  %3393 = vst.msk [vmem:[#allocation3 + $0x48] sm:$0xff] %vm1402_vm0, %v7542_v5  ;;  %7001 = vmatmul.mubr.msk.f32.gmra.mxu1 %vm620_vm1, %v7904_v29  ;;  %1529 = vperm.xlu1 %7532, %v560_v30   ;;  %v7995_v50 = vld [vmem:[%s7812_s26 + $0x70] sm:$0xff]  ;;  %v8005_v52 = vld [vmem:[%s7812_s26 + $0x78] sm:$0xff] }
  0x24   : > { %3394 = vst.msk [vmem:[#allocation3 + $0x50] sm:$0xff] %vm1402_vm0, %v7542_v5  ;;  %3395 = vst.msk [vmem:[#allocation3 + $0x58] sm:$0xff] %vm1402_vm0, %v7542_v5  ;;  %1525 = vperm.xlu0 %7531, %v559_v31   ;;  %6979 = vmatprep.mubr.msk.f32.mxu0 %vm620_vm1, %v7917_v32  ;;  %v7998_v51 = vld [vmem:[%s7812_s26 + $0xf0] sm:$0xff]  ;;  %v8008_v53 = vld [vmem:[%s7812_s26 + $0xf8] sm:$0xff] }
  0x25   : > { %3396 = vst.msk [vmem:[#allocation3 + $0x60] sm:$0xff] %vm1402_vm0, %v7542_v5  ;;  %3397 = vst.msk [vmem:[#allocation3 + $0x68] sm:$0xff] %vm1402_vm0, %v7542_v5  ;;  %7003 = vmatprep.mubr.msk.f32.mxu1 %vm620_vm1, %v7920_v33  ;;  %v564_v54 = vld [vmem:[%s10373_s1 + $0x50] sm:$0xff]  ;;  %v563_v55 = vld [vmem:[%s10373_s1 + $0x48] sm:$0xff] }
  0x26   : > { %3398 = vst.msk [vmem:[#allocation3 + $0x70] sm:$0xff] %vm1402_vm0, %v7542_v5  ;;  %3399 = vst.msk [vmem:[#allocation3 + $0x78] sm:$0xff] %vm1402_vm0, %v7542_v5  ;;  %6980 = vmatmul.mubr.msk.f32.gmra.mxu0 %vm620_vm1, %v7927_v34  ;;  %v1176_v56 = vld [vmem:[%s10376_s4 + $0x8] sm:$0xff]  ;;  %v1175_v57 = vld [vmem:[%s10376_s4] sm:$0xff] }
  0x27   : > { %3400 = vst.msk [vmem:[#allocation3 + $0x80] sm:$0xff] %vm1402_vm0, %v7542_v5  ;;  %3401 = vst.msk [vmem:[#allocation3 + $0x88] sm:$0xff] %vm1402_vm0, %v7542_v5  ;;  %7004 = vmatmul.mubr.msk.f32.gmra.mxu1 %vm620_vm1, %v7930_v35  ;;  %2499 = vperm.xlu1 %7532, %v592_v36   ;;  %v596_v58 = vld [vmem:[%s10374_s2 + $0x50] sm:$0xff]  ;;  %v595_v59 = vld [vmem:[%s10374_s2 + $0x48] sm:$0xff] }
  0x28   : > { %3402 = vst.msk [vmem:[#allocation3 + $0x90] sm:$0xff] %vm1402_vm0, %v7542_v5  ;;  %3403 = vst.msk [vmem:[#allocation3 + $0x98] sm:$0xff] %vm1402_vm0, %v7542_v5  ;;  %2495 = vperm.xlu0 %7531, %v591_v37   ;;  %6982 = vmatprep.mubr.msk.f32.mxu0 %vm620_vm1, %v7943_v38  ;;  %v566_v60 = vld [vmem:[%s10373_s1 + $0x60] sm:$0xff]  ;;  %v565_v61 = vld [vmem:[%s10373_s1 + $0x58] sm:$0xff] }
  0x29   : > { %3404 = vst.msk [vmem:[#allocation3 + $0xa0] sm:$0xff] %vm1402_vm0, %v7542_v5  ;;  %3405 = vst.msk [vmem:[#allocation3 + $0xa8] sm:$0xff] %vm1402_vm0, %v7542_v5  ;;  %7006 = vmatprep.mubr.msk.f32.mxu1 %vm620_vm1, %v7946_v39  ;;  %7015 = vmatprep.subr.mxu1 %v1176_v56  ;;  %v598_v62 = vld [vmem:[%s10374_s2 + $0x60] sm:$0xff]  ;;  %v597_v63 = vld [vmem:[%s10374_s2 + $0x58] sm:$0xff] }
  0x2a   : > { %3406 = vst.msk [vmem:[#allocation3 + $0xb0] sm:$0xff] %vm1402_vm0, %v7542_v5  ;;  %3407 = vst.msk [vmem:[#allocation3 + $0xb8] sm:$0xff] %vm1402_vm0, %v7542_v5  ;;  %6983 = vmatmul.mubr.msk.f32.gmra.mxu0 %vm620_vm1, %v7953_v40  ;;  %7016 = vmatpush3.msra.mxu1 %v1176_v56  ;;  %v568_v0 = vld [vmem:[%s10373_s1 + $0x70] sm:$0xff]  ;;  %v567_v1 = vld [vmem:[%s10373_s1 + $0x68] sm:$0xff] }
  0x2b   : > { %3408 = vst.msk [vmem:[#allocation3 + $0xc0] sm:$0xff] %vm1402_vm0, %v7542_v5  ;;  %3409 = vst.msk [vmem:[#allocation3 + $0xc8] sm:$0xff] %vm1402_vm0, %v7542_v5  ;;  %7007 = vmatmul.mubr.msk.f32.gmra.mxu1 %vm620_vm1, %v7956_v41  ;;  %1537 = vperm.xlu1 %7532, %v562_v42   ;;  %v600_v2 = vld [vmem:[%s10374_s2 + $0x70] sm:$0xff]  ;;  %v599_v3 = vld [vmem:[%s10374_s2 + $0x68] sm:$0xff] }
  0x2c   : > { %3410 = vst.msk [vmem:[#allocation3 + $0xd0] sm:$0xff] %vm1402_vm0, %v7542_v5  ;;  %3411 = vst.msk [vmem:[#allocation3 + $0xd8] sm:$0xff] %vm1402_vm0, %v7542_v5  ;;  %1533 = vperm.xlu0 %7531, %v561_v43   ;;  %6985 = vmatprep.mubr.msk.f32.mxu0 %vm620_vm1, %v7969_v44  ;;  %v6302_v4 = vld [vmem:[%s10377_s5 + $0x8] sm:$0xff]  ;;  %v569_v6 = vld [vmem:[%s10373_s1 + $0x78] sm:$0xff] }
  0x2d   : > { %3412 = vst.msk [vmem:[#allocation3 + $0xe0] sm:$0xff] %vm1402_vm0, %v7542_v5  ;;  %3413 = vst.msk [vmem:[#allocation3 + $0xe8] sm:$0xff] %vm1402_vm0, %v7542_v5  ;;  %7009 = vmatprep.mubr.msk.f32.mxu1 %vm620_vm1, %v7972_v45  ;;  %7017 = vmatprep.subr.mxu1 %v1175_v57  ;;  %v602_v7 = vld [vmem:[%s10374_s2 + $0x80] sm:$0xff]  ;;  %v571_v12 = vld [vmem:[%s10373_s1 + $0x88] sm:$0xff] }
  0x2e   : > { %3414 = vst.msk [vmem:[#allocation3 + $0xf0] sm:$0xff] %vm1402_vm0, %v7542_v5  ;;  %3415 = vst.msk [vmem:[#allocation3 + $0xf8] sm:$0xff] %vm1402_vm0, %v7542_v5  ;;  %6986 = vmatmul.mubr.msk.f32.gmra.mxu0 %vm620_vm1, %v7979_v46  ;;  %7018 = vmatpush3.msra.mxu1 %v1175_v57  ;;  %v604_v13 = vld [vmem:[%s10374_s2 + $0x90] sm:$0xff]  ;;  %v573_v18 = vld [vmem:[%s10373_s1 + $0x98] sm:$0xff] }
  0x2f   : > { %3416 = vst.msk [vmem:[#allocation3 + $0x100] sm:$0xff] %vm1402_vm0, %v7542_v5  ;;  %3417 = vst.msk [vmem:[#allocation3 + $0x108] sm:$0xff] %vm1402_vm0, %v7542_v5  ;;  %7010 = vmatmul.mubr.msk.f32.gmra.mxu1 %vm620_vm1, %v7982_v47  ;;  %2507 = vperm.xlu1 %7532, %v594_v48   ;;  %v605_v19 = vld [vmem:[%s10374_s2 + $0x98] sm:$0xff]  ;;  %v580_v25 = vld [vmem:[%s10373_s1 + $0xd0] sm:$0xff] }
  0x30   : > { %3418 = vst.msk [vmem:[#allocation3 + $0x110] sm:$0xff] %vm1402_vm0, %v7542_v5  ;;  %3419 = vst.msk [vmem:[#allocation3 + $0x118] sm:$0xff] %vm1402_vm0, %v7542_v5  ;;  %2503 = vperm.xlu0 %7531, %v593_v49   ;;  %6988 = vmatprep.mubr.msk.f32.mxu0 %vm620_vm1, %v7995_v50  ;;  %v570_v5 = vld [vmem:[%s10373_s1 + $0x80] sm:$0xff]  ;;  %v609_v24 = vld [vmem:[%s10374_s2 + $0xb8] sm:$0xff] }
  0x31   : > { %7012 = vmatprep.mubr.msk.f32.mxu1 %vm620_vm1, %v7998_v51  ;;  %7067 = vmatprep.subr.mxu0 %v6302_v4  ;;  %v581_v30 = vld [vmem:[%s10373_s1 + $0xd8] sm:$0xff]  ;;  %v614_v31 = vld [vmem:[%s10374_s2 + $0xe0] sm:$0xff]  ;;  %v616_v36 = vld [vmem:[%s10374_s2 + $0xf0] sm:$0xff] }
  0x32   : > { %6989 = vmatmul.mubr.msk.f32.gmra.mxu0 %vm620_vm1, %v8005_v52  ;;  %v615_v37 = vld [vmem:[%s10374_s2 + $0xe8] sm:$0xff]  ;;  %v8239_v42 = vld [vmem:[%s10377_s5 + $0x10] sm:$0xff] }
  0x33   : > { %7013 = vmatmul.mubr.msk.f32.gmra.mxu1 %vm620_vm1, %v8008_v53  ;;  %1545 = vperm.xlu1 %7532, %v564_v54  }
  0x34   : > { %1541 = vperm.xlu0 %7531, %v563_v55   ;;  %7019 = vmatprep.mubr.msk.f32.mxu1 %vm620_vm1, %v7815_v8  ;;  %v601_v8 = vld [vmem:[%s10374_s2 + $0x78] sm:$0xff] }
  0x35   : > { %7068 = vmatpush3.msra.mxu0 %v6302_v4 }
  0x36   : > { %7167 = vmatprep.subr.mxu0 %v8239_v42 }
  0x37   : > { %2515 = vperm.xlu1 %7532, %v596_v58   ;;  %7020 = vmatmul.mubr.msk.f32.vlgmr.msra.gmra.mxu1 %vm620_vm1, %v7821_v10  ;;  %v572_v10 = vld [vmem:[%s10373_s1 + $0x90] sm:$0xff] }
  0x38   : > { %2511 = vperm.xlu0 %7531, %v595_v59   ;;  %7022 = vmatprep.mubr.msk.f32.mxu1 %vm620_vm1, %v7839_v14  ;;  %v603_v14 = vld [vmem:[%s10374_s2 + $0x88] sm:$0xff] }
  0x3b   : > { %1553 = vperm.xlu1 %7532, %v566_v60   ;;  %7023 = vmatmul.mubr.msk.f32.gmra.mxu1 %vm620_vm1, %v7849_v16  ;;  %v574_v16 = vld [vmem:[%s10373_s1 + $0xa0] sm:$0xff] }
  0x3c   : > { %1549 = vperm.xlu0 %7531, %v565_v61   ;;  %7025 = vmatprep.mubr.msk.f32.mxu1 %vm620_vm1, %v7865_v20  ;;  %v607_v20 = vld [vmem:[%s10374_s2 + $0xa8] sm:$0xff] }
  0x3f   : > { %2523 = vperm.xlu1 %7532, %v598_v62   ;;  %7026 = vmatmul.mubr.msk.f32.gmra.mxu1 %vm620_vm1, %v7875_v22  ;;  %v577_v22 = vld [vmem:[%s10373_s1 + $0xb8] sm:$0xff] }
  0x40   : > { %2519 = vperm.xlu0 %7531, %v597_v63   ;;  %7028 = vmatprep.mubr.msk.f32.mxu1 %vm620_vm1, %v7891_v26  ;;  %v579_v26 = vld [vmem:[%s10373_s1 + $0xc8] sm:$0xff] }
  0x43   : > { %1561 = vperm.xlu1 %7532, %v568_v0   ;;  %7029 = vmatmul.mubr.msk.f32.gmra.mxu1 %vm620_vm1, %v7901_v28  ;;  %v611_v28 = vld [vmem:[%s10374_s2 + $0xc8] sm:$0xff] }
  0x44   : > { %1557 = vperm.xlu0 %7531, %v567_v1   ;;  %7031 = vmatprep.mubr.msk.f32.mxu1 %vm620_vm1, %v7917_v32  ;;  %v613_v32 = vld [vmem:[%s10374_s2 + $0xd8] sm:$0xff] }
  0x47   : > { %2531 = vperm.xlu1 %7532, %v600_v2   ;;  %7032 = vmatmul.mubr.msk.f32.gmra.mxu1 %vm620_vm1, %v7927_v34  ;;  %v583_v34 = vld [vmem:[%s10373_s1 + $0xe8] sm:$0xff] }
  0x48   : > { %2527 = vperm.xlu0 %7531, %v599_v3   ;;  %7034 = vmatprep.mubr.msk.f32.mxu1 %vm620_vm1, %v7943_v38  ;;  %v617_v38 = vld [vmem:[%s10374_s2 + $0xf8] sm:$0xff] }
  0x4b   : > { %1569 = vperm.xlu1 %7532, %v570_v5   ;;  %7035 = vmatmul.mubr.msk.f32.gmra.mxu1 %vm620_vm1, %v7953_v40 }
  0x4c   : > { %1565 = vperm.xlu0 %7531, %v569_v6   ;;  %7037 = vmatprep.mubr.msk.f32.mxu1 %vm620_vm1, %v7969_v44 }
  0x4f   : > { %2539 = vperm.xlu1 %7532, %v602_v7   ;;  %7038 = vmatmul.mubr.msk.f32.gmra.mxu1 %vm620_vm1, %v7979_v46 }
  0x50   : > { %2535 = vperm.xlu0 %7531, %v601_v8   ;;  %7040 = vmatprep.mubr.msk.f32.mxu1 %vm620_vm1, %v7995_v50 }
  0x53   : > { %1577 = vperm.xlu1 %7532, %v572_v10   ;;  %7041 = vmatmul.mubr.msk.f32.gmra.mxu1 %vm620_vm1, %v8005_v52 }
  0x54   : > { %1573 = vperm.xlu0 %7531, %v571_v12   ;;  %7043 = vmatprep.mubr.msk.f32.mxu1 %vm620_vm1, %v7818_v9  ;;  %v606_v9 = vld [vmem:[%s10374_s2 + $0xa0] sm:$0xff] }
  0x57   : > { %2547 = vperm.xlu1 %7532, %v604_v13   ;;  %7044 = vmatmul.mubr.msk.f32.gmra.mxu1 %vm620_vm1, %v7826_v11  ;;  %v576_v11 = vld [vmem:[%s10373_s1 + $0xb0] sm:$0xff] }
  0x58   : > { %2543 = vperm.xlu0 %7531, %v603_v14   ;;  %7046 = vmatprep.mubr.msk.f32.mxu1 %vm620_vm1, %v7842_v15  ;;  %v575_v15 = vld [vmem:[%s10373_s1 + $0xa8] sm:$0xff] }
  0x5b   : > { %1585 = vperm.xlu1 %7532, %v574_v16   ;;  %7047 = vmatmul.mubr.msk.f32.gmra.mxu1 %vm620_vm1, %v7852_v17  ;;  %v608_v17 = vld [vmem:[%s10374_s2 + $0xb0] sm:$0xff] }
  0x5c   : > { %1581 = vperm.xlu0 %7531, %v573_v18   ;;  %7049 = vmatprep.mubr.msk.f32.mxu1 %vm620_vm1, %v7868_v21  ;;  %v578_v21 = vld [vmem:[%s10373_s1 + $0xc0] sm:$0xff] }
  0x5f   : > { %2555 = vperm.xlu1 %7532, %v606_v9   ;;  %7050 = vmatmul.mubr.msk.f32.gmra.mxu1 %vm620_vm1, %v7878_v23  ;;  %v610_v23 = vld [vmem:[%s10374_s2 + $0xc0] sm:$0xff] }
  0x60   : > { %2551 = vperm.xlu0 %7531, %v605_v19   ;;  %7052 = vmatprep.mubr.msk.f32.mxu1 %vm620_vm1, %v7894_v27  ;;  %v612_v27 = vld [vmem:[%s10374_s2 + $0xd0] sm:$0xff] }
  0x63   : > { %1593 = vperm.xlu1 %7532, %v576_v11   ;;  %7053 = vmatmul.mubr.msk.f32.gmra.mxu1 %vm620_vm1, %v7904_v29  ;;  %v582_v29 = vld [vmem:[%s10373_s1 + $0xe0] sm:$0xff] }
  0x64   : > { %1589 = vperm.xlu0 %7531, %v575_v15   ;;  %7055 = vmatprep.mubr.msk.f32.mxu1 %vm620_vm1, %v7920_v33  ;;  %v584_v33 = vld [vmem:[%s10373_s1 + $0xf0] sm:$0xff] }
  0x67   : > { %2563 = vperm.xlu1 %7532, %v608_v17   ;;  %7056 = vmatmul.mubr.msk.f32.gmra.mxu1 %vm620_vm1, %v7930_v35  ;;  %v1761_v35 = vld [vmem:[%s10377_s5] sm:$0xff] }
  0x68   : > { %2559 = vperm.xlu0 %7531, %v607_v20   ;;  %7058 = vmatprep.mubr.msk.f32.mxu1 %vm620_vm1, %v7946_v39  ;;  %v585_v39 = vld [vmem:[%s10373_s1 + $0xf8] sm:$0xff] }
  0x69   : > { %7117 = vmatprep.subr.mxu1 %v1761_v35 }
  0x6a   : > { %7118 = vmatpush3.msra.mxu1 %v1761_v35 }
  0x6b   : > { %1601 = vperm.xlu1 %7532, %v578_v21   ;;  %7059 = vmatmul.mubr.msk.f32.gmra.mxu1 %vm620_vm1, %v7956_v41 }
  0x6c   : > { %1597 = vperm.xlu0 %7531, %v577_v22   ;;  %7061 = vmatprep.mubr.msk.f32.mxu1 %vm620_vm1, %v7972_v45 }
  0x6f   : > { %2571 = vperm.xlu1 %7532, %v610_v23   ;;  %7062 = vmatmul.mubr.msk.f32.gmra.mxu1 %vm620_vm1, %v7982_v47 }
  0x70   : > { %2567 = vperm.xlu0 %7531, %v609_v24   ;;  %7064 = vmatprep.mubr.msk.f32.mxu1 %vm620_vm1, %v7998_v51 }
  0x73   : > { %1609 = vperm.xlu1 %7532, %v580_v25   ;;  %7065 = vmatmul.mubr.msk.f32.gmra.mxu1 %vm620_vm1, %v8008_v53 }
  0x74   : > { %1605 = vperm.xlu0 %7531, %v579_v26  }
  0x77   : > { %2579 = vperm.xlu1 %7532, %v612_v27  }
  0x78   : > { %2575 = vperm.xlu0 %7531, %v611_v28  }
  0x7b   : > { %1617 = vperm.xlu1 %7532, %v582_v29  }
  0x7c   : > { %1613 = vperm.xlu0 %7531, %v581_v30  }
  0x7f   : > { %2587 = vperm.xlu1 %7532, %v614_v31  }
  0x80   : > { %2583 = vperm.xlu0 %7531, %v613_v32  }
  0x83   : > { %1625 = vperm.xlu1 %7532, %v584_v33  }
  0x84   : > { %1621 = vperm.xlu0 %7531, %v583_v34  }
  0x87   : > { %2595 = vperm.xlu1 %7532, %v616_v36  }
  0x88   : > { %2591 = vperm.xlu0 %7531, %v615_v37   ;;  %v943_v37 = vlaneseq }
  0x89   : > { %v8232_v40 = vpop.permute.xlu1 %1513  ;;  %v8234_v41 = vpop.permute.xlu0 %1505 }
  0x8b   : > { %2599 = vperm.xlu1 %7532, %v617_v38  }
  0x8c   : > { %1629 = vperm.xlu0 %7531, %v585_v39  }
  0x8d   : > { %v8242_v43 = vpop.permute.xlu1 %2475  ;;  %v8244_v44 = vpop.permute.xlu0 %1509 }
  0x8e   : > { %10442 = vst [vmem:[#allocation4_spill] sm:$0xff] %v8242_v43  ;;  %v10389_v45 = vrot.slane %v8242_v43, 7 }
  0x92   : > { %v2484_v46 = vpop.permute.xlu1 %2483 }
  0x93   : > { %v2480_v47 = vpop.permute.xlu0 %2479  ;;  %v2604_v48 = vrot.slane %v2484_v46, 7  ;;  %v944_v46 = vshrl.u32 %v943_v37, 7 }
  0x94   : > { %v2602_v49 = vrot.slane %v2480_v47, 7 }
  0x96   : > { %v8250_v50 = vsel %vm2118_vm2, %v10389_v45, %v2602_v49  ;;  %v8253_v51 = vsel %vm2118_vm2, %v2602_v49, %v2604_v48  ;;  %v8255_v52 = vpop.permute.xlu1 %1521  ;;  %v942_v49 = vld [vmem:[%s10382_s10] sm:$0x3] }
  0x97   : > { %10443 = vst [vmem:[#allocation5_spill] sm:$0xff] %v8250_v50  ;;  %v8257_v53 = vpop.permute.xlu0 %1517 }
  0x9a   : > { %v2492_v54 = vpop.permute.xlu1 %2491 }
  0x9b   : > { %v2488_v55 = vpop.permute.xlu0 %2487  ;;  %v2608_v56 = vrot.slane %v2492_v54, 7  ;;  %v8330_v54 = vsub.s32 1, %v944_v46 }
  0x9c   : > { %v2606_v57 = vrot.slane %v2488_v55, 7 }
  0x9d   : > { %10458 = vst [vmem:[#allocation20_spill] sm:$0xff] %v8330_v54 }
  0x9e   : > { %v8260_v58 = vsel %vm2118_vm2, %v2604_v48, %v2606_v57  ;;  %v8263_v59 = vsel %vm2118_vm2, %v2606_v57, %v2608_v56  ;;  %v8265_v60 = vpop.permute.xlu1 %1529  ;;  %v8325_v48 = vsub.s32 0, %v944_v46 }
  0x9f   : > { %10444 = vst [vmem:[#allocation6_spill] sm:$0xff] %v8260_v58  ;;  %10445 = vst [vmem:[#allocation7_spill] sm:$0xff] %v8263_v59  ;;  %v8267_v61 = vpop.permute.xlu0 %1525 }
  0xa0   : > { %10457 = vst [vmem:[#allocation19_spill] sm:$0xff] %v8325_v48  ;;  %v8333_v55 = vrot.slane %v942_v49, %v8325_v48 }
  0xa2   : > { %v2500_v62 = vpop.permute.xlu1 %2499 }
  0xa3   : > { %v2496_v63 = vpop.permute.xlu0 %2495  ;;  %v2612_v0 = vrot.slane %v2500_v62, 7 }
  0xa4   : > { %v2610_v1 = vrot.slane %v2496_v63, 7 }
  0xa6   : > { %v8270_v2 = vsel %vm2118_vm2, %v2608_v56, %v2610_v1  ;;  %v8273_v3 = vsel %vm2118_vm2, %v2610_v1, %v2612_v0  ;;  %v8275_v4 = vpop.permute.xlu1 %1537  ;;  %v8336_v56 = vrot.slane %v942_v49, %v8330_v54 }
  0xa7   : > { %10446 = vst [vmem:[#allocation8_spill] sm:$0xff] %v8270_v2  ;;  %10447 = vst [vmem:[#allocation9_spill] sm:$0xff] %v8273_v3  ;;  %v8277_v5 = vpop.permute.xlu0 %1533 }
  0xaa   : > { %v2508_v6 = vpop.permute.xlu1 %2507 }
  0xab   : > { %v2504_v7 = vpop.permute.xlu0 %2503  ;;  %v2616_v8 = vrot.slane %v2508_v6, 7 }
  0xac   : > { %v2614_v10 = vrot.slane %v2504_v7, 7 }
  0xae   : > { %v8280_v12 = vsel %vm2118_vm2, %v2612_v0, %v2614_v10  ;;  %v8283_v13 = vsel %vm2118_vm2, %v2614_v10, %v2616_v8  ;;  %v8285_v14 = vpop.permute.xlu1 %1545 }
  0xaf   : > { %10448 = vst [vmem:[#allocation10_spill] sm:$0xff] %v8280_v12  ;;  %10449 = vst [vmem:[#allocation11_spill] sm:$0xff] %v8283_v13  ;;  %v8287_v16 = vpop.permute.xlu0 %1541 }
  0xb2   : > { %v2516_v18 = vpop.permute.xlu1 %2515 }
  0xb3   : > { %v2512_v9 = vpop.permute.xlu0 %2511  ;;  %v2620_v19 = vrot.slane %v2516_v18, 7 }
  0xb4   : > { %v2618_v11 = vrot.slane %v2512_v9, 7 }
  0xb6   : > { %v8290_v15 = vsel %vm2118_vm2, %v2616_v8, %v2618_v11  ;;  %v8293_v17 = vsel %vm2118_vm2, %v2618_v11, %v2620_v19  ;;  %v8295_v20 = vpop.permute.xlu1 %1553 }
  0xb7   : > { %10450 = vst [vmem:[#allocation12_spill] sm:$0xff] %v8290_v15  ;;  %10451 = vst [vmem:[#allocation13_spill] sm:$0xff] %v8293_v17  ;;  %v8297_v21 = vpop.permute.xlu0 %1549 }
  0xba   : > { %v2524_v22 = vpop.permute.xlu1 %2523 }
  0xbb   : > { %v2520_v23 = vpop.permute.xlu0 %2519  ;;  %v2624_v24 = vrot.slane %v2524_v22, 7 }
  0xbc   : > { %v2622_v25 = vrot.slane %v2520_v23, 7 }
  0xbe   : > { %v8300_v26 = vsel %vm2118_vm2, %v2620_v19, %v2622_v25  ;;  %v8303_v27 = vsel %vm2118_vm2, %v2622_v25, %v2624_v24  ;;  %v8305_v28 = vpop.permute.xlu1 %1561 }
  0xbf   : > { %10452 = vst [vmem:[#allocation14_spill] sm:$0xff] %v8300_v26  ;;  %10453 = vst [vmem:[#allocation15_spill] sm:$0xff] %v8303_v27  ;;  %v8307_v29 = vpop.permute.xlu0 %1557 }
  0xc2   : > { %v2532_v30 = vpop.permute.xlu1 %2531 }
  0xc3   : > { %v2528_v31 = vpop.permute.xlu0 %2527  ;;  %v2628_v32 = vrot.slane %v2532_v30, 7 }
  0xc4   : > { %v2626_v33 = vrot.slane %v2528_v31, 7 }
  0xc6   : > { %v8310_v34 = vsel %vm2118_vm2, %v2624_v24, %v2626_v33  ;;  %v8313_v35 = vsel %vm2118_vm2, %v2626_v33, %v2628_v32 }
  0xc7   : > { %10454 = vst [vmem:[#allocation16_spill] sm:$0xff] %v8310_v34  ;;  %10455 = vst [vmem:[#allocation17_spill] sm:$0xff] %v8313_v35  ;;  %v8315_v36 = vpop.permute.xlu0 %1565 }
  0xcb   : > { %v8317_v38 = vpop.permute.xlu0 %2535 }
  0xcc   : > { %v10390_v39 = vrot.slane %v8317_v38, 7 }
  0xce   : > { %v8323_v47 = vsel %vm2118_vm2, %v2628_v32, %v10390_v39 }
  0xcf   : > { %10456 = vst [vmem:[#allocation18_spill] sm:$0xff] %v8323_v47 }
  0xd6   : > { %v6969_v57 = vpop.f32.mrf.mxu0 }
  0xd7   : > { %v6993_v62 = vpop.f32.mrf.mxu1  ;;  %v948_v63 = vmul.f32 %v6969_v57, %v8333_v55 }
  0xd8   : > { %v964_v0 = vmul.f32 %v6993_v62, %v8333_v55  ;;  %v783_v1 = vpop.f32.mrf.mxu0 }
  0xd9   : > { %v863_v6 = vpop.f32.mrf.mxu1  ;;  %v984_v7 = vadd.f32 %v8336_v56, %v948_v63  ;;  %v947_v10 = vmul.f32 %v8333_v55, %v783_v1 }
  0xda   : > { %v1000_v8 = vadd.f32 %v8336_v56, %v964_v0  ;;  %v963_v18 = vmul.f32 %v8333_v55, %v863_v6  ;;  %v6972_v9 = vpop.f32.mrf.mxu0 }
  0xdb   : > { %v6996_v19 = vpop.f32.mrf.mxu1  ;;  %v1016_v11 = vadd.f32 3.0, %v984_v7  ;;  %v983_v23 = vadd.f32 %v8336_v56, %v947_v10  ;;  %v950_v25 = vmul.f32 %v6972_v9, %v8333_v55 }
  0xdc   : > { %v1032_v22 = vadd.f32 3.0, %v1000_v8  ;;  %v999_v24 = vadd.f32 %v8336_v56, %v963_v18  ;;  %v966_v30 = vmul.f32 %v6996_v19, %v8333_v55  ;;  %v793_v31 = vpop.f32.mrf.mxu0 }
  0xdd   : > { %v873_v32 = vpop.f32.mrf.mxu1  ;;  %v1048_v33 = vmax.f32 %v1016_v11, 0.0  ;;  %v1015_v46 = vadd.f32 3.0, %v983_v23  ;;  %v986_v57 = vadd.f32 %v8336_v56, %v950_v25  ;;  %v949_v9 = vmul.f32 %v8333_v55, %v793_v31 }
  0xde   : > { %v1064_v37 = vmax.f32 %v1032_v22, 0.0  ;;  %v1031_v49 = vadd.f32 3.0, %v999_v24  ;;  %v1002_v62 = vadd.f32 %v8336_v56, %v966_v30  ;;  %v965_v19 = vmul.f32 %v8333_v55, %v873_v32  ;;  %v6975_v39 = vpop.f32.mrf.mxu0 }
  0xdf   : > { %v6999_v63 = vpop.f32.mrf.mxu1  ;;  %v1080_v0 = vmin.f32 %v1048_v33, 6.0  ;;  %v1047_v6 = vmax.f32 %v1015_v46, 0.0  ;;  %v1018_v18 = vadd.f32 3.0, %v986_v57  ;;  %v985_v30 = vadd.f32 %v8336_v56, %v949_v9 }
  0xe0   : > { %v1096_v1 = vmin.f32 %v1064_v37, 6.0  ;;  %v1063_v10 = vmax.f32 %v1031_v49, 0.0  ;;  %v1034_v45 = vadd.f32 3.0, %v1002_v62  ;;  %v1001_v33 = vadd.f32 %v8336_v56, %v965_v19 }
  0xe1   : > { %v883_v11 = vpop.f32.mrf.mxu1  ;;  %v1112_v22 = vmul.f32 %v1080_v0, %v984_v7  ;;  %v1079_v48 = vmin.f32 %v1047_v6, 6.0  ;;  %v1050_v25 = vmax.f32 %v1018_v18, 0.0  ;;  %v1017_v26 = vadd.f32 3.0, %v985_v30 }
  0xe2   : > { %v1128_v54 = vmul.f32 %v1096_v1, %v1000_v8  ;;  %v1095_v47 = vmin.f32 %v1063_v10, 6.0  ;;  %v1066_v35 = vmax.f32 %v1034_v45, 0.0  ;;  %v1033_v7 = vadd.f32 3.0, %v1001_v33  ;;  %v803_v8 = vpop.f32.mrf.mxu0 }
  0xe3   : > { %v7002_v37 = vpop.f32.mrf.mxu1  ;;  %v8354_v46 = vmul.f32 0.16666667, %v1112_v22  ;;  %v1111_v31 = vmul.f32 %v1079_v48, %v983_v23  ;;  %v1082_v32 = vmin.f32 %v1050_v25, 6.0  ;;  %v952_v48 = vmul.f32 %v6975_v39, %v8333_v55 }
  0xe4   : > { %v8356_v49 = vmul.f32 0.16666667, %v1128_v54  ;;  %v1127_v34 = vmul.f32 %v1095_v47, %v999_v24  ;;  %v1098_v27 = vmin.f32 %v1066_v35, 6.0  ;;  %v968_v47 = vmul.f32 %v6999_v63, %v8333_v55 }
  0xe5   : > { %10459 = vst [vmem:[#allocation21_spill] sm:$0xff] %v8354_v46  ;;  %v8358_v0 = vpop.f32.mrf.mxu1  ;;  %1438 = vst.msk [vmem:[#allocation2 + $0x10] sm:$0xff] %vm1402_vm0, %v8354_v46  ;;  %v8364_v45 = vmul.f32 0.16666667, %v1111_v31  ;;  %v1114_v35 = vmul.f32 %v1082_v32, %v986_v57  ;;  %v1049_v23 = vmax.f32 %v1017_v26, 0.0  ;;  %v1065_v24 = vmax.f32 %v1033_v7, 0.0 }
  0xe6   : > { %10460 = vst [vmem:[#allocation22_spill] sm:$0xff] %v8356_v49  ;;  %1454 = vst.msk [vmem:[#allocation2 + $0x90] sm:$0xff] %vm1402_vm0, %v8356_v49  ;;  %v8366_v1 = vmul.f32 0.16666667, %v1127_v34  ;;  %v1130_v54 = vmul.f32 %v1098_v27, %v1002_v62  ;;  %v988_v6 = vadd.f32 %v8336_v56, %v952_v48  ;;  %v1004_v10 = vadd.f32 %v8336_v56, %v968_v47  ;;  %v6978_v62 = vpop.f32.mrf.mxu0 }
  0xe7   : > { %10461 = vst [vmem:[#allocation23_spill] sm:$0xff] %v8364_v45  ;;  %1437 = vst.msk [vmem:[#allocation2 + $0x8] sm:$0xff] %vm1402_vm0, %v8364_v45  ;;  %v8376_v34 = vpop.f32.mrf.mxu1  ;;  %7069 = vmatprep.mubr.msk.f32.mxu0 %vm1402_vm0, %v8364_v45  ;;  %v8380_v39 = vmul.f32 0.16666667, %v1114_v35  ;;  %v1081_v26 = vmin.f32 %v1049_v23, 6.0  ;;  %v1097_v57 = vmin.f32 %v1065_v24, 6.0  ;;  %v951_v22 = vmul.f32 %v8333_v55, %v803_v8 }
  0xe8   : > { %10462 = vst [vmem:[#allocation24_spill] sm:$0xff] %v8366_v1  ;;  %1453 = vst.msk [vmem:[#allocation2 + $0x88] sm:$0xff] %vm1402_vm0, %v8366_v1  ;;  %v8382_v27 = vmul.f32 0.16666667, %v1130_v54  ;;  %7070 = vmatmul.mubr.msk.f32.vlgmr.msra.gmra.mxu0 %vm1402_vm0, %v8354_v46  ;;  %v1020_v63 = vadd.f32 3.0, %v988_v6  ;;  %v1036_v18 = vadd.f32 3.0, %v1004_v10  ;;  %v967_v25 = vmul.f32 %v8333_v55, %v883_v11  ;;  %v813_v24 = vpop.f32.mrf.mxu0 }
  0xe9   : > { %10463 = vst [vmem:[#allocation25_spill] sm:$0xff] %v8380_v39  ;;  %7168 = vmatpush3.msra.mxu0 %v8239_v42  ;;  %1440 = vst.msk [vmem:[#allocation2 + $0x20] sm:$0xff] %vm1402_vm0, %v8380_v39  ;;  %v1113_v9 = vmul.f32 %v1081_v26, %v985_v30  ;;  %v1129_v19 = vmul.f32 %v1097_v57, %v1001_v33  ;;  %v954_v7 = vmul.f32 %v6978_v62, %v8333_v55  ;;  %v8395_v47 = vpop.f32.mrf.mxu1 }
  0xea   : > { %10464 = vst [vmem:[#allocation26_spill] sm:$0xff] %v8382_v27  ;;  %1456 = vst.msk [vmem:[#allocation2 + $0xa0] sm:$0xff] %vm1402_vm0, %v8382_v27  ;;  %v1052_v31 = vmax.f32 %v1020_v63, 0.0  ;;  %v1068_v32 = vmax.f32 %v1036_v18, 0.0  ;;  %v970_v48 = vmul.f32 %v7002_v37, %v8333_v55  ;;  %v987_v54 = vadd.f32 %v8336_v56, %v951_v22 }
  0xeb   : > { %v8397_v42 = vmul.f32 0.16666667, %v1113_v9  ;;  %v8399_v35 = vmul.f32 0.16666667, %v1129_v19  ;;  %v1003_v30 = vadd.f32 %v8336_v56, %v967_v25  ;;  %v990_v11 = vadd.f32 %v8336_v56, %v954_v7  ;;  %v8411_v9 = vpop.f32.mrf.mxu1 }
  0xec   : > { %v1084_v33 = vmin.f32 %v1052_v31, 6.0  ;;  %v1100_v8 = vmin.f32 %v1068_v32, 6.0  ;;  %v1006_v23 = vadd.f32 %v8336_v56, %v970_v48  ;;  %v1019_v37 = vadd.f32 3.0, %v987_v54  ;;  %v6981_v48 = vpop.f32.mrf.mxu0 }
  0xed   : > { %10465 = vst [vmem:[#allocation27_spill] sm:$0xff] %v8397_v42  ;;  %10466 = vst [vmem:[#allocation28_spill] sm:$0xff] %v8399_v35  ;;  %v1035_v26 = vadd.f32 3.0, %v1003_v30  ;;  %7072 = vmatprep.mubr.msk.f32.mxu0 %vm1402_vm0, %v8397_v42  ;;  %v1022_v63 = vadd.f32 3.0, %v990_v11  ;;  %v953_v7 = vmul.f32 %v8333_v55, %v813_v24 }
  0xee   : > { %1439 = vst.msk [vmem:[#allocation2 + $0x18] sm:$0xff] %vm1402_vm0, %v8397_v42  ;;  %1455 = vst.msk [vmem:[#allocation2 + $0x98] sm:$0xff] %vm1402_vm0, %v8399_v35  ;;  %v1116_v57 = vmul.f32 %v1084_v33, %v988_v6  ;;  %v1132_v62 = vmul.f32 %v1100_v8, %v1004_v10  ;;  %v1038_v18 = vadd.f32 3.0, %v1006_v23  ;;  %7073 = vmatmul.mubr.msk.f32.gmra.mxu0 %vm1402_vm0, %v8380_v39  ;;  %v1051_v19 = vmax.f32 %v1019_v37, 0.0 }
  0xef   : > { %v1067_v22 = vmax.f32 %v1035_v26, 0.0  ;;  %v1054_v32 = vmax.f32 %v1022_v63, 0.0  ;;  %v989_v8 = vadd.f32 %v8336_v56, %v953_v7  ;;  %v969_v37 = vmul.f32 %v8333_v55, %v8358_v0  ;;  %v8427_v26 = vpop.f32.mrf.mxu1  ;;  %v8430_v63 = vpop.permute.xlu0 %1573 }
  0xf0   : > { %v8415_v25 = vmul.f32 0.16666667, %v1116_v57  ;;  %v8417_v31 = vmul.f32 0.16666667, %v1132_v62  ;;  %v1083_v42 = vmin.f32 %v1051_v19, 6.0  ;;  %v1070_v33 = vmax.f32 %v1038_v18, 0.0 }
  0xf1   : > { %v1099_v6 = vmin.f32 %v1067_v22, 6.0  ;;  %v1086_v10 = vmin.f32 %v1054_v32, 6.0  ;;  %v956_v62 = vmul.f32 %v6981_v48, %v8333_v55  ;;  %v1021_v45 = vadd.f32 3.0, %v989_v8 }
  0xf2   : > { %10467 = vst [vmem:[#allocation29_spill] sm:$0xff] %v8415_v25  ;;  %10468 = vst [vmem:[#allocation30_spill] sm:$0xff] %v8417_v31  ;;  %v1115_v57 = vmul.f32 %v1083_v42, %v987_v54  ;;  %v1102_v22 = vmin.f32 %v1070_v33, 6.0  ;;  %v1005_v39 = vadd.f32 %v8336_v56, %v969_v37  ;;  %v972_v0 = vmul.f32 %v8376_v34, %v8333_v55  ;;  %v823_v42 = vpop.f32.mrf.mxu0  ;;  %v8440_v54 = vpop.permute.xlu1 %1569 }
  0xf3   : > { %1442 = vst.msk [vmem:[#allocation2 + $0x30] sm:$0xff] %vm1402_vm0, %v8415_v25  ;;  %1458 = vst.msk [vmem:[#allocation2 + $0xb0] sm:$0xff] %vm1402_vm0, %v8417_v31  ;;  %v1131_v24 = vmul.f32 %v1099_v6, %v1003_v30  ;;  %v1118_v19 = vmul.f32 %v1086_v10, %v990_v11  ;;  %v992_v7 = vadd.f32 %v8336_v56, %v956_v62  ;;  %v1053_v11 = vmax.f32 %v1021_v45, 0.0  ;;  %v8444_v10 = vpop.f32.mrf.mxu1 }
  0xf4   : > { %v8433_v32 = vmul.f32 0.16666667, %v1115_v57  ;;  %v1134_v48 = vmul.f32 %v1102_v22, %v1006_v23  ;;  %v1037_v6 = vadd.f32 3.0, %v1005_v39  ;;  %v1008_v37 = vadd.f32 %v8336_v56, %v972_v0  ;;  %v8460_v22 = vpop.permute.xlu0 %2543 }
  0xf5   : > { %v8435_v18 = vmul.f32 0.16666667, %v1131_v24  ;;  %v8442_v30 = vmul.f32 0.16666667, %v1118_v19  ;;  %v1024_v33 = vadd.f32 3.0, %v992_v7  ;;  %v1085_v45 = vmin.f32 %v1053_v11, 6.0  ;;  %v6984_v19 = vpop.f32.mrf.mxu0  ;;  %v8464_v46 = vpop.f32.mrf.mxu1 }
  0xf6   : > { %10469 = vst [vmem:[#allocation31_spill] sm:$0xff] %v8433_v32  ;;  %1441 = vst.msk [vmem:[#allocation2 + $0x28] sm:$0xff] %vm1402_vm0, %v8433_v32  ;;  %7075 = vmatprep.mubr.msk.f32.mxu0 %vm1402_vm0, %v8433_v32  ;;  %v8455_v34 = vmul.f32 0.16666667, %v1134_v48  ;;  %v1069_v23 = vmax.f32 %v1037_v6, 0.0  ;;  %v955_v57 = vmul.f32 %v8333_v55, %v823_v42  ;;  %v1040_v62 = vadd.f32 3.0, %v1008_v37 }
  0xf7   : > { %10470 = vst [vmem:[#allocation32_spill] sm:$0xff] %v8435_v18  ;;  %10471 = vst [vmem:[#allocation33_spill] sm:$0xff] %v8442_v30  ;;  %7076 = vmatmul.mubr.msk.f32.gmra.mxu0 %vm1402_vm0, %v8415_v25  ;;  %v1056_v24 = vmax.f32 %v1024_v33, 0.0  ;;  %v1117_v0 = vmul.f32 %v1085_v45, %v989_v8  ;;  %v971_v42 = vmul.f32 %v8333_v55, %v8395_v47  ;;  %v8469_v25 = vpop.permute.xlu1 %2539  ;;  %v833_v45 = vpop.f32.mrf.mxu0 }
  0xf8   : > { %1457 = vst.msk [vmem:[#allocation2 + $0xa8] sm:$0xff] %vm1402_vm0, %v8435_v18  ;;  %1444 = vst.msk [vmem:[#allocation2 + $0x40] sm:$0xff] %vm1402_vm0, %v8442_v30  ;;  %v1101_v32 = vmin.f32 %v1069_v23, 6.0  ;;  %v1072_v11 = vmax.f32 %v1040_v62, 0.0  ;;  %v991_v6 = vadd.f32 %v8336_v56, %v955_v57  ;;  %v958_v57 = vmul.f32 %v6984_v19, %v8333_v55 }
  0xf9   : > { %10472 = vst [vmem:[#allocation34_spill] sm:$0xff] %v8455_v34  ;;  %10473 = vst [vmem:[#allocation35_spill] sm:$0xff] %v8460_v22  ;;  %v1088_v48 = vmin.f32 %v1056_v24, 6.0  ;;  %v8471_v33 = vmul.f32 0.16666667, %v1117_v0  ;;  %v1007_v8 = vadd.f32 %v8336_v56, %v971_v42  ;;  %v974_v47 = vmul.f32 %v8411_v9, %v8333_v55  ;;  %v8481_v24 = vpop.f32.mrf.mxu1 }
  0xfa   : > { %1460 = vst.msk [vmem:[#allocation2 + $0xc0] sm:$0xff] %vm1402_vm0, %v8455_v34  ;;  %v1133_v17 = vmul.f32 %v1101_v32, %v1005_v39  ;;  %v1104_v15 = vmin.f32 %v1072_v11, 6.0  ;;  %v1023_v13 = vadd.f32 3.0, %v991_v6  ;;  %v994_v9 = vadd.f32 %v8336_v56, %v958_v57 }
  0xfb   : > { %10474 = vst [vmem:[#allocation36_spill] sm:$0xff] %v8471_v33  ;;  %v1120_v22 = vmul.f32 %v1088_v48, %v992_v7  ;;  %1443 = vst.msk [vmem:[#allocation2 + $0x38] sm:$0xff] %vm1402_vm0, %v8471_v33  ;;  %7078 = vmatprep.mubr.msk.f32.mxu0 %vm1402_vm0, %v8471_v33  ;;  %v1039_v62 = vadd.f32 3.0, %v1007_v8  ;;  %v1010_v19 = vadd.f32 %v8336_v56, %v974_v47  ;;  %v6987_v48 = vpop.f32.mrf.mxu0  ;;  %v8502_v11 = vpop.permute.xlu1 %1577 }
  0xfc   : > { %v8476_v23 = vmul.f32 0.16666667, %v1133_v17  ;;  %v1136_v32 = vmul.f32 %v1104_v15, %v1008_v37  ;;  %v1055_v7 = vmax.f32 %v1023_v13, 0.0  ;;  %7079 = vmatmul.mubr.msk.f32.gmra.mxu0 %vm1402_vm0, %v8442_v30  ;;  %v8489_v17 = vpop.permute.xlu0 %1581  ;;  %v957_v0 = vmul.f32 %v8333_v55, %v833_v45  ;;  %v8504_v57 = vpop.f32.mrf.mxu1 }
  0xfd   : > { %v8485_v39 = vmul.f32 0.16666667, %v1120_v22  ;;  %v1071_v37 = vmax.f32 %v1039_v62, 0.0  ;;  %v973_v22 = vmul.f32 %v8333_v55, %v8427_v26  ;;  %v1026_v42 = vadd.f32 3.0, %v994_v9  ;;  %v843_v2 = vpop.f32.mrf.mxu0 }
  0xfe   : > { %10475 = vst [vmem:[#allocation37_spill] sm:$0xff] %v8476_v23  ;;  %1459 = vst.msk [vmem:[#allocation2 + $0xb8] sm:$0xff] %vm1402_vm0, %v8476_v23  ;;  %v8498_v15 = vmul.f32 0.16666667, %v1136_v32  ;;  %v1087_v13 = vmin.f32 %v1055_v7, 6.0  ;;  %v1042_v33 = vadd.f32 3.0, %v1010_v19  ;;  %v993_v7 = vadd.f32 %v8336_v56, %v957_v0  ;;  %v8509_v62 = vpop.f32.mrf.mxu1 }
  0xff   : > { %10476 = vst [vmem:[#allocation38_spill] sm:$0xff] %v8485_v39  ;;  %1446 = vst.msk [vmem:[#allocation2 + $0x50] sm:$0xff] %vm1402_vm0, %v8485_v39  ;;  %v1103_v47 = vmin.f32 %v1071_v37, 6.0  ;;  %v1058_v30 = vmax.f32 %v1026_v42, 0.0  ;;  %v1009_v3 = vadd.f32 %v8336_v56, %v973_v22  ;;  %v8527_v37 = vpop.permute.xlu1 %2547 }
 0x100   : > { %10477 = vst [vmem:[#allocation39_spill] sm:$0xff] %v8498_v15  ;;  %1462 = vst.msk [vmem:[#allocation2 + $0xd0] sm:$0xff] %vm1402_vm0, %v8498_v15  ;;  %v1119_v45 = vmul.f32 %v1087_v13, %v991_v6  ;;  %v1074_v32 = vmax.f32 %v1042_v33, 0.0  ;;  %v8514_v59 = vpop.permute.xlu0 %2551  ;;  %v1025_v43 = vadd.f32 3.0, %v993_v7  ;;  %v960_v6 = vmul.f32 %v6987_v48, %v8333_v55 }
 0x101   : > { %10478 = vst [vmem:[#allocation40_spill] sm:$0xff] %v8509_v62  ;;  %v1135_v26 = vmul.f32 %v1103_v47, %v1007_v8  ;;  %10480 = vst [vmem:[#allocation42_spill] sm:$0xff] %v8514_v59  ;;  %v1090_v58 = vmin.f32 %v1058_v30, 6.0  ;;  %v1041_v0 = vadd.f32 3.0, %v1009_v3  ;;  %v976_v13 = vmul.f32 %v8444_v10, %v8333_v55  ;;  %v8525_v8 = vpop.f32.mrf.mxu1  ;;  %v6990_v47 = vpop.f32.mrf.mxu0 }
 0x102   : > { %v8511_v12 = vmul.f32 0.16666667, %v1119_v45  ;;  %v1106_v50 = vmin.f32 %v1074_v32, 6.0  ;;  %10482 = vst [vmem:[#allocation44_spill] sm:$0xff] %v8525_v8  ;;  %10483 = vst [vmem:[#allocation45_spill] sm:$0xff] %v8527_v37  ;;  %v1057_v48 = vmax.f32 %v1025_v43, 0.0  ;;  %v996_v45 = vadd.f32 %v8336_v56, %v960_v6 }
 0x103   : > { %v8519_v33 = vmul.f32 0.16666667, %v1135_v26  ;;  %v1122_v30 = vmul.f32 %v1090_v58, %v994_v9  ;;  %v1073_v42 = vmax.f32 %v1041_v0, 0.0  ;;  %v1012_v10 = vadd.f32 %v8336_v56, %v976_v13  ;;  %v8535_v32 = vpop.f32.mrf.mxu1 }
 0x104   : > { %10479 = vst [vmem:[#allocation41_spill] sm:$0xff] %v8511_v12  ;;  %1445 = vst.msk [vmem:[#allocation2 + $0x48] sm:$0xff] %vm1402_vm0, %v8511_v12  ;;  %7081 = vmatprep.mubr.msk.f32.mxu0 %vm1402_vm0, %v8511_v12  ;;  %v1138_v22 = vmul.f32 %v1106_v50, %v1010_v19  ;;  %v959_v50 = vmul.f32 %v8333_v55, %v843_v2  ;;  %v1089_v58 = vmin.f32 %v1057_v48, 6.0  ;;  %v1028_v19 = vadd.f32 3.0, %v996_v45  ;;  %v8544_v43 = vpop.permute.xlu0 %1589 }
 0x105   : > { %10481 = vst [vmem:[#allocation43_spill] sm:$0xff] %v8519_v33  ;;  %7082 = vmatmul.mubr.msk.f32.gmra.mxu0 %vm1402_vm0, %v8485_v39  ;;  %1461 = vst.msk [vmem:[#allocation2 + $0xc8] sm:$0xff] %vm1402_vm0, %v8519_v33  ;;  %v8537_v26 = vmul.f32 0.16666667, %v1122_v30  ;;  %v1105_v9 = vmin.f32 %v1073_v42, 6.0  ;;  %v1044_v39 = vadd.f32 3.0, %v1012_v10  ;;  %v8542_v62 = vpop.f32.mrf.mxu1  ;;  %v975_v0 = vmul.f32 %v8333_v55, %v8464_v46 }
 0x106   : > { %10484 = vst [vmem:[#allocation46_spill] sm:$0xff] %v8535_v32  ;;  %v8539_v12 = vmul.f32 0.16666667, %v1138_v22  ;;  %10487 = vst [vmem:[#allocation49_spill] sm:$0xff] %v8542_v62  ;;  %v995_v6 = vadd.f32 %v8336_v56, %v959_v50  ;;  %v962_v2 = vmul.f32 %v6990_v47, %v8333_v55  ;;  %v1121_v13 = vmul.f32 %v1089_v58, %v993_v7  ;;  %v8557_v62 = vpop.permute.xlu1 %1585 }
 0x107   : > { %10485 = vst [vmem:[#allocation47_spill] sm:$0xff] %v8537_v26  ;;  %1448 = vst.msk [vmem:[#allocation2 + $0x60] sm:$0xff] %vm1402_vm0, %v8537_v26  ;;  %v1137_v30 = vmul.f32 %v1105_v9, %v1009_v3  ;;  %v1060_v22 = vmax.f32 %v1028_v19, 0.0  ;;  %v1076_v48 = vmax.f32 %v1044_v39, 0.0  ;;  %v8554_v42 = vpop.f32.mrf.mxu1  ;;  %v1632_v32 = vrot.slane %v8234_v41, 1  ;;  %v1469_v3 = vld [vmem:[#allocation2] sm:$0xff] }
 0x108   : > { %10486 = vst [vmem:[#allocation48_spill] sm:$0xff] %v8539_v12  ;;  %1464 = vst.msk [vmem:[#allocation2 + $0xe0] sm:$0xff] %vm1402_vm0, %v8539_v12  ;;  %v1027_v8 = vadd.f32 3.0, %v995_v6  ;;  %v1011_v59 = vadd.f32 %v8336_v56, %v975_v0  ;;  %v8560_v37 = vmul.f32 0.16666667, %v1121_v13  ;;  %v998_v58 = vadd.f32 %v8336_v56, %v962_v2 }
 0x109   : > { %10488 = vst [vmem:[#allocation50_spill] sm:$0xff] %v8554_v42  ;;  %v8562_v50 = vmul.f32 0.16666667, %v1137_v30  ;;  %v1092_v46 = vmin.f32 %v1060_v22, 6.0  ;;  %v1108_v12 = vmin.f32 %v1076_v48, 6.0  ;;  %v8564_v47 = vpop.f32.mrf.mxu1  ;;  %v1635_v0 = vrot.slane %v8232_v40, 1  ;;  %v853_v22 = vpop.f32.mrf.mxu0 }
 0x10a   : > { %10489 = vst [vmem:[#allocation51_spill] sm:$0xff] %v8560_v37  ;;  %10491 = vst [vmem:[#allocation53_spill] sm:$0xff] %v8564_v47  ;;  %v1059_v7 = vmax.f32 %v1027_v8, 0.0  ;;  %v1043_v39 = vadd.f32 3.0, %v1011_v59  ;;  %7084 = vmatprep.mubr.msk.f32.mxu0 %vm1402_vm0, %v8560_v37  ;;  %v8576_v8 = vpop.permute.xlu0 %2559  ;;  %v1030_v30 = vadd.f32 3.0, %v998_v58  ;;  %v1728_v48 = vmul.f32 %v1632_v32, %v1469_v3 }
 0x10b   : > { %10490 = vst [vmem:[#allocation52_spill] sm:$0xff] %v8562_v50  ;;  %1447 = vst.msk [vmem:[#allocation2 + $0x58] sm:$0xff] %vm1402_vm0, %v8560_v37  ;;  %v1124_v41 = vmul.f32 %v1092_v46, %v996_v45  ;;  %v1140_v9 = vmul.f32 %v1108_v12, %v1012_v10  ;;  %v8573_v19 = vpop.f32.mrf.mxu1  ;;  %7085 = vmatmul.mubr.msk.f32.gmra.mxu0 %vm1402_vm0, %v8537_v26  ;;  %v1633_v45 = vrot.slane %v8244_v44, 1  ;;  %v8587_v37 = vpop.permute.xlu1 %2555  ;;  %v1637_v42 = vrot.slane %v8257_v53, 1  ;;  %v8604_v53 = vld [vmem:[#allocation2 + $0x8] sm:$0xff] }
 0x10c   : > { %1463 = vst.msk [vmem:[#allocation2 + $0xd8] sm:$0xff] %vm1402_vm0, %v8562_v50  ;;  %10492 = vst [vmem:[#allocation54_spill] sm:$0xff] %v8573_v19  ;;  %v1091_v13 = vmin.f32 %v1059_v7, 6.0  ;;  %v1075_v2 = vmax.f32 %v1043_v39, 0.0  ;;  %v1062_v7 = vmax.f32 %v1030_v30, 0.0  ;;  %v978_v39 = vmul.f32 %v8481_v24, %v8333_v55 }
 0x10d   : > { %10493 = vst [vmem:[#allocation55_spill] sm:$0xff] %v8576_v8  ;;  %v8581_v12 = vmul.f32 0.16666667, %v1124_v41  ;;  %v8583_v10 = vmul.f32 0.16666667, %v1140_v9  ;;  %v8585_v46 = vpop.f32.mrf.mxu1  ;;  %v961_v44 = vmul.f32 %v8333_v55, %v853_v22  ;;  %v977_v3 = vmul.f32 %v8333_v55, %v8504_v57 }
 0x10e   : > { %10496 = vst [vmem:[#allocation58_spill] sm:$0xff] %v8585_v46  ;;  %v1123_v40 = vmul.f32 %v1091_v13, %v995_v6  ;;  %v1107_v19 = vmin.f32 %v1075_v2, 6.0  ;;  %v1094_v13 = vmin.f32 %v1062_v7, 6.0  ;;  %v1014_v24 = vadd.f32 %v8336_v56, %v978_v39  ;;  %v8609_v46 = vld [vmem:[#allocation2 + $0x10] sm:$0xff] }
 0x10f   : > { %10494 = vst [vmem:[#allocation56_spill] sm:$0xff] %v8581_v12  ;;  %10495 = vst [vmem:[#allocation57_spill] sm:$0xff] %v8583_v10  ;;  %v8599_v41 = vpop.f32.mrf.mxu1  ;;  %v2119_v2 = vrot.slane %v1728_v48, 7  ;;  %v1634_v30 = vsel %vm1631_vm3, %v1632_v32, %v1633_v45  ;;  %v997_v26 = vadd.f32 %v8336_v56, %v961_v44  ;;  %v1013_v22 = vadd.f32 %v8336_v56, %v977_v3  ;;  %v8629_v3 = vpop.permute.xlu1 %1593 }
 0x110   : > { %1450 = vst.msk [vmem:[#allocation2 + $0x70] sm:$0xff] %vm1402_vm0, %v8581_v12  ;;  %1466 = vst.msk [vmem:[#allocation2 + $0xf0] sm:$0xff] %vm1402_vm0, %v8583_v10  ;;  %v8601_v6 = vmul.f32 0.16666667, %v1123_v40  ;;  %v1139_v9 = vmul.f32 %v1107_v19, %v1011_v59  ;;  %v1636_v57 = vsel %vm1631_vm3, %v1633_v45, %v1635_v0  ;;  %v8614_v40 = vpop.permute.xlu0 %1597  ;;  %v1126_v19 = vmul.f32 %v1094_v13, %v998_v58  ;;  %v8636_v13 = vld [vmem:[#allocation2 + $0x18] sm:$0xff] }
 0x111   : > { %10497 = vst [vmem:[#allocation59_spill] sm:$0xff] %v8599_v41  ;;  %v8611_v55 = vpop.f32.mrf.mxu1  ;;  %v1046_v48 = vadd.f32 3.0, %v1014_v24  ;;  %v1639_v56 = vrot.slane %v8255_v52, 1  ;;  %v1029_v32 = vadd.f32 3.0, %v997_v26  ;;  %v1045_v7 = vadd.f32 3.0, %v1013_v22 }
 0x112   : > { %10498 = vst [vmem:[#allocation60_spill] sm:$0xff] %v8601_v6  ;;  %10499 = vst [vmem:[#allocation61_spill] sm:$0xff] %v8611_v55  ;;  %v8618_v59 = vmul.f32 0.16666667, %v1139_v9  ;;  %7087 = vmatprep.mubr.msk.f32.mxu0 %vm1402_vm0, %v8601_v6  ;;  %v1729_v39 = vmul.f32 %v1634_v30, %v8604_v53  ;;  %v1638_v44 = vsel %vm1631_vm3, %v1635_v0, %v1637_v42  ;;  %v8633_v58 = vmul.f32 0.16666667, %v1126_v19 }
 0x113   : > { %1449 = vst.msk [vmem:[#allocation2 + $0x68] sm:$0xff] %vm1402_vm0, %v8601_v6  ;;  %7088 = vmatmul.mubr.msk.f32.gmra.mxu0 %vm1402_vm0, %v8581_v12  ;;  %v8626_v45 = vpop.f32.mrf.mxu1  ;;  %v1078_v9 = vmax.f32 %v1046_v48, 0.0  ;;  %v1730_v52 = vmul.f32 %v1636_v57, %v8609_v46  ;;  %v1643_v30 = vrot.slane %v8265_v60, 1  ;;  %v1061_v6 = vmax.f32 %v1029_v32, 0.0  ;;  %v8647_v32 = vld [vmem:[#allocation2 + $0x20] sm:$0xff] }
 0x114   : > { %10500 = vst [vmem:[#allocation62_spill] sm:$0xff] %v8618_v59  ;;  %10501 = vst [vmem:[#allocation63_spill] sm:$0xff] %v8626_v45  ;;  %v1077_v12 = vmax.f32 %v1045_v7, 0.0  ;;  %v2120_v41 = vrot.slane %v1729_v39, 7  ;;  %v1641_v45 = vrot.slane %v8267_v61, 1  ;;  %v1645_v0 = vrot.slane %v8277_v5, 1  ;;  %v8650_v61 = vpop.permute.xlu0 %2567 }
 0x115   : > { %1465 = vst.msk [vmem:[#allocation2 + $0xe8] sm:$0xff] %vm1402_vm0, %v8618_v59  ;;  %10502 = vst [vmem:[#allocation64_spill] sm:$0xff] %v8633_v58  ;;  %v1110_v55 = vmin.f32 %v1078_v9, 6.0  ;;  %v2122_v19 = vrot.slane %v1730_v52, 7  ;;  %v8643_v47 = vpop.f32.mrf.mxu1  ;;  %v1093_v48 = vmin.f32 %v1061_v6, 6.0  ;;  %v1731_v60 = vmul.f32 %v1638_v44, %v8636_v13 }
 0x116   : > { %1452 = vst.msk [vmem:[#allocation2 + $0x80] sm:$0xff] %vm1402_vm0, %v8633_v58  ;;  %10503 = vst [vmem:[#allocation65_spill] sm:$0xff] %v8643_v47  ;;  %v1109_v57 = vmin.f32 %v1077_v12, 6.0  ;;  %v2121_v8 = vsel %vm2118_vm2, %v2119_v2, %v2120_v41  ;;  %v1647_v7 = vrot.slane %v8275_v4, 1  ;;  %v1640_v9 = vsel %vm1631_vm3, %v1637_v42, %v1639_v56  ;;  %v8657_v2 = vpop.permute.xlu1 %2563 }
 0x117   : > { %v1142_v5 = vmul.f32 %v1110_v55, %v1014_v24  ;;  %7119 = vmatprep.mubr.msk.f32.mxu1 %vm1402_vm0, %v2121_v8  ;;  %v2123_v39 = vsel %vm2118_vm2, %v2120_v41, %v2122_v19  ;;  %v1125_v52 = vmul.f32 %v1093_v48, %v997_v26  ;;  %v1642_v12 = vsel %vm1631_vm3, %v1639_v56, %v1641_v45  ;;  %v8662_v24 = vld [vmem:[#allocation2 + $0x28] sm:$0xff]  ;;  %v8664_v8 = vld [vmem:[#allocation2 + $0x30] sm:$0xff]  ;;  %v8666_v41 = vpop.f32.mrf.mxu1  ;;  %v8674_v56 = vld [vmem:[#allocation2 + $0x38] sm:$0xff] }
 0x118   : > { %v1141_v6 = vmul.f32 %v1109_v57, %v1013_v22  ;;  %7120 = vmatmul.mubr.msk.f32.vlgmr.msra.gmra.mxu1 %vm1402_vm0, %v2123_v39  ;;  %v2124_v4 = vrot.slane %v1731_v60, 7  ;;  %v1732_v47 = vmul.f32 %v1640_v9, %v8647_v32  ;;  %10505 = vst [vmem:[#allocation67_spill] sm:$0xff] %v8666_v41  ;;  %v1644_v26 = vsel %vm1631_vm3, %v1641_v45, %v1643_v30  ;;  %v8676_v48 = vld [vmem:[#allocation2 + $0x40] sm:$0xff]  ;;  %v8814_v41 = vld [vmem:[#allocation2 + $0xb0] sm:$0xff] }
 0x119   : > { %v8659_v44 = vmul.f32 0.16666667, %v1142_v5  ;;  %v1646_v42 = vsel %vm1631_vm3, %v1643_v30, %v1645_v0  ;;  %v8670_v22 = vmul.f32 0.16666667, %v1125_v52  ;;  %v1648_v57 = vsel %vm1631_vm3, %v1645_v0, %v1647_v7  ;;  %v8702_v52 = vpop.f32.mrf.mxu1 }
 0x11a   : > { %v8672_v55 = vmul.f32 0.16666667, %v1141_v6  ;;  %v1649_v60 = vrot.slane %v8287_v16, 1  ;;  %v2125_v5 = vsel %vm2118_vm2, %v2122_v19, %v2124_v4  ;;  %v2126_v45 = vrot.slane %v1732_v47, 7  ;;  %10508 = vst [vmem:[#allocation70_spill] sm:$0xff] %v8702_v52  ;;  %v8821_v52 = vld [vmem:[#allocation2 + $0x90] sm:$0xff] }
 0x11b   : > { %10504 = vst [vmem:[#allocation66_spill] sm:$0xff] %v8659_v44  ;;  %10506 = vst [vmem:[#allocation68_spill] sm:$0xff] %v8670_v22  ;;  %v1651_v30 = vrot.slane %v8285_v14, 1  ;;  %v1653_v39 = vrot.slane %v8297_v21, 1  ;;  %7122 = vmatprep.mubr.msk.f32.mxu1 %vm1402_vm0, %v2125_v5  ;;  %v1733_v16 = vmul.f32 %v1642_v12, %v8662_v24  ;;  %v1734_v0 = vmul.f32 %v1644_v26, %v8664_v8  ;;  %v8695_v14 = vpop.permute.xlu0 %1605  ;;  %v8708_v26 = vpop.permute.xlu1 %1601 }
 0x11c   : > { %10507 = vst [vmem:[#allocation69_spill] sm:$0xff] %v8672_v55  ;;  %1468 = vst.msk [vmem:[#allocation2 + $0x100] sm:$0xff] %vm1402_vm0, %v8659_v44  ;;  %7090 = vmatprep.mubr.msk.f32.mxu0 %vm1402_vm0, %v8670_v22  ;;  %v1655_v47 = vrot.slane %v8295_v20, 1  ;;  %v2127_v21 = vsel %vm2118_vm2, %v2124_v4, %v2126_v45  ;;  %v1735_v19 = vmul.f32 %v1646_v42, %v8674_v56 }
 0x11d   : > { %1451 = vst.msk [vmem:[#allocation2 + $0x78] sm:$0xff] %vm1402_vm0, %v8670_v22  ;;  %1467 = vst.msk [vmem:[#allocation2 + $0xf8] sm:$0xff] %vm1402_vm0, %v8672_v55  ;;  %v1736_v9 = vmul.f32 %v1648_v57, %v8676_v48  ;;  %7091 = vmatmul.mubr.msk.f32.gmra.mxu0 %vm1402_vm0, %v8633_v58  ;;  %7123 = vmatmul.mubr.msk.f32.gmra.mxu1 %vm1402_vm0, %v2127_v21  ;;  %v2128_v6 = vrot.slane %v1733_v16, 7  ;;  %v2130_v12 = vrot.slane %v1734_v0, 7  ;;  %v8714_v22 = vld [vmem:[#allocation2 + $0x48] sm:$0xff]  ;;  %v8716_v21 = vld [vmem:[#allocation2 + $0x50] sm:$0xff] }
 0x11e   : > { %7093 = vmatprep.mubr.msk.f32.mxu0 %vm1402_vm0, %v8366_v1  ;;  %v1650_v20 = vsel %vm1631_vm3, %v1647_v7, %v1649_v60  ;;  %v1652_v4 = vsel %vm1631_vm3, %v1649_v60, %v1651_v30  ;;  %v1654_v42 = vsel %vm1631_vm3, %v1651_v30, %v1653_v39  ;;  %v1656_v16 = vsel %vm1631_vm3, %v1653_v39, %v1655_v47  ;;  %v8723_v60 = vpop.f32.mrf.mxu1 }
 0x11f   : > { %v2129_v57 = vsel %vm2118_vm2, %v2126_v45, %v2128_v6  ;;  %v2131_v5 = vsel %vm2118_vm2, %v2128_v6, %v2130_v12  ;;  %v1657_v0 = vrot.slane %v8307_v29, 1  ;;  %v2132_v7 = vrot.slane %v1735_v19, 7  ;;  %10509 = vst [vmem:[#allocation71_spill] sm:$0xff] %v8723_v60  ;;  %v8732_v29 = vpop.permute.xlu0 %2575 }
 0x120   : > { %7125 = vmatprep.mubr.msk.f32.mxu1 %vm1402_vm0, %v2129_v57  ;;  %v2134_v1 = vrot.slane %v1736_v9, 7  ;;  %v1659_v45 = vrot.slane %v8305_v28, 1  ;;  %v1663_v30 = vrot.slane %v8440_v54, 1  ;;  %v1661_v6 = vrot.slane %v8315_v36, 1  ;;  %10510 = vst [vmem:[#allocation72_spill] sm:$0xff] %v8732_v29  ;;  %v8823_v29 = vld [vmem:[#allocation2 + $0x98] sm:$0xff] }
 0x121   : > { %7094 = vmatmul.mubr.msk.f32.gmra.mxu0 %vm1402_vm0, %v8356_v49  ;;  %7126 = vmatmul.mubr.msk.f32.gmra.mxu1 %vm1402_vm0, %v2131_v5  ;;  %v2133_v39 = vsel %vm2118_vm2, %v2130_v12, %v2132_v7  ;;  %v1737_v9 = vmul.f32 %v1650_v20, %v8714_v22  ;;  %v8738_v28 = vmul.f32 %v1652_v4, %v8716_v21  ;;  %v1667_v36 = vrot.slane %v8502_v11, 1  ;;  %v8752_v11 = vpop.f32.mrf.mxu1 }
 0x122   : > { %7096 = vmatprep.mubr.msk.f32.mxu0 %vm1402_vm0, %v8399_v35  ;;  %v2135_v19 = vsel %vm2118_vm2, %v2132_v7, %v2134_v1  ;;  %v1665_v54 = vrot.slane %v8430_v63, 1  ;;  %v1671_v57 = vrot.slane %v8557_v62, 1  ;;  %v1669_v5 = vrot.slane %v8489_v17, 1  ;;  %7128 = vmatprep.mubr.msk.f32.mxu1 %vm1402_vm0, %v2133_v39  ;;  %v8747_v7 = vpop.permute.xlu1 %2571  ;;  %10511 = vst [vmem:[#allocation73_spill] sm:$0xff] %v8752_v11  ;;  %v8761_v39 = vld [vmem:[#allocation2 + $0x60] sm:$0xff] }
 0x123   : > { %v1658_v58 = vsel %vm1631_vm3, %v1655_v47, %v1657_v0  ;;  %v1673_v12 = vrot.slane %v8544_v43, 1  ;;  %v2136_v20 = vrot.slane %v1737_v9, 7  ;;  %v2138_v4 = vrot.slane %v8738_v28, 7  ;;  %v8759_v43 = vld [vmem:[#allocation2 + $0x58] sm:$0xff]  ;;  %v8763_v9 = vld [vmem:[#allocation2 + $0x68] sm:$0xff] }
 0x124   : > { %v1660_v63 = vsel %vm1631_vm3, %v1657_v0, %v1659_v45  ;;  %v1662_v17 = vsel %vm1631_vm3, %v1659_v45, %v1661_v6  ;;  %v1664_v62 = vsel %vm1631_vm3, %v1661_v6, %v1663_v30  ;;  %v1675_v47 = vrot.slane %v8629_v3, 1 }
 0x125   : > { %7097 = vmatmul.mubr.msk.f32.gmra.mxu0 %vm1402_vm0, %v8382_v27  ;;  %7129 = vmatmul.mubr.msk.f32.gmra.mxu1 %vm1402_vm0, %v2135_v19  ;;  %v10512_v28 = vrot.slane %v8469_v25, 7  ;;  %v10513_v35 = vrot.slane %v8317_v38, 7  ;;  %v1677_v45 = vrot.slane %v8614_v40, 1  ;;  %v2137_v6 = vsel %vm2118_vm2, %v2134_v1, %v2136_v20  ;;  %v8777_v19 = vld [vmem:[#allocation2 + $0x70] sm:$0xff]  ;;  %v8779_v27 = vld [vmem:[#allocation2 + $0x78] sm:$0xff] }
 0x126   : > { %v2139_v3 = vsel %vm2118_vm2, %v2136_v20, %v2138_v4  ;;  %7099 = vmatprep.mubr.msk.f32.mxu0 %vm1402_vm0, %v8435_v18  ;;  %v1666_v49 = vsel %vm1631_vm3, %v1663_v30, %v1665_v54  ;;  %v1668_v38 = vsel %vm1631_vm3, %v1665_v54, %v1667_v36  ;;  %7131 = vmatprep.mubr.msk.f32.mxu1 %vm1402_vm0, %v2137_v6  ;;  %v8787_v40 = vld [vmem:[#allocation2 + $0xb8] sm:$0xff]  ;;  %v8789_v20 = vpop.permute.xlu0 %1613  ;;  %v8798_v54 = vpop.f32.mrf.mxu1 }
 0x127   : > { %v8770_v0 = vsel %vm2118_vm2, %v10513_v35, %v10512_v28  ;;  %v1670_v35 = vsel %vm1631_vm3, %v1667_v36, %v1669_v5  ;;  %v1672_v28 = vsel %vm1631_vm3, %v1669_v5, %v1671_v57  ;;  %v1674_v1 = vsel %vm1631_vm3, %v1671_v57, %v1673_v12  ;;  %v8796_v36 = vld [vmem:[#allocation2 + $0x80] sm:$0xff]  ;;  %10514 = vst [vmem:[#allocation74_spill] sm:$0xff] %v8798_v54  ;;  %v8812_v54 = vpop.permute.xlu1 %1609 }
 0x128   : > { %v1739_v18 = vmul.f32 %v1654_v42, %v8759_v43  ;;  %v1740_v60 = vmul.f32 %v1656_v16, %v8761_v39  ;;  %v1741_v30 = vmul.f32 %v1658_v58, %v8763_v9  ;;  %v1676_v5 = vsel %vm1631_vm3, %v1673_v12, %v1675_v47  ;;  %v8807_v58 = vld [vmem:[#allocation2 + $0x88] sm:$0xff]  ;;  %v8809_v16 = vld [vmem:[#allocation2 + $0xa0] sm:$0xff] }
 0x129   : > { %7100 = vmatmul.mubr.msk.f32.gmra.mxu0 %vm1402_vm0, %v8417_v31  ;;  %v1679_v57 = vrot.slane %v8708_v26, 1  ;;  %7132 = vmatmul.mubr.msk.f32.gmra.mxu1 %vm1402_vm0, %v2139_v3  ;;  %v1742_v6 = vmul.f32 %v1660_v63, %v8777_v19  ;;  %v1743_v42 = vmul.f32 %v1662_v17, %v8779_v27  ;;  %v1678_v31 = vsel %vm1631_vm3, %v1675_v47, %v1677_v45  ;;  %v8849_v17 = vld [vmem:[#allocation2 + $0xc8] sm:$0xff] }
 0x12a   : > { %7102 = vmatprep.mubr.msk.f32.mxu0 %vm1402_vm0, %v8476_v23  ;;  %v2140_v12 = vrot.slane %v1739_v18, 7  ;;  %v2142_v11 = vrot.slane %v1740_v60, 7  ;;  %v2144_v26 = vrot.slane %v1741_v30, 7  ;;  %v8817_v63 = vmul.f32 %v1678_v31, %v8787_v40  ;;  %v8831_v31 = vpop.f32.mrf.mxu1 }
 0x12b   : > { %v2148_v3 = vrot.slane %v1743_v42, 7  ;;  %v1744_v23 = vmul.f32 %v1664_v62, %v8796_v36  ;;  %v1745_v30 = vmul.f32 %v1666_v49, %v8807_v58  ;;  %10515 = vst [vmem:[#allocation75_spill] sm:$0xff] %v8831_v31  ;;  %v8834_v42 = vmul.f32 %v1672_v28, %v8809_v16  ;;  %v8844_v49 = vld [vmem:[#allocation2 + $0xa8] sm:$0xff] }
 0x12c   : > { %v2141_v47 = vsel %vm2118_vm2, %v2138_v4, %v2140_v12  ;;  %v2143_v18 = vsel %vm2118_vm2, %v2140_v12, %v2142_v11  ;;  %v2145_v60 = vsel %vm2118_vm2, %v2142_v11, %v2144_v26  ;;  %v8837_v62 = vsel %vm1631_vm3, %v1677_v45, %v1679_v57  ;;  %v8852_v45 = vpop.permute.xlu0 %2583 }
 0x12d   : > { %7103 = vmatmul.mubr.msk.f32.gmra.mxu0 %vm1402_vm0, %v8455_v34  ;;  %v2699_v4 = vmul.f32 %v8253_v51, %v8636_v13  ;;  %7134 = vmatprep.mubr.msk.f32.mxu1 %vm1402_vm0, %v2141_v47  ;;  %v2146_v12 = vrot.slane %v1742_v6, 7  ;;  %v8847_v11 = vmul.f32 %v1676_v5, %v8814_v41  ;;  %v1746_v51 = vmul.f32 %v1668_v38, %v8821_v52  ;;  %v8865_v34 = vpop.permute.xlu1 %2579 }
 0x12e   : > { %7105 = vmatprep.mubr.msk.f32.mxu0 %vm1402_vm0, %v8519_v33  ;;  %7135 = vmatmul.mubr.msk.f32.gmra.mxu1 %vm1402_vm0, %v2143_v18  ;;  %v8857_v13 = vmul.f32 %v1670_v35, %v8823_v29  ;;  %v10516_v47 = vrot.slane %v8695_v14, 1  ;;  %v2150_v28 = vrot.slane %v1744_v23, 7  ;;  %v2152_v31 = vrot.slane %v1745_v30, 7  ;;  %v10517_v35 = vld [vmem:[#allocation4_spill] sm:$0xff] }
 0x12f   : > { %7137 = vmatprep.mubr.msk.f32.mxu1 %vm1402_vm0, %v2145_v60  ;;  %v2147_v33 = vsel %vm2118_vm2, %v2144_v26, %v2146_v12  ;;  %v2149_v18 = vsel %vm2118_vm2, %v2146_v12, %v2148_v3  ;;  %v8871_v38 = vmul.f32 %v1674_v1, %v8844_v49  ;;  %v10518_v6 = vrot.slane %v10517_v35, 7  ;;  %v10520_v60 = vld [vmem:[#allocation5_spill] sm:$0xff]  ;;  %v10521_v12 = vld [vmem:[#allocation6_spill] sm:$0xff] }
 0x130   : > { %v1682_v5 = vsel %vm1631_vm3, %v1679_v57, %v10516_v47  ;;  %v8876_v47 = vpop.f32.mrf.mxu1  ;;  %v2768_v23 = vrot.slane %v2699_v4, 1  ;;  %v2698_v30 = vmul.f32 %v10520_v60, %v8609_v46  ;;  %v2700_v1 = vmul.f32 %v10521_v12, %v8647_v32  ;;  %v8893_v46 = vpop.permute.xlu0 %1621  ;;  %v10522_v60 = vld [vmem:[#allocation48_spill] sm:$0xff] }
 0x131   : > { %7106 = vmatmul.mubr.msk.f32.gmra.mxu0 %vm1402_vm0, %v8498_v15  ;;  %v2697_v57 = vmul.f32 %v10518_v6, %v8604_v53  ;;  %10519 = vst [vmem:[#allocation4_spill] sm:$0xff] %v8876_v47  ;;  %v8879_v26 = vmul.f32 %v1682_v5, %v8849_v17  ;;  %v2151_v35 = vsel %vm2118_vm2, %v2148_v3, %v2150_v28  ;;  %v2154_v53 = vrot.slane %v1746_v51, 7  ;;  %v10523_v3 = vld [vmem:[#allocation7_spill] sm:$0xff] }
 0x132   : > { %7108 = vmatprep.mubr.msk.f32.mxu0 %vm1402_vm0, %v8562_v50  ;;  %7138 = vmatmul.mubr.msk.f32.gmra.mxu1 %vm1402_vm0, %v2147_v33  ;;  %v2156_v6 = vrot.slane %v8857_v13, 7  ;;  %v2153_v4 = vsel %vm2118_vm2, %v2150_v28, %v2152_v31  ;;  %v2766_v15 = vrot.slane %v2698_v30, 1  ;;  %v2770_v47 = vrot.slane %v2700_v1, 1  ;;  %v10524_v13 = vld [vmem:[#allocation8_spill] sm:$0xff]  ;;  %v8903_v12 = vpop.f32.mrf.mxu1  ;;  %v10526_v30 = vld [vmem:[#allocation9_spill] sm:$0xff]  ;;  %v10527_v33 = vld [vmem:[#allocation10_spill] sm:$0xff] }
 0x133   : > { %7140 = vmatprep.mubr.msk.f32.mxu1 %vm1402_vm0, %v2149_v18  ;;  %v2765_v50 = vrot.slane %v2697_v57, 1  ;;  %v2155_v32 = vsel %vm2118_vm2, %v2152_v31, %v2154_v53  ;;  %v2701_v51 = vmul.f32 %v10523_v3, %v8662_v24  ;;  %v2702_v18 = vmul.f32 %v10524_v13, %v8664_v8  ;;  %10525 = vst [vmem:[#allocation5_spill] sm:$0xff] %v8903_v12  ;;  %v8916_v24 = vpop.permute.xlu1 %1617 }
 0x134   : > { %v8909_v31 = vsel %vm1631_vm3, %v2766_v15, %v2768_v23  ;;  %v8912_v57 = vsel %vm1631_vm3, %v2768_v23, %v2770_v47  ;;  %v2703_v1 = vmul.f32 %v10526_v30, %v8674_v56  ;;  %v2157_v8 = vsel %vm2118_vm2, %v2154_v53, %v2156_v6  ;;  %v10528_v23 = vld [vmem:[#allocation11_spill] sm:$0xff]  ;;  %v10530_v30 = vld [vmem:[#allocation13_spill] sm:$0xff] }
 0x135   : > { %7109 = vmatmul.mubr.msk.f32.gmra.mxu0 %vm1402_vm0, %v10522_v60  ;;  %v2767_v28 = vsel %vm1631_vm3, %v2765_v50, %v2766_v15  ;;  %v2772_v3 = vrot.slane %v2701_v51, 1  ;;  %v2774_v13 = vrot.slane %v2702_v18, 1  ;;  %v2704_v50 = vmul.f32 %v10527_v33, %v8676_v48 }
 0x136   : > { %7111 = vmatprep.mubr.msk.f32.mxu0 %vm1402_vm0, %v8618_v59  ;;  %7141 = vmatmul.mubr.msk.f32.gmra.mxu1 %vm1402_vm0, %v2151_v35  ;;  %v2776_v15 = vrot.slane %v2703_v1, 1  ;;  %v2705_v5 = vmul.f32 %v10528_v23, %v8714_v22  ;;  %v10529_v59 = vld [vmem:[#allocation12_spill] sm:$0xff]  ;;  %v2707_v60 = vmul.f32 %v10530_v30, %v8759_v43  ;;  %v8939_v22 = vpop.f32.mrf.mxu1 }
 0x137   : > { %7143 = vmatprep.mubr.msk.f32.mxu1 %vm1402_vm0, %v2153_v4  ;;  %v2706_v56 = vmul.f32 %v10529_v59, %v8716_v21  ;;  %v8932_v35 = vsel %vm1631_vm3, %v2770_v47, %v2772_v3  ;;  %v8935_v48 = vsel %vm1631_vm3, %v2772_v3, %v2774_v13  ;;  %v2778_v53 = vrot.slane %v2704_v50, 1  ;;  %v10531_v4 = vld [vmem:[#allocation14_spill] sm:$0xff]  ;;  %10532 = vst [vmem:[#allocation6_spill] sm:$0xff] %v8939_v22  ;;  %v8946_v47 = vpop.permute.xlu0 %2591  ;;  %v10534_v50 = vld [vmem:[#allocation16_spill] sm:$0xff] }
 0x138   : > { %v2708_v33 = vmul.f32 %v10531_v4, %v8761_v39  ;;  %v8944_v59 = vsel %vm1631_vm3, %v2774_v13, %v2776_v15  ;;  %v2780_v21 = vrot.slane %v2705_v5, 1  ;;  %v2784_v51 = vrot.slane %v2707_v60, 1  ;;  %v10533_v39 = vld [vmem:[#allocation15_spill] sm:$0xff]  ;;  %v10535_v13 = vld [vmem:[#allocation17_spill] sm:$0xff] }
 0x139   : > { %7112 = vmatmul.mubr.msk.f32.gmra.mxu0 %vm1402_vm0, %v8583_v10  ;;  %v2782_v43 = vrot.slane %v2706_v56, 1  ;;  %v8950_v18 = vsel %vm1631_vm3, %v2776_v15, %v2778_v53  ;;  %v2709_v3 = vmul.f32 %v10533_v39, %v8763_v9  ;;  %v2710_v23 = vmul.f32 %v10534_v50, %v8777_v19  ;;  %v8968_v56 = vld [vmem:[#allocation2 + $0xc0] sm:$0xff]  ;;  %v8970_v9 = vpop.permute.xlu1 %2587 }
 0x13a   : > { %7114 = vmatprep.mubr.msk.f32.mxu0 %vm1402_vm0, %v8672_v55  ;;  %7144 = vmatmul.mubr.msk.f32.gmra.mxu1 %vm1402_vm0, %v2155_v32  ;;  %v2786_v1 = vrot.slane %v2708_v33, 1  ;;  %v8958_v5 = vsel %vm1631_vm3, %v2778_v53, %v2780_v21  ;;  %v2711_v15 = vmul.f32 %v10535_v13, %v8779_v27  ;;  %v10536_v53 = vld [vmem:[#allocation18_spill] sm:$0xff]  ;;  %v8979_v33 = vpop.f32.mrf.mxu1  ;;  %v10538_v27 = vrot.slane %v8834_v42, 7 }
 0x13b   : > { %7146 = vmatprep.mubr.msk.f32.mxu1 %vm1402_vm0, %v2157_v8  ;;  %v8961_v60 = vsel %vm1631_vm3, %v2780_v21, %v2782_v43  ;;  %v8964_v32 = vsel %vm1631_vm3, %v2782_v43, %v2784_v51  ;;  %v2788_v8 = vrot.slane %v2709_v3, 1  ;;  %v2790_v30 = vrot.slane %v2710_v23, 1  ;;  %10537 = vst [vmem:[#allocation7_spill] sm:$0xff] %v8979_v33 }
 0x13c   : > { %v8975_v19 = vsel %vm1631_vm3, %v2784_v51, %v2786_v1  ;;  %v2712_v4 = vmul.f32 %v10536_v53, %v8796_v36  ;;  %v1685_v21 = vrot.slane %v8789_v20, 1  ;;  %v2159_v43 = vsel %vm2118_vm2, %v2156_v6, %v10538_v27  ;;  %v1630_v53 = vpop.permute.xlu0 %1629 }
 0x13d   : > { %7115 = vmatmul.mubr.msk.f32.gmra.mxu0 %vm1402_vm0, %v8659_v44  ;;  %v2792_v39 = vrot.slane %v2711_v15, 1  ;;  %v8988_v51 = vmul.f32 %v8770_v0, %v8807_v58  ;;  %v10539_v3 = vrot.slane %v8871_v38, 7  ;;  %v10540_v36 = vmov %v10538_v27  ;;  %v9005_v58 = vld [vmem:[#allocation2 + $0xd8] sm:$0xff] }
 0x13e   : > { %7169 = vmatprep.mubr.msk.f32.mxu0 %vm1402_vm0, %v2767_v28  ;;  %7147 = vmatmul.mubr.msk.f32.gmra.mxu1 %vm1402_vm0, %v2159_v43  ;;  %v8997_v20 = vsel %vm1631_vm3, %v2786_v1, %v2788_v8  ;;  %v9000_v6 = vsel %vm1631_vm3, %v2788_v8, %v2790_v30  ;;  %v2794_v28 = vrot.slane %v2712_v4, 1  ;;  %v2162_v23 = vrot.slane %v8847_v11, 7  ;;  %v9012_v1 = vld [vmem:[#allocation2 + $0xd0] sm:$0xff]  ;;  %v9024_v4 = vpop.f32.mrf.mxu1 }
 0x13f   : > { %v2161_v50 = vsel %vm2118_vm2, %v10540_v36, %v10539_v3  ;;  %v1752_v0 = vmul.f32 %v8837_v62, %v8968_v56  ;;  %v9009_v42 = vsel %vm1631_vm3, %v2790_v30, %v2792_v39  ;;  %v2796_v13 = vrot.slane %v8988_v51, 1  ;;  %10543 = vst [vmem:[#allocation8_spill] sm:$0xff] %v9024_v4 }
 0x140   : > { %7149 = vmatprep.mubr.msk.f32.mxu1 %vm1402_vm0, %v2161_v50  ;;  %v10541_v15 = vrot.slane %v8812_v54, 1  ;;  %v10542_v8 = vrot.slane %v8695_v14, 1  ;;  %v9022_v62 = vsel %vm1631_vm3, %v2792_v39, %v2794_v28  ;;  %v1689_v43 = vrot.slane %v8893_v46, 1  ;;  %v1626_v50 = vpop.permute.xlu1 %1625 }
 0x141   : > { %7170 = vmatmul.mubr.msk.f32.vlgmr.msra.gmra.mxu0 %vm1402_vm0, %v8909_v31  ;;  %v2163_v14 = vsel %vm2118_vm2, %v10539_v3, %v2162_v23  ;;  %v9038_v31 = vsel %vm1631_vm3, %v2794_v28, %v2796_v13  ;;  %v2168_v39 = vrot.slane %v8879_v26, 7  ;;  %v1687_v54 = vrot.slane %v8916_v24, 1  ;;  %v9051_v26 = vld [vmem:[#allocation2 + $0xe0] sm:$0xff]  ;;  %v9055_v24 = vpop.f32.mrf.mxu1 }
 0x142   : > { %v1684_v11 = vsel %vm1631_vm3, %v10542_v8, %v10541_v15  ;;  %v10544_v30 = vmov %v10541_v15  ;;  %7172 = vmatprep.mubr.msk.f32.mxu0 %vm1402_vm0, %v8912_v57  ;;  %7150 = vmatmul.mubr.msk.f32.gmra.mxu1 %vm1402_vm0, %v2163_v14  ;;  %v10545_v38 = vrot.slane %v8817_v63, 7  ;;  %v2166_v15 = vrot.slane %v1752_v0, 7  ;;  %v9048_v8 = vld [vmem:[#allocation2 + $0xe8] sm:$0xff]  ;;  %10546 = vst [vmem:[#allocation9_spill] sm:$0xff] %v9055_v24 }
 0x143   : > { %v1686_v27 = vsel %vm1631_vm3, %v10544_v30, %v1685_v21  ;;  %v1754_v57 = vmul.f32 %v1684_v11, %v9012_v1  ;;  %v1693_v28 = vrot.slane %v1630_v53, 1  ;;  %v1691_v30 = vrot.slane %v1626_v50, 1 }
 0x144   : > { %v1755_v36 = vmul.f32 %v1686_v27, %v9005_v58  ;;  %v2165_v46 = vsel %vm2118_vm2, %v2162_v23, %v10545_v38  ;;  %v1690_v27 = vsel %vm1631_vm3, %v1687_v54, %v1689_v43  ;;  %v10547_v23 = vmov %v10545_v38  ;;  %v9068_v38 = vld [vmem:[#allocation2 + $0xf8] sm:$0xff] }
 0x145   : > { %7152 = vmatprep.mubr.msk.f32.mxu1 %vm1402_vm0, %v2165_v46  ;;  %7173 = vmatmul.mubr.msk.f32.gmra.mxu0 %vm1402_vm0, %v8932_v35  ;;  %v2167_v0 = vsel %vm2118_vm2, %v10547_v23, %v2166_v15  ;;  %v1688_v11 = vsel %vm1631_vm3, %v1685_v21, %v1687_v54  ;;  %v1757_v3 = vmul.f32 %v1690_v27, %v9048_v8  ;;  %v2170_v14 = vrot.slane %v1754_v57, 7  ;;  %v9072_v46 = vld [vmem:[#allocation2 + $0xf0] sm:$0xff] }
 0x146   : > { %7175 = vmatprep.mubr.msk.f32.mxu0 %vm1402_vm0, %v8935_v48  ;;  %v2172_v53 = vrot.slane %v1755_v36, 7  ;;  %7153 = vmatmul.mubr.msk.f32.gmra.mxu1 %vm1402_vm0, %v2167_v0  ;;  %v2169_v35 = vsel %vm2118_vm2, %v2166_v15, %v2168_v39  ;;  %v1756_v50 = vmul.f32 %v1688_v11, %v9051_v26  ;;  %v1694_v63 = vsel %vm1631_vm3, %v1691_v30, %v1693_v28  ;;  %v9076_v48 = vpop.f32.mrf.mxu1  ;;  %v9082_v15 = vld [vmem:[#allocation2 + $0x100] sm:$0xff] }
 0x147   : > { %7155 = vmatprep.mubr.msk.f32.mxu1 %vm1402_vm0, %v2169_v35  ;;  %10548 = vst [vmem:[#allocation10_spill] sm:$0xff] %v9076_v48  ;;  %v2171_v21 = vsel %vm2118_vm2, %v2168_v39, %v2170_v14  ;;  %v1692_v54 = vsel %vm1631_vm3, %v1689_v43, %v1691_v30  ;;  %v2176_v36 = vrot.slane %v1757_v3, 7  ;;  %v1759_v57 = vmul.f32 %v1694_v63, %v9068_v38  ;;  %v10551_v3 = vld [vmem:[#allocation35_spill] sm:$0xff] }
 0x148   : > { %v2173_v27 = vsel %vm2118_vm2, %v2170_v14, %v2172_v53  ;;  %v2174_v23 = vrot.slane %v1756_v50, 7  ;;  %v1760_v43 = vmul.f32 %v1693_v28, %v9082_v15  ;;  %v2634_v28 = vrot.slane %v10551_v3, 7 }
 0x149   : > { %7176 = vmatmul.mubr.msk.f32.gmra.mxu0 %vm1402_vm0, %v8944_v59  ;;  %v1758_v59 = vmul.f32 %v1692_v54, %v9072_v46  ;;  %v2180_v30 = vrot.slane %v1759_v57, 7  ;;  %v10554_v63 = vrot.slane %v8469_v25, 7  ;;  %v10555_v54 = vld [vmem:[#allocation42_spill] sm:$0xff]  ;;  %v2648_v51 = vrot.slane %v8747_v7, 7 }
 0x14a   : > { %7178 = vmatprep.mubr.msk.f32.mxu0 %vm1402_vm0, %v8950_v18  ;;  %7156 = vmatmul.mubr.msk.f32.gmra.mxu1 %vm1402_vm0, %v2171_v21  ;;  %v9091_v18 = vpop.f32.mrf.mxu1  ;;  %v2175_v39 = vsel %vm2118_vm2, %v2172_v53, %v2174_v23  ;;  %v2177_v0 = vsel %vm2118_vm2, %v2174_v23, %v2176_v36  ;;  %v2182_v35 = vrot.slane %v1760_v43, 7  ;;  %v10557_v43 = vld [vmem:[#allocation55_spill] sm:$0xff] }
 0x14b   : > { %7158 = vmatprep.mubr.msk.f32.mxu1 %vm1402_vm0, %v2173_v27  ;;  %10549 = vst [vmem:[#allocation11_spill] sm:$0xff] %v9091_v18  ;;  %v2178_v11 = vrot.slane %v1758_v59, 7  ;;  %v2635_v21 = vsel %vm2118_vm2, %v10554_v63, %v2634_v28  ;;  %v2640_v27 = vrot.slane %v8587_v37, 7  ;;  %v10561_v63 = vld [vmem:[#allocation72_spill] sm:$0xff] }
 0x14d   : > { %7179 = vmatmul.mubr.msk.f32.gmra.mxu0 %vm1402_vm0, %v8958_v5  ;;  %v9102_v5 = vpop.f32.mrf.mxu1  ;;  %v2179_v53 = vsel %vm2118_vm2, %v2176_v36, %v2178_v11  ;;  %v2181_v50 = vsel %vm2118_vm2, %v2178_v11, %v2180_v30  ;;  %v2638_v36 = vrot.slane %v10555_v54, 7 }
 0x14e   : > { %7181 = vmatprep.mubr.msk.f32.mxu0 %vm1402_vm0, %v8961_v60  ;;  %7159 = vmatmul.mubr.msk.f32.gmra.mxu1 %vm1402_vm0, %v2175_v39  ;;  %10550 = vst [vmem:[#allocation12_spill] sm:$0xff] %v9102_v5  ;;  %v10552_v60 = vld [vmem:[#allocation45_spill] sm:$0xff]  ;;  %v2642_v39 = vrot.slane %v10557_v43, 7 }
 0x14f   : > { %7161 = vmatprep.mubr.msk.f32.mxu1 %vm1402_vm0, %v2177_v0  ;;  %v2636_v14 = vrot.slane %v10552_v60, 7  ;;  %v2641_v37 = vsel %vm2118_vm2, %v2638_v36, %v2640_v27 }
 0x150   : > { %v2717_v0 = vmul.f32 %v2641_v37, %v8844_v49 }
 0x151   : > { %7182 = vmatmul.mubr.msk.f32.gmra.mxu0 %vm1402_vm0, %v8964_v32  ;;  %v9114_v32 = vpop.f32.mrf.mxu1  ;;  %v2637_v57 = vsel %vm2118_vm2, %v2634_v28, %v2636_v14  ;;  %v2639_v59 = vsel %vm2118_vm2, %v2636_v14, %v2638_v36  ;;  %v2596_v14 = vpop.permute.xlu1 %2595 }
 0x152   : > { %7184 = vmatprep.mubr.msk.f32.mxu0 %vm1402_vm0, %v8975_v19  ;;  %7162 = vmatmul.mubr.msk.f32.gmra.mxu1 %vm1402_vm0, %v2179_v53  ;;  %10553 = vst [vmem:[#allocation13_spill] sm:$0xff] %v9114_v32  ;;  %v2183_v19 = vsel %vm2118_vm2, %v2180_v30, %v2182_v35  ;;  %v2715_v23 = vmul.f32 %v2637_v57, %v8823_v29  ;;  %v2804_v35 = vrot.slane %v2717_v0, 1  ;;  %v10559_v53 = vld [vmem:[#allocation19_spill] sm:$0xff] }
 0x153   : > { %7164 = vmatprep.mubr.msk.f32.mxu1 %vm1402_vm0, %v2181_v50  ;;  %v9130_v25 = vpop.f32.mrf.mxu1 }
 0x154   : > { %10556 = vst [vmem:[#allocation14_spill] sm:$0xff] %v9130_v25  ;;  %v2800_v29 = vrot.slane %v2715_v23, 1 }
 0x155   : > { %7185 = vmatmul.mubr.msk.f32.gmra.mxu0 %vm1402_vm0, %v8997_v20  ;;  %v2714_v20 = vmul.f32 %v2635_v21, %v8821_v52  ;;  %v2644_v52 = vrot.slane %v8657_v2, 7  ;;  %v9148_v11 = vpop.f32.mrf.mxu1  ;;  %v2646_v2 = vrot.slane %v8650_v61, 7  ;;  %v10562_v21 = vld [vmem:[#allocation20_spill] sm:$0xff]  ;;  %v2600_v0 = vpop.permute.xlu1 %2599 }
 0x156   : > { %7187 = vmatprep.mubr.msk.f32.mxu0 %vm1402_vm0, %v9000_v6  ;;  %7165 = vmatmul.mubr.msk.f32.gmra.mxu1 %vm1402_vm0, %v2183_v19  ;;  %v2716_v6 = vmul.f32 %v2639_v59, %v8809_v16  ;;  %10558 = vst [vmem:[#allocation15_spill] sm:$0xff] %v9148_v11  ;;  %v2643_v16 = vsel %vm2118_vm2, %v2640_v27, %v2642_v39  ;;  %v3151_v11 = vld [vmem:[%s10383_s11] sm:$0x3] }
 0x157   : > { %v2798_v30 = vrot.slane %v2714_v20, 1  ;;  %v2645_v3 = vsel %vm2118_vm2, %v2642_v39, %v2644_v52  ;;  %v7066_v50 = vpop.f32.mrf.mxu1  ;;  %v2647_v7 = vsel %vm2118_vm2, %v2644_v52, %v2646_v2  ;;  %v2649_v57 = vsel %vm2118_vm2, %v2646_v2, %v2648_v51 }
 0x158   : > { %v2802_v49 = vrot.slane %v2716_v6, 1  ;;  %v2720_v27 = vmul.f32 %v2647_v7, %v8968_v56  ;;  %v2652_v20 = vrot.slane %v8865_v34, 7  ;;  %v2721_v23 = vmul.f32 %v2649_v57, %v8849_v17 }
 0x159   : > { %7188 = vmatmul.mubr.msk.f32.gmra.mxu0 %vm1402_vm0, %v9009_v42  ;;  %v2799_v42 = vsel %vm1631_vm3, %v2796_v13, %v2798_v30  ;;  %v2719_v13 = vmul.f32 %v2645_v3, %v8787_v40  ;;  %v2801_v28 = vsel %vm1631_vm3, %v2798_v30, %v2800_v29  ;;  %v2650_v40 = vrot.slane %v10561_v63, 7  ;;  %v1502_v63 = vld [vmem:[#allocation2 + $0x108] sm:$0xff] }
 0x15a   : > { %7190 = vmatprep.mubr.msk.f32.mxu0 %vm1402_vm0, %v9022_v62  ;;  %v5128_v62 = vld [vmem:[%s10386_s14] sm:$0x3]  ;;  %v2803_v61 = vsel %vm1631_vm3, %v2800_v29, %v2802_v49  ;;  %v2805_v59 = vsel %vm1631_vm3, %v2802_v49, %v2804_v35  ;;  %v2654_v52 = vrot.slane %v8852_v45, 7  ;;  %v2658_v56 = vrot.slane %v8946_v47, 7 }
 0x15b   : > { %v9159_v60 = vrot.slane %v5128_v62, %v10559_v53  ;;  %v9170_v54 = vrot.slane %v5128_v62, %v10562_v21  ;;  %v2808_v43 = vrot.slane %v2719_v13, 1  ;;  %v2651_v6 = vsel %vm2118_vm2, %v2648_v51, %v2650_v40 }
 0x15c   : > { %v2810_v34 = vrot.slane %v2720_v27, 1  ;;  %v2653_v17 = vsel %vm2118_vm2, %v2650_v40, %v2652_v20  ;;  %v2722_v30 = vmul.f32 %v2651_v6, %v9012_v1  ;;  %v2656_v29 = vrot.slane %v8970_v9, 7  ;;  %v9229_v6 = vld [vmem:[%s10378_s6 + $0x10] sm:$0xff] }
 0x15d   : > { %7191 = vmatmul.mubr.msk.f32.gmra.mxu0 %vm1402_vm0, %v9038_v31  ;;  %v2718_v31 = vmul.f32 %v2643_v16, %v8814_v41  ;;  %10560 = vst [vmem:[#allocation16_spill] sm:$0xff] %v9159_v60  ;;  %v6400_v41 = vld [vmem:[%s10378_s6 + $0x8] sm:$0xff]  ;;  %10563 = vst [vmem:[#allocation17_spill] sm:$0xff] %v9170_v54  ;;  %v5164_v36 = vmul.f32 %v7066_v50, %v9159_v60  ;;  %v2723_v62 = vmul.f32 %v2653_v17, %v9005_v58 }
 0x15e   : > { %7193 = vmatprep.mubr.msk.f32.mxu0 %vm1402_vm0, %v2799_v42  ;;  %7217 = vmatprep.subr.mxu1 %v6400_v41  ;;  %v2812_v42 = vrot.slane %v2721_v23, 1  ;;  %v2811_v45 = vsel %vm1631_vm3, %v2808_v43, %v2810_v34  ;;  %v2655_v47 = vsel %vm2118_vm2, %v2652_v20, %v2654_v52  ;;  %v2659_v2 = vsel %vm2118_vm2, %v2656_v29, %v2658_v56 }
 0x15f   : > { %v2806_v19 = vrot.slane %v2718_v31, 1  ;;  %7218 = vmatpush3.msra.mxu1 %v6400_v41  ;;  %v9179_v39 = vadd.f32 %v9170_v54, %v5164_v36  ;;  %v2662_v49 = vrot.slane %v2600_v0, 7  ;;  %v2814_v1 = vrot.slane %v2722_v30, 1  ;;  %10565 = vst [vmem:[#allocation35_spill] sm:$0xff] %v9229_v6 }
 0x160   : > { %v2657_v9 = vsel %vm2118_vm2, %v2654_v52, %v2656_v29  ;;  %v2724_v3 = vmul.f32 %v2655_v47, %v9051_v26  ;;  %v2660_v31 = vrot.slane %v2596_v14, 7  ;;  %v2816_v58 = vrot.slane %v2723_v62, 1  ;;  %7317 = vmatprep.subr.mxu1 %v9229_v6 }
 0x161   : > { %7194 = vmatmul.mubr.msk.f32.gmra.mxu0 %vm1402_vm0, %v2801_v28  ;;  %10564 = vst [vmem:[#allocation18_spill] sm:$0xff] %v9179_v39  ;;  %v2807_v37 = vsel %vm1631_vm3, %v2804_v35, %v2806_v19  ;;  %v2809_v16 = vsel %vm1631_vm3, %v2806_v19, %v2808_v43  ;;  %v2725_v51 = vmul.f32 %v2657_v9, %v9048_v8  ;;  %v3488_v43 = vld [vmem:[%s10378_s6] sm:$0xff] }
 0x162   : > { %7196 = vmatprep.mubr.msk.f32.mxu0 %vm1402_vm0, %v2803_v61  ;;  %v2813_v13 = vsel %vm1631_vm3, %v2810_v34, %v2812_v42  ;;  %v2726_v28 = vmul.f32 %v2659_v2, %v9072_v46  ;;  %v2815_v35 = vsel %vm1631_vm3, %v2812_v42, %v2814_v1  ;;  %v2663_v61 = vsel %vm2118_vm2, %v2660_v31, %v2662_v49  ;;  %v3453_v34 = vld [vmem:[#allocation3 + $0x8] sm:$0xff] }
 0x163   : > { %v2818_v50 = vrot.slane %v2724_v3, 1  ;;  %v2661_v41 = vsel %vm2118_vm2, %v2658_v56, %v2660_v31  ;;  %v2820_v26 = vrot.slane %v2725_v51, 1  ;;  %v2817_v8 = vsel %vm1631_vm3, %v2814_v1, %v2816_v58  ;;  %7267 = vmatprep.subr.mxu0 %v3488_v43 }
 0x164   : > { %v2727_v14 = vmul.f32 %v2661_v41, %v9068_v38  ;;  %v2822_v7 = vrot.slane %v2726_v28, 1  ;;  %v2728_v46 = vmul.f32 %v2663_v61, %v9082_v15  ;;  %v2729_v19 = vmul.f32 %v2662_v49, %v1502_v63  ;;  %7268 = vmatpush3.msra.mxu0 %v3488_v43  ;;  %v9236_v49 = vpop.f32.mrf.mxu1 }
 0x165   : > { %7197 = vmatmul.mubr.msk.f32.gmra.mxu0 %vm1402_vm0, %v2805_v59  ;;  %v2819_v40 = vsel %vm1631_vm3, %v2816_v58, %v2818_v50  ;;  %v2821_v57 = vsel %vm1631_vm3, %v2818_v50, %v2820_v26  ;;  %10566 = vst [vmem:[#allocation45_spill] sm:$0xff] %v9236_v49  ;;  %v9282_v18 = vrot.slane %v3151_v11, %v10559_v53 }
 0x166   : > { %7199 = vmatprep.mubr.msk.f32.mxu0 %vm1402_vm0, %v2807_v37  ;;  %v2824_v36 = vrot.slane %v2727_v14, 1  ;;  %v2826_v27 = vrot.slane %v2728_v46, 1  ;;  %v2823_v38 = vsel %vm1631_vm3, %v2820_v26, %v2822_v7  ;;  %v2828_v20 = vrot.slane %v2729_v19, 1  ;;  %v3452_v37 = vld [vmem:[#allocation3] sm:$0xff] }
 0x167   : > { %v9285_v12 = vrot.slane %v3151_v11, %v10562_v21 }
 0x168   : > { %v2825_v15 = vsel %vm1631_vm3, %v2822_v7, %v2824_v36  ;;  %v2827_v23 = vsel %vm1631_vm3, %v2824_v36, %v2826_v27  ;;  %v2829_v59 = vsel %vm1631_vm3, %v2826_v27, %v2828_v20 }
 0x169   : > { %7200 = vmatmul.mubr.msk.f32.gmra.mxu0 %vm1402_vm0, %v2809_v16 }
 0x16a   : > { %7202 = vmatprep.mubr.msk.f32.mxu0 %vm1402_vm0, %v2811_v45 }
 0x16d   : > { %7203 = vmatmul.mubr.msk.f32.gmra.mxu0 %vm1402_vm0, %v2813_v13 }
 0x16e   : > { %7205 = vmatprep.mubr.msk.f32.mxu0 %vm1402_vm0, %v2815_v35 }
 0x171   : > { %7206 = vmatmul.mubr.msk.f32.gmra.mxu0 %vm1402_vm0, %v2817_v8 }
 0x172   : > { %7208 = vmatprep.mubr.msk.f32.mxu0 %vm1402_vm0, %v2819_v40 }
 0x175   : > { %7209 = vmatmul.mubr.msk.f32.gmra.mxu0 %vm1402_vm0, %v2821_v57 }
 0x176   : > { %7211 = vmatprep.mubr.msk.f32.mxu0 %vm1402_vm0, %v2823_v38 }
 0x179   : > { %7212 = vmatmul.mubr.msk.f32.gmra.mxu0 %vm1402_vm0, %v2825_v15 }
 0x17a   : > { %7214 = vmatprep.mubr.msk.f32.mxu0 %vm1402_vm0, %v2827_v23 }
 0x17d   : > { %7215 = vmatmul.mubr.msk.f32.gmra.mxu0 %vm1402_vm0, %v2829_v59 }
 0x17e   : > { %7269 = vmatprep.mubr.msk.f32.mxu0 %vm1402_vm0, %v3452_v37 }
 0x181   : > { %7270 = vmatmul.mubr.msk.f32.vlgmr.msra.gmra.mxu0 %vm1402_vm0, %v3453_v34 }
 0x1a8   : > { %v7071_v52 = vpop.f32.mrf.mxu0 }
 0x1aa   : > { %v1926_v56 = vpop.f32.mrf.mxu0 }
 0x1ae   : > { %v7074_v17 = vpop.f32.mrf.mxu0 }
 0x1b0   : > { %v1936_v30 = vpop.f32.mrf.mxu0 }
 0x1b7   : > { %v7077_v29 = vpop.f32.mrf.mxu0 }
 0x1b9   : > { %v1946_v0 = vpop.f32.mrf.mxu0 }
 0x1bc   : > { %v7080_v42 = vpop.f32.mrf.mxu0 }
 0x1be   : > { %v1956_v62 = vpop.f32.mrf.mxu0 }
 0x1c5   : > { %v7083_v16 = vpop.f32.mrf.mxu0 }
 0x1c7   : > { %v1966_v45 = vpop.f32.mrf.mxu0 }
 0x1cb   : > { %v7086_v47 = vpop.f32.mrf.mxu0 }
 0x1cd   : > { %v9234_v2 = vpop.f32.mrf.mxu0 }
 0x1d3   : > { %v9238_v1 = vpop.f32.mrf.mxu0 }
 0x1d5   : > { %v9240_v3 = vpop.f32.mrf.mxu0 }
 0x1d8   : > { %v7121_v9 = vpop.f32.mrf.mxu1 }
 0x1d9   : > { %v2320_v48 = vadd.f32 %v7121_v9, %v7071_v52 }
 0x1da   : > { %v2314_v31 = vpop.f32.mrf.mxu1 }
 0x1db   : > { %v2315_v22 = vadd.f32 %v2314_v31, %v1926_v56 }
 0x1dd   : > { %v9242_v58 = vpop.f32.mrf.mxu0  ;;  %v7124_v51 = vpop.f32.mrf.mxu1 }
 0x1de   : > { %v2330_v54 = vadd.f32 %v7124_v51, %v7074_v17 }
 0x1df   : > { %v9244_v13 = vpop.f32.mrf.mxu0  ;;  %v2324_v28 = vpop.f32.mrf.mxu1 }
 0x1e0   : > { %v2325_v60 = vadd.f32 %v2324_v28, %v1936_v30 }
 0x1e1   : > { %v9246_v35 = vpop.f32.mrf.mxu0  ;;  %v7127_v61 = vpop.f32.mrf.mxu1 }
 0x1e2   : > { %v2340_v6 = vadd.f32 %v7127_v61, %v7077_v29 }
 0x1e3   : > { %v9248_v50 = vpop.f32.mrf.mxu0  ;;  %v2334_v41 = vpop.f32.mrf.mxu1 }
 0x1e5   : > { %v9250_v26 = vpop.f32.mrf.mxu0  ;;  %v7130_v14 = vpop.f32.mrf.mxu1 }
 0x1e7   : > { %v9252_v8 = vpop.f32.mrf.mxu0  ;;  %v2344_v7 = vpop.f32.mrf.mxu1 }
 0x1e8   : > { %v9288_v9 = vadd.f32 %v2344_v7, %v1956_v62 }
 0x1e9   : > { %v9254_v63 = vpop.f32.mrf.mxu0  ;;  %v7133_v46 = vpop.f32.mrf.mxu1 }
 0x1ea   : > { %v9290_v53 = vadd.f32 %v7133_v46, %v7083_v16 }
 0x1eb   : > { %v9256_v40 = vpop.f32.mrf.mxu0  ;;  %v2354_v36 = vpop.f32.mrf.mxu1 }
 0x1ed   : > { %v9258_v19 = vpop.f32.mrf.mxu0 }
 0x1ee   : > { %v7136_v57 = vpop.f32.mrf.mxu1 }
 0x1ef   : > { %v9260_v27 = vpop.f32.mrf.mxu0 }
 0x1f0   : > { %v2364_v38 = vpop.f32.mrf.mxu1 }
 0x1f1   : > { %v9262_v20 = vpop.f32.mrf.mxu0  ;;  %v9297_v56 = vadd.f32 %v2364_v38, %v9234_v2 }
 0x1f2   : > { %v7139_v15 = vpop.f32.mrf.mxu1 }
 0x1f3   : > { %v9264_v23 = vpop.f32.mrf.mxu0 }
 0x1f4   : > { %v2374_v59 = vpop.f32.mrf.mxu1 }
 0x1f5   : > { %v9266_v43 = vpop.f32.mrf.mxu0 }
 0x1f6   : > { %10567 = vst [vmem:[#allocation42_spill] sm:$0xff] %v9266_v43  ;;  %v7142_v37 = vpop.f32.mrf.mxu1  ;;  %v9292_v43 = vadd.f32 %v2354_v36, %v1966_v45 }
 0x1f7   : > { %v9268_v34 = vpop.f32.mrf.mxu0 }
 0x1f8   : > { %10568 = vst [vmem:[#allocation55_spill] sm:$0xff] %v9268_v34  ;;  %v2384_v44 = vpop.f32.mrf.mxu1  ;;  %v2350_v34 = vadd.f32 %v7130_v14, %v7080_v42 }
 0x1f9   : > { %v9270_v55 = vpop.f32.mrf.mxu0 }
 0x1fa   : > { %10569 = vst [vmem:[#allocation72_spill] sm:$0xff] %v9270_v55  ;;  %v7145_v10 = vpop.f32.mrf.mxu1  ;;  %v2335_v55 = vadd.f32 %v2334_v41, %v1946_v0  ;;  %v9311_v0 = vadd.f32 %v2384_v44, %v9244_v13 }
 0x1fb   : > { %v9272_v39 = vpop.f32.mrf.mxu0  ;;  %v9314_v16 = vadd.f32 %v7145_v10, %v9246_v35 }
 0x1fc   : > { %10570 = vst [vmem:[#allocation76_spill] sm:$0xff] %v9272_v39  ;;  %v2394_v49 = vpop.f32.mrf.mxu1 }
 0x1fd   : > { %v9274_v25 = vpop.f32.mrf.mxu0 }
 0x1fe   : > { %10571 = vst [vmem:[#allocation77_spill] sm:$0xff] %v9274_v25  ;;  %v7148_v5 = vpop.f32.mrf.mxu1 }
 0x1ff   : > { %v9279_v32 = vpop.f32.mrf.mxu0  ;;  %v9322_v2 = vadd.f32 %v7148_v5, %v9250_v26 }
 0x200   : > { %10572 = vst [vmem:[#allocation78_spill] sm:$0xff] %v9279_v32  ;;  %v2404_v4 = vpop.f32.mrf.mxu1 }
 0x201   : > { %v7171_v24 = vpop.f32.mrf.mxu0 }
 0x202   : > { %v3120_v33 = vadd.f32 %v7171_v24, %v2320_v48  ;;  %v7151_v25 = vpop.f32.mrf.mxu1  ;;  %v9294_v24 = vadd.f32 %v7136_v57, %v7086_v47  ;;  %v9319_v47 = vadd.f32 %v2394_v49, %v9248_v50 }
 0x203   : > { %v2960_v39 = vpop.f32.mrf.mxu0  ;;  %v9328_v10 = vadd.f32 %v7151_v25, %v9254_v63 }
 0x204   : > { %v3157_v32 = vmul.f32 %v9282_v18, %v3120_v33  ;;  %v3119_v52 = vadd.f32 %v2960_v39, %v2315_v22  ;;  %v2414_v48 = vpop.f32.mrf.mxu1  ;;  %v9302_v22 = vadd.f32 %v7139_v15, %v9238_v1  ;;  %v9305_v33 = vadd.f32 %v2374_v59, %v9240_v3 }
 0x205   : > { %v7174_v11 = vpop.f32.mrf.mxu0  ;;  %v9308_v39 = vadd.f32 %v7142_v37, %v9242_v58  ;;  %v9325_v1 = vadd.f32 %v2404_v4, %v9252_v8  ;;  %v9332_v28 = vadd.f32 %v2414_v48, %v9256_v40 }
 0x206   : > { %v3193_v17 = vadd.f32 %v9285_v12, %v3157_v32  ;;  %v3156_v30 = vmul.f32 %v9282_v18, %v3119_v52  ;;  %v3122_v29 = vadd.f32 %v7174_v11, %v2330_v54  ;;  %v7154_v42 = vpop.f32.mrf.mxu1  ;;  %v10573_v52 = vld [vmem:[#allocation42_spill] sm:$0xff] }
 0x207   : > { %v2970_v62 = vpop.f32.mrf.mxu0  ;;  %v9335_v49 = vadd.f32 %v7154_v42, %v9258_v19 }
 0x208   : > { %v3225_v32 = vadd.f32 3.0, %v3193_v17  ;;  %v3192_v54 = vadd.f32 %v9285_v12, %v3156_v30  ;;  %v3159_v45 = vmul.f32 %v9282_v18, %v3122_v29  ;;  %v2424_v44 = vpop.f32.mrf.mxu1  ;;  %v3121_v3 = vadd.f32 %v2970_v62, %v2325_v60 }
 0x209   : > { %v7177_v31 = vpop.f32.mrf.mxu0  ;;  %v9339_v60 = vadd.f32 %v2424_v44, %v9260_v27 }
 0x20a   : > { %v3257_v58 = vmax.f32 %v3225_v32, 0.0  ;;  %v3224_v51 = vadd.f32 3.0, %v3192_v54  ;;  %v3195_v13 = vadd.f32 %v9285_v12, %v3159_v45  ;;  %v7157_v5 = vpop.f32.mrf.mxu1  ;;  %v3158_v4 = vmul.f32 %v9282_v18, %v3121_v3  ;;  %v10574_v32 = vld [vmem:[#allocation55_spill] sm:$0xff] }
 0x20b   : > { %v3124_v35 = vadd.f32 %v7177_v31, %v2340_v6  ;;  %v2980_v61 = vpop.f32.mrf.mxu0  ;;  %v9342_v26 = vadd.f32 %v7157_v5, %v9262_v20 }
 0x20c   : > { %v3289_v25 = vmin.f32 %v3257_v58, 6.0  ;;  %v3256_v50 = vmax.f32 %v3224_v51, 0.0  ;;  %v3227_v41 = vadd.f32 3.0, %v3195_v13  ;;  %v2434_v14 = vpop.f32.mrf.mxu1  ;;  %v3194_v8 = vadd.f32 %v9285_v12, %v3158_v4 }
 0x20d   : > { %v3161_v7 = vmul.f32 %v9282_v18, %v3124_v35  ;;  %v3123_v63 = vadd.f32 %v2980_v61, %v2335_v55  ;;  %v7180_v46 = vpop.f32.mrf.mxu0  ;;  %v9347_v40 = vadd.f32 %v2434_v14, %v9264_v23  ;;  %v10575_v61 = vld [vmem:[#allocation72_spill] sm:$0xff] }
 0x20e   : > { %v3321_v6 = vmul.f32 %v3289_v25, %v3193_v17  ;;  %v3288_v36 = vmin.f32 %v3256_v50, 6.0  ;;  %v3259_v19 = vmax.f32 %v3227_v41, 0.0  ;;  %v7160_v57 = vpop.f32.mrf.mxu1  ;;  %v3226_v27 = vadd.f32 3.0, %v3194_v8 }
 0x20f   : > { %v3197_v38 = vadd.f32 %v9285_v12, %v3161_v7  ;;  %v3160_v20 = vmul.f32 %v9282_v18, %v3123_v63  ;;  %v3126_v15 = vadd.f32 %v7180_v46, %v2350_v34  ;;  %v2990_v59 = vpop.f32.mrf.mxu0  ;;  %v9352_v48 = vadd.f32 %v7160_v57, %v10573_v52  ;;  %v10576_v46 = vld [vmem:[#allocation76_spill] sm:$0xff] }
 0x210   : > { %v3353_v37 = vmul.f32 0.16666667, %v3321_v6  ;;  %v3320_v55 = vmul.f32 %v3288_v36, %v3192_v54  ;;  %v3291_v11 = vmin.f32 %v3259_v19, 6.0  ;;  %v2444_v30 = vpop.f32.mrf.mxu1  ;;  %v3258_v23 = vmax.f32 %v3226_v27, 0.0 }
 0x211   : > { %v3229_v29 = vadd.f32 3.0, %v3197_v38  ;;  %v3196_v17 = vadd.f32 %v9285_v12, %v3160_v20  ;;  %v3163_v42 = vmul.f32 %v9282_v18, %v3126_v15  ;;  %v7183_v62 = vpop.f32.mrf.mxu0  ;;  %v9358_v45 = vadd.f32 %v2444_v30, %v10574_v32 }
 0x212   : > { %3421 = vst.msk [vmem:[#allocation3 + $0x18] sm:$0xff] %vm1402_vm0, %v3353_v37  ;;  %v3323_v34 = vmul.f32 %v3291_v11, %v3195_v13  ;;  %v3125_v44 = vadd.f32 %v2990_v59, %v9288_v9  ;;  %v3128_v3 = vadd.f32 %v7183_v62, %v9290_v53  ;;  %v7163_v54 = vpop.f32.mrf.mxu1  ;;  %v3290_v31 = vmin.f32 %v3258_v23, 6.0  ;;  %v10577_v11 = vld [vmem:[#allocation77_spill] sm:$0xff] }
 0x213   : > { %v3261_v58 = vmax.f32 %v3229_v29, 0.0  ;;  %v3228_v51 = vadd.f32 3.0, %v3196_v17  ;;  %v3199_v5 = vadd.f32 %v9285_v12, %v3163_v42  ;;  %v3000_v4 = vpop.f32.mrf.mxu0  ;;  %v9364_v25 = vadd.f32 %v7163_v54, %v10575_v61 }
 0x214   : > { %v3355_v35 = vmul.f32 0.16666667, %v3323_v34  ;;  %v3162_v50 = vmul.f32 %v9282_v18, %v3125_v44  ;;  %v3165_v41 = vmul.f32 %v9282_v18, %v3128_v3  ;;  %v3322_v13 = vmul.f32 %v3290_v31, %v3194_v8  ;;  %v2454_v14 = vpop.f32.mrf.mxu1  ;;  %v10578_v3 = vld [vmem:[#allocation78_spill] sm:$0xff] }
 0x215   : > { %v3293_v9 = vmin.f32 %v3261_v58, 6.0  ;;  %v3260_v7 = vmax.f32 %v3228_v51, 0.0  ;;  %v3231_v53 = vadd.f32 3.0, %v3199_v5  ;;  %v7186_v63 = vpop.f32.mrf.mxu0  ;;  %v9370_v6 = vadd.f32 %v2454_v14, %v10576_v46 }
 0x216   : > { %3423 = vst.msk [vmem:[#allocation3 + $0x28] sm:$0xff] %vm1402_vm0, %v3355_v35  ;;  %v3198_v36 = vadd.f32 %v9285_v12, %v3162_v50  ;;  %v3201_v19 = vadd.f32 %v9285_v12, %v3165_v41  ;;  %v3127_v57 = vadd.f32 %v3000_v4, %v9292_v43  ;;  %v7166_v20 = vpop.f32.mrf.mxu1  ;;  %v3352_v59 = vmul.f32 0.16666667, %v3320_v55  ;;  %v9385_v55 = vld [vmem:[%s10381_s9] sm:$0xff]  ;;  %v10579_v4 = vld [vmem:[#allocation35_spill] sm:$0xff] }
 0x217   : > { %v3325_v27 = vmul.f32 %v3293_v9, %v3197_v38  ;;  %v3292_v15 = vmin.f32 %v3260_v7, 6.0  ;;  %v3263_v8 = vmax.f32 %v3231_v53, 0.0  ;;  %v3010_v52 = vpop.f32.mrf.mxu0  ;;  %v9376_v30 = vadd.f32 %v7166_v20, %v10577_v11 }
 0x218   : > { %v3230_v23 = vadd.f32 3.0, %v3198_v36  ;;  %v3233_v29 = vadd.f32 3.0, %v3201_v19  ;;  %v3164_v42 = vmul.f32 %v9282_v18, %v3127_v57  ;;  %v2464_v34 = vpop.f32.mrf.mxu1  ;;  %3420 = vst.msk [vmem:[#allocation3 + $0x10] sm:$0xff] %vm1402_vm0, %v3352_v59  ;;  %7219 = vmatprep.mubr.msk.f32.mxu1 %vm1402_vm0, %v3352_v59  ;;  %v3130_v43 = vadd.f32 %v7186_v63, %v9294_v24 }
 0x219   : > { %v3357_v62 = vmul.f32 0.16666667, %v3325_v27  ;;  %v3324_v32 = vmul.f32 %v3292_v15, %v3196_v17  ;;  %v3295_v44 = vmin.f32 %v3263_v8, 6.0  ;;  %v7189_v38 = vpop.f32.mrf.mxu0  ;;  %v9388_v54 = vadd.f32 %v2464_v34, %v10578_v3  ;;  %7220 = vmatmul.mubr.msk.f32.vlgmr.msra.gmra.mxu1 %vm1402_vm0, %v3353_v37 }
 0x21a   : > { %v3262_v31 = vmax.f32 %v3230_v23, 0.0  ;;  %v3265_v58 = vmax.f32 %v3233_v29, 0.0  ;;  %v3200_v17 = vadd.f32 %v9285_v12, %v3164_v42  ;;  %v3167_v24 = vmul.f32 %v9282_v18, %v3130_v43  ;;  %7318 = vmatpush3.msra.mxu1 %v10579_v4 }
 0x21b   : > { %3425 = vst.msk [vmem:[#allocation3 + $0x38] sm:$0xff] %vm1402_vm0, %v3357_v62  ;;  %v3327_v51 = vmul.f32 %v3295_v44, %v3199_v5  ;;  %v3129_v61 = vadd.f32 %v3010_v52, %v9297_v56  ;;  %v3354_v50 = vmul.f32 0.16666667, %v3322_v13  ;;  %v3020_v41 = vpop.f32.mrf.mxu0  ;;  %v3132_v53 = vadd.f32 %v7189_v38, %v9302_v22  ;;  %7417 = vmatprep.subr.mxu1 %v9385_v55 }
 0x21c   : > { %v3294_v14 = vmin.f32 %v3262_v31, 6.0  ;;  %v3297_v9 = vmin.f32 %v3265_v58, 6.0  ;;  %v3232_v7 = vadd.f32 3.0, %v3200_v17  ;;  %v3203_v37 = vadd.f32 %v9285_v12, %v3167_v24 }
 0x21d   : > { %v3359_v63 = vmul.f32 0.16666667, %v3327_v51  ;;  %v3166_v5 = vmul.f32 %v9282_v18, %v3129_v61  ;;  %3422 = vst.msk [vmem:[#allocation3 + $0x20] sm:$0xff] %vm1402_vm0, %v3354_v50  ;;  %7222 = vmatprep.mubr.msk.f32.mxu1 %vm1402_vm0, %v3354_v50  ;;  %v3131_v56 = vadd.f32 %v3020_v41, %v9305_v33  ;;  %v7192_v13 = vpop.f32.mrf.mxu0  ;;  %v3169_v20 = vmul.f32 %v9282_v18, %v3132_v53  ;;  %v9433_v53 = vld [vmem:[#allocation3 + $0x28] sm:$0xff] }
 0x21e   : > { %v3326_v46 = vmul.f32 %v3294_v14, %v3198_v36  ;;  %v3329_v57 = vmul.f32 %v3297_v9, %v3201_v19  ;;  %v3264_v27 = vmax.f32 %v3232_v7, 0.0  ;;  %7223 = vmatmul.mubr.msk.f32.gmra.mxu1 %vm1402_vm0, %v3355_v35  ;;  %v3235_v22 = vadd.f32 3.0, %v3203_v37 }
 0x21f   : > { %3427 = vst.msk [vmem:[#allocation3 + $0x48] sm:$0xff] %vm1402_vm0, %v3359_v63  ;;  %v3202_v15 = vadd.f32 %v9285_v12, %v3166_v5  ;;  %v3168_v8 = vmul.f32 %v9282_v18, %v3131_v56  ;;  %v3356_v59 = vmul.f32 0.16666667, %v3324_v32  ;;  %v3030_v52 = vpop.f32.mrf.mxu0  ;;  %v3205_v36 = vadd.f32 %v9285_v12, %v3169_v20  ;;  %v3454_v19 = vld [vmem:[#allocation3 + $0x10] sm:$0xff]  ;;  %v3455_v32 = vld [vmem:[#allocation3 + $0x18] sm:$0xff] }
 0x220   : > { %v9408_v11 = vmul.f32 0.16666667, %v3329_v57  ;;  %v3296_v33 = vmin.f32 %v3264_v27, 6.0  ;;  %v3134_v23 = vadd.f32 %v7192_v13, %v9308_v39  ;;  %v3267_v29 = vmax.f32 %v3235_v22, 0.0  ;;  %7272 = vmatprep.mubr.msk.f32.mxu0 %vm1402_vm0, %v3454_v19 }
 0x221   : > { %v3234_v42 = vadd.f32 3.0, %v3202_v15  ;;  %v3204_v35 = vadd.f32 %v9285_v12, %v3168_v8  ;;  %3424 = vst.msk [vmem:[#allocation3 + $0x30] sm:$0xff] %vm1402_vm0, %v3356_v59  ;;  %7225 = vmatprep.mubr.msk.f32.mxu1 %vm1402_vm0, %v3356_v59  ;;  %v3133_v34 = vadd.f32 %v3030_v52, %v9311_v0  ;;  %v7195_v44 = vpop.f32.mrf.mxu0  ;;  %v3237_v38 = vadd.f32 3.0, %v3205_v36  ;;  %7273 = vmatmul.mubr.msk.f32.gmra.mxu0 %vm1402_vm0, %v3455_v32 }
 0x222   : > { %3429 = vst.msk [vmem:[#allocation3 + $0x58] sm:$0xff] %vm1402_vm0, %v9408_v11  ;;  %v3328_v43 = vmul.f32 %v3296_v33, %v3200_v17  ;;  %v3171_v39 = vmul.f32 %v9282_v18, %v3134_v23  ;;  %7226 = vmatmul.mubr.msk.f32.gmra.mxu1 %vm1402_vm0, %v3357_v62  ;;  %v3358_v3 = vmul.f32 0.16666667, %v3326_v46  ;;  %v3299_v31 = vmin.f32 %v3267_v29, 6.0  ;;  %v9448_v29 = vld [vmem:[#allocation3 + $0x38] sm:$0xff] }
 0x223   : > { %v3266_v58 = vmax.f32 %v3234_v42, 0.0  ;;  %v3236_v51 = vadd.f32 3.0, %v3204_v35  ;;  %v3170_v24 = vmul.f32 %v9282_v18, %v3133_v34  ;;  %v3040_v4 = vpop.f32.mrf.mxu0  ;;  %v3269_v0 = vmax.f32 %v3237_v38, 0.0 }
 0x224   : > { %v3207_v61 = vadd.f32 %v9285_v12, %v3171_v39  ;;  %3426 = vst.msk [vmem:[#allocation3 + $0x40] sm:$0xff] %vm1402_vm0, %v3358_v3  ;;  %7228 = vmatprep.mubr.msk.f32.mxu1 %vm1402_vm0, %v3358_v3  ;;  %v9426_v17 = vld [vmem:[#allocation3 + $0x20] sm:$0xff]  ;;  %v3136_v62 = vadd.f32 %v7195_v44, %v9314_v16  ;;  %v3135_v50 = vadd.f32 %v3040_v4, %v9319_v47  ;;  %v3360_v23 = vmul.f32 0.16666667, %v3328_v43 }
 0x225   : > { %v3331_v41 = vmul.f32 %v3299_v31, %v3203_v37  ;;  %v3298_v14 = vmin.f32 %v3266_v58, 6.0  ;;  %v3268_v9 = vmax.f32 %v3236_v51, 0.0  ;;  %v3206_v7 = vadd.f32 %v9285_v12, %v3170_v24  ;;  %7275 = vmatprep.mubr.msk.f32.mxu0 %vm1402_vm0, %v9426_v17  ;;  %v7198_v5 = vpop.f32.mrf.mxu0 }
 0x226   : > { %v3301_v56 = vmin.f32 %v3269_v0, 6.0  ;;  %v3239_v13 = vadd.f32 3.0, %v3207_v61  ;;  %v3173_v46 = vmul.f32 %v9282_v18, %v3136_v62  ;;  %7229 = vmatmul.mubr.msk.f32.gmra.mxu1 %vm1402_vm0, %v3359_v63  ;;  %7276 = vmatmul.mubr.msk.f32.gmra.mxu0 %vm1402_vm0, %v9433_v53  ;;  %v3172_v16 = vmul.f32 %v9282_v18, %v3135_v50  ;;  %3428 = vst.msk [vmem:[#allocation3 + $0x50] sm:$0xff] %vm1402_vm0, %v3360_v23 }
 0x227   : > { %v3363_v47 = vmul.f32 0.16666667, %v3331_v41  ;;  %v3330_v37 = vmul.f32 %v3298_v14, %v3202_v15  ;;  %v3300_v57 = vmin.f32 %v3268_v9, 6.0  ;;  %v3238_v27 = vadd.f32 3.0, %v3206_v7  ;;  %v3050_v20 = vpop.f32.mrf.mxu0  ;;  %7231 = vmatprep.mubr.msk.f32.mxu1 %vm1402_vm0, %v3360_v23 }
 0x228   : > { %v3333_v22 = vmul.f32 %v3301_v56, %v3205_v36  ;;  %v3271_v8 = vmax.f32 %v3239_v13, 0.0  ;;  %v3209_v59 = vadd.f32 %v9285_v12, %v3173_v46  ;;  %v3208_v52 = vadd.f32 %v9285_v12, %v3172_v16  ;;  %v9442_v33 = vld [vmem:[#allocation3 + $0x30] sm:$0xff] }
 0x229   : > { %3431 = vst.msk [vmem:[#allocation3 + $0x68] sm:$0xff] %vm1402_vm0, %v3363_v47  ;;  %v3332_v63 = vmul.f32 %v3300_v57, %v3204_v35  ;;  %v3270_v19 = vmax.f32 %v3238_v27, 0.0  ;;  %7278 = vmatprep.mubr.msk.f32.mxu0 %vm1402_vm0, %v9442_v33  ;;  %v3138_v15 = vadd.f32 %v7198_v5, %v9322_v2  ;;  %v7201_v36 = vpop.f32.mrf.mxu0  ;;  %v3137_v2 = vadd.f32 %v3050_v20, %v9325_v1 }
 0x22a   : > { %v9450_v42 = vmul.f32 0.16666667, %v3333_v22  ;;  %v3303_v32 = vmin.f32 %v3271_v8, 6.0  ;;  %v3241_v34 = vadd.f32 3.0, %v3209_v59  ;;  %v3240_v44 = vadd.f32 3.0, %v3208_v52  ;;  %7279 = vmatmul.mubr.msk.f32.gmra.mxu0 %vm1402_vm0, %v9448_v29  ;;  %7232 = vmatmul.mubr.msk.f32.gmra.mxu1 %vm1402_vm0, %v9408_v11 }
 0x22b   : > { %v3302_v38 = vmin.f32 %v3270_v19, 6.0  ;;  %v3175_v35 = vmul.f32 %v9282_v18, %v3138_v15  ;;  %v3362_v43 = vmul.f32 0.16666667, %v3330_v37  ;;  %v9458_v39 = vld [vmem:[#allocation3 + $0x40] sm:$0xff]  ;;  %v3060_v3 = vpop.f32.mrf.mxu0  ;;  %v3140_v24 = vadd.f32 %v7201_v36, %v9328_v10  ;;  %v9497_v36 = vld [vmem:[#allocation3 + $0x58] sm:$0xff] }
 0x22c   : > { %3433 = vst.msk [vmem:[#allocation3 + $0x78] sm:$0xff] %vm1402_vm0, %v9450_v42  ;;  %v3335_v31 = vmul.f32 %v3303_v32, %v3207_v61  ;;  %v3273_v58 = vmax.f32 %v3241_v34, 0.0  ;;  %v3272_v51 = vmax.f32 %v3240_v44, 0.0  ;;  %7281 = vmatprep.mubr.msk.f32.mxu0 %vm1402_vm0, %v9458_v39  ;;  %v3174_v0 = vmul.f32 %v9282_v18, %v3137_v2  ;;  %v9471_v61 = vld [vmem:[#allocation3 + $0x48] sm:$0xff] }
 0x22d   : > { %v3334_v4 = vmul.f32 %v3302_v38, %v3206_v7  ;;  %v3211_v1 = vadd.f32 %v9285_v12, %v3175_v35  ;;  %3430 = vst.msk [vmem:[#allocation3 + $0x60] sm:$0xff] %vm1402_vm0, %v3362_v43  ;;  %7234 = vmatprep.mubr.msk.f32.mxu1 %vm1402_vm0, %v3362_v43  ;;  %v3139_v62 = vadd.f32 %v3060_v3, %v9332_v28  ;;  %v7204_v50 = vpop.f32.mrf.mxu0  ;;  %v3364_v56 = vmul.f32 0.16666667, %v3332_v63  ;;  %v9492_v19 = vld [vmem:[#allocation3 + $0x50] sm:$0xff] }
 0x22e   : > { %v9474_v11 = vmul.f32 0.16666667, %v3335_v31  ;;  %v3305_v41 = vmin.f32 %v3273_v58, 6.0  ;;  %v3304_v14 = vmin.f32 %v3272_v51, 6.0  ;;  %v3177_v10 = vmul.f32 %v9282_v18, %v3140_v24  ;;  %7282 = vmatmul.mubr.msk.f32.gmra.mxu0 %vm1402_vm0, %v9471_v61  ;;  %7235 = vmatmul.mubr.msk.f32.gmra.mxu1 %vm1402_vm0, %v3363_v47 }
 0x22f   : > { %v3243_v9 = vadd.f32 3.0, %v3211_v1  ;;  %v3210_v7 = vadd.f32 %v9285_v12, %v3174_v0  ;;  %v3176_v5 = vmul.f32 %v9282_v18, %v3139_v62  ;;  %v3070_v13 = vpop.f32.mrf.mxu0  ;;  %v3142_v37 = vadd.f32 %v7204_v50, %v9335_v49  ;;  %3432 = vst.msk [vmem:[#allocation3 + $0x70] sm:$0xff] %vm1402_vm0, %v3364_v56  ;;  %7237 = vmatprep.mubr.msk.f32.mxu1 %vm1402_vm0, %v3364_v56 }
 0x230   : > { %3435 = vst.msk [vmem:[#allocation3 + $0x88] sm:$0xff] %vm1402_vm0, %v9474_v11  ;;  %v3337_v28 = vmul.f32 %v3305_v41, %v3209_v59  ;;  %v3336_v46 = vmul.f32 %v3304_v14, %v3208_v52  ;;  %v3213_v16 = vadd.f32 %v9285_v12, %v3177_v10  ;;  %v3141_v22 = vadd.f32 %v3070_v13, %v9339_v60  ;;  %v9520_v41 = vld [vmem:[#allocation3 + $0x68] sm:$0xff] }
 0x231   : > { %v3275_v57 = vmax.f32 %v3243_v9, 0.0  ;;  %v3242_v27 = vadd.f32 3.0, %v3210_v7  ;;  %v3212_v20 = vadd.f32 %v9285_v12, %v3176_v5  ;;  %v7207_v8 = vpop.f32.mrf.mxu0  ;;  %v3179_v47 = vmul.f32 %v9282_v18, %v3142_v37  ;;  %7284 = vmatprep.mubr.msk.f32.mxu0 %vm1402_vm0, %v9492_v19 }
 0x232   : > { %v9490_v63 = vmul.f32 0.16666667, %v3337_v28  ;;  %v3368_v59 = vmul.f32 0.16666667, %v3336_v46  ;;  %v3245_v52 = vadd.f32 3.0, %v3213_v16  ;;  %v3178_v32 = vmul.f32 %v9282_v18, %v3141_v22  ;;  %7238 = vmatmul.mubr.msk.f32.gmra.mxu1 %vm1402_vm0, %v9450_v42  ;;  %7285 = vmatmul.mubr.msk.f32.gmra.mxu0 %vm1402_vm0, %v9497_v36 }
 0x233   : > { %v3307_v49 = vmin.f32 %v3275_v57, 6.0  ;;  %v3274_v23 = vmax.f32 %v3242_v27, 0.0  ;;  %v3244_v15 = vadd.f32 3.0, %v3212_v20  ;;  %v3080_v60 = vpop.f32.mrf.mxu0  ;;  %v3215_v44 = vadd.f32 %v9285_v12, %v3179_v47 }
 0x234   : > { %3437 = vst.msk [vmem:[#allocation3 + $0x98] sm:$0xff] %vm1402_vm0, %v9490_v63  ;;  %3436 = vst.msk [vmem:[#allocation3 + $0x90] sm:$0xff] %vm1402_vm0, %v3368_v59  ;;  %v3277_v34 = vmax.f32 %v3245_v52, 0.0  ;;  %v3366_v38 = vmul.f32 0.16666667, %v3334_v4  ;;  %v9508_v35 = vld [vmem:[#allocation3 + $0x60] sm:$0xff]  ;;  %v3144_v2 = vadd.f32 %v7207_v8, %v9342_v26  ;;  %v3214_v58 = vadd.f32 %v9285_v12, %v3178_v32 }
 0x235   : > { %v3339_v43 = vmul.f32 %v3307_v49, %v3211_v1  ;;  %v3306_v3 = vmin.f32 %v3274_v23, 6.0  ;;  %v3276_v31 = vmax.f32 %v3244_v15, 0.0  ;;  %7287 = vmatprep.mubr.msk.f32.mxu0 %vm1402_vm0, %v9508_v35  ;;  %v7210_v51 = vpop.f32.mrf.mxu0  ;;  %v3247_v0 = vadd.f32 3.0, %v3215_v44  ;;  %v9541_v52 = vld [vmem:[#allocation3 + $0x78] sm:$0xff] }
 0x236   : > { %v3309_v24 = vmin.f32 %v3277_v34, 6.0  ;;  %3434 = vst.msk [vmem:[#allocation3 + $0x80] sm:$0xff] %vm1402_vm0, %v3366_v38  ;;  %7240 = vmatprep.mubr.msk.f32.mxu1 %vm1402_vm0, %v3366_v38  ;;  %v3181_v42 = vmul.f32 %v9282_v18, %v3144_v2  ;;  %v3143_v4 = vadd.f32 %v3080_v60, %v9347_v40  ;;  %v3246_v50 = vadd.f32 3.0, %v3214_v58  ;;  %7288 = vmatmul.mubr.msk.f32.gmra.mxu0 %vm1402_vm0, %v9520_v41  ;;  %v9528_v56 = vld [vmem:[#allocation3 + $0x70] sm:$0xff] }
 0x237   : > { %v9518_v26 = vmul.f32 0.16666667, %v3339_v43  ;;  %v3338_v1 = vmul.f32 %v3306_v3, %v3210_v7  ;;  %v3308_v62 = vmin.f32 %v3276_v31, 6.0  ;;  %v3090_v14 = vpop.f32.mrf.mxu0  ;;  %v3279_v9 = vmax.f32 %v3247_v0, 0.0  ;;  %7241 = vmatmul.mubr.msk.f32.gmra.mxu1 %vm1402_vm0, %v9474_v11  ;;  %7290 = vmatprep.mubr.msk.f32.mxu0 %vm1402_vm0, %v9528_v56 }
 0x238   : > { %v3341_v10 = vmul.f32 %v3309_v24, %v3213_v16  ;;  %v3217_v5 = vadd.f32 %v9285_v12, %v3181_v42  ;;  %v3180_v40 = vmul.f32 %v9282_v18, %v3143_v4  ;;  %v3278_v28 = vmax.f32 %v3246_v50, 0.0  ;;  %7243 = vmatprep.mubr.msk.f32.mxu1 %vm1402_vm0, %v3368_v59  ;;  %v9564_v24 = vld [vmem:[#allocation3 + $0x88] sm:$0xff] }
 0x239   : > { %3439 = vst.msk [vmem:[#allocation3 + $0xa8] sm:$0xff] %vm1402_vm0, %v9518_v26  ;;  %v3370_v7 = vmul.f32 0.16666667, %v3338_v1  ;;  %v3340_v13 = vmul.f32 %v3308_v62, %v3212_v20  ;;  %v3146_v11 = vadd.f32 %v7210_v51, %v9352_v48  ;;  %v7213_v46 = vpop.f32.mrf.mxu0  ;;  %v3311_v37 = vmin.f32 %v3279_v9, 6.0 }
 0x23a   : > { %v9536_v16 = vmul.f32 0.16666667, %v3341_v10  ;;  %v3249_v57 = vadd.f32 3.0, %v3217_v5  ;;  %v3216_v27 = vadd.f32 %v9285_v12, %v3180_v40  ;;  %v3310_v8 = vmin.f32 %v3278_v28, 6.0  ;;  %7291 = vmatmul.mubr.msk.f32.gmra.mxu0 %vm1402_vm0, %v9541_v52 }
 0x23b   : > { %3438 = vst.msk [vmem:[#allocation3 + $0xa0] sm:$0xff] %vm1402_vm0, %v3370_v7  ;;  %v3372_v22 = vmul.f32 0.16666667, %v3340_v13  ;;  %v3183_v20 = vmul.f32 %v9282_v18, %v3146_v11  ;;  %v3145_v59 = vadd.f32 %v3090_v14, %v9358_v45  ;;  %v3100_v47 = vpop.f32.mrf.mxu0  ;;  %v3343_v48 = vmul.f32 %v3311_v37, %v3215_v44  ;;  %7244 = vmatmul.mubr.msk.f32.gmra.mxu1 %vm1402_vm0, %v9490_v63  ;;  %v9561_v3 = vld [vmem:[#allocation3 + $0x90] sm:$0xff] }
 0x23c   : > { %3441 = vst.msk [vmem:[#allocation3 + $0xb8] sm:$0xff] %vm1402_vm0, %v9536_v16  ;;  %v3281_v49 = vmax.f32 %v3249_v57, 0.0  ;;  %v3248_v23 = vadd.f32 3.0, %v3216_v27  ;;  %v3148_v15 = vadd.f32 %v7213_v46, %v9364_v25  ;;  %v3342_v32 = vmul.f32 %v3310_v8, %v3214_v58  ;;  %7246 = vmatprep.mubr.msk.f32.mxu1 %vm1402_vm0, %v3370_v7  ;;  %v9583_v46 = vld [vmem:[#allocation3 + $0x98] sm:$0xff] }
 0x23d   : > { %3440 = vst.msk [vmem:[#allocation3 + $0xb0] sm:$0xff] %vm1402_vm0, %v3372_v22  ;;  %v3219_v45 = vadd.f32 %v9285_v12, %v3183_v20  ;;  %v3182_v60 = vmul.f32 %v9282_v18, %v3145_v59  ;;  %v9555_v34 = vld [vmem:[#allocation3 + $0x80] sm:$0xff]  ;;  %v3147_v44 = vadd.f32 %v3100_v47, %v9370_v6  ;;  %v7216_v38 = vpop.f32.mrf.mxu0  ;;  %v3375_v63 = vmul.f32 0.16666667, %v3343_v48 }
 0x23e   : > { %v3313_v2 = vmin.f32 %v3281_v49, 6.0  ;;  %v3280_v43 = vmax.f32 %v3248_v23, 0.0  ;;  %7293 = vmatprep.mubr.msk.f32.mxu0 %vm1402_vm0, %v9555_v34  ;;  %v3185_v25 = vmul.f32 %v9282_v18, %v3148_v15  ;;  %v3374_v31 = vmul.f32 0.16666667, %v3342_v32 }
 0x23f   : > { %v3251_v58 = vadd.f32 3.0, %v3219_v45  ;;  %v3218_v51 = vadd.f32 %v9285_v12, %v3182_v60  ;;  %v3184_v0 = vmul.f32 %v9282_v18, %v3147_v44  ;;  %v3110_v6 = vpop.f32.mrf.mxu0  ;;  %3443 = vst.msk [vmem:[#allocation3 + $0xc8] sm:$0xff] %vm1402_vm0, %v3375_v63  ;;  %7247 = vmatmul.mubr.msk.f32.gmra.mxu1 %vm1402_vm0, %v9518_v26  ;;  %7294 = vmatmul.mubr.msk.f32.gmra.mxu0 %vm1402_vm0, %v9564_v24 }
 0x240   : > { %v3345_v42 = vmul.f32 %v3313_v2, %v3217_v5  ;;  %v3312_v4 = vmin.f32 %v3280_v43, 6.0  ;;  %v3221_v1 = vadd.f32 %v9285_v12, %v3185_v25  ;;  %v3150_v62 = vadd.f32 %v7216_v38, %v9376_v30  ;;  %3442 = vst.msk [vmem:[#allocation3 + $0xc0] sm:$0xff] %vm1402_vm0, %v3374_v31  ;;  %7249 = vmatprep.mubr.msk.f32.mxu1 %vm1402_vm0, %v3372_v22  ;;  %v9599_v32 = vld [vmem:[#allocation3 + $0xa8] sm:$0xff] }
 0x241   : > { %v3283_v50 = vmax.f32 %v3251_v58, 0.0  ;;  %v3250_v14 = vadd.f32 3.0, %v3218_v51  ;;  %v3220_v10 = vadd.f32 %v9285_v12, %v3184_v0  ;;  %7296 = vmatprep.mubr.msk.f32.mxu0 %vm1402_vm0, %v9561_v3  ;;  %v3149_v9 = vadd.f32 %v3110_v6, %v9388_v54 }
 0x242   : > { %v3377_v5 = vmul.f32 0.16666667, %v3345_v42  ;;  %v3344_v26 = vmul.f32 %v3312_v4, %v3216_v27  ;;  %v3253_v40 = vadd.f32 3.0, %v3221_v1  ;;  %v3187_v7 = vmul.f32 %v9282_v18, %v3150_v62  ;;  %v9581_v13 = vld [vmem:[#allocation3 + $0xa0] sm:$0xff] }
 0x243   : > { %v3315_v30 = vmin.f32 %v3283_v50, 6.0  ;;  %v3282_v28 = vmax.f32 %v3250_v14, 0.0  ;;  %v3252_v11 = vadd.f32 3.0, %v3220_v10  ;;  %v3186_v37 = vmul.f32 %v9282_v18, %v3149_v9  ;;  %7250 = vmatmul.mubr.msk.f32.gmra.mxu1 %vm1402_vm0, %v9536_v16  ;;  %7297 = vmatmul.mubr.msk.f32.gmra.mxu0 %vm1402_vm0, %v9583_v46  ;;  %v3475_v58 = vld [vmem:[#allocation3 + $0xb8] sm:$0xff] }
 0x244   : > { %3445 = vst.msk [vmem:[#allocation3 + $0xd8] sm:$0xff] %vm1402_vm0, %v3377_v5  ;;  %v3376_v57 = vmul.f32 0.16666667, %v3344_v26  ;;  %v3285_v22 = vmax.f32 %v3253_v40, 0.0  ;;  %v3223_v54 = vadd.f32 %v9285_v12, %v3187_v7  ;;  %7252 = vmatprep.mubr.msk.f32.mxu1 %vm1402_vm0, %v3374_v31  ;;  %7299 = vmatprep.mubr.msk.f32.mxu0 %vm1402_vm0, %v9581_v13  ;;  %v9597_v48 = vld [vmem:[#allocation3 + $0xb0] sm:$0xff]  ;;  %v10586_v26 = vld [vmem:[#allocation53_spill] sm:$0xff] }
 0x245   : > { %v3347_v27 = vmul.f32 %v3315_v30, %v3219_v45  ;;  %v3314_v8 = vmin.f32 %v3282_v28, 6.0  ;;  %v3284_v20 = vmax.f32 %v3252_v11, 0.0  ;;  %v3222_v59 = vadd.f32 %v9285_v12, %v3186_v37  ;;  %v10587_v11 = vld [vmem:[#allocation50_spill] sm:$0xff] }
 0x246   : > { %3444 = vst.msk [vmem:[#allocation3 + $0xd0] sm:$0xff] %vm1402_vm0, %v3376_v57  ;;  %v3317_v18 = vmin.f32 %v3285_v22, 6.0  ;;  %v3255_v47 = vadd.f32 3.0, %v3223_v54 }
 0x247   : > { %v3379_v16 = vmul.f32 0.16666667, %v3347_v27  ;;  %v3346_v49 = vmul.f32 %v3314_v8, %v3218_v51  ;;  %v3316_v23 = vmin.f32 %v3284_v20, 6.0  ;;  %v3254_v15 = vadd.f32 3.0, %v3222_v59  ;;  %7253 = vmatmul.mubr.msk.f32.gmra.mxu1 %vm1402_vm0, %v3375_v63  ;;  %7300 = vmatmul.mubr.msk.f32.gmra.mxu0 %vm1402_vm0, %v9599_v32  ;;  %v3476_v25 = vld [vmem:[#allocation3 + $0xc0] sm:$0xff] }
 0x248   : > { %v3349_v45 = vmul.f32 %v3317_v18, %v3221_v1  ;;  %v3287_v60 = vmax.f32 %v3255_v47, 0.0  ;;  %7255 = vmatprep.mubr.msk.f32.mxu1 %vm1402_vm0, %v3376_v57  ;;  %7302 = vmatprep.mubr.msk.f32.mxu0 %vm1402_vm0, %v9597_v48  ;;  %v3477_v1 = vld [vmem:[#allocation3 + $0xc8] sm:$0xff]  ;;  %v10589_v18 = vld [vmem:[#allocation54_spill] sm:$0xff] }
 0x249   : > { %3447 = vst.msk [vmem:[#allocation3 + $0xe8] sm:$0xff] %vm1402_vm0, %v3379_v16  ;;  %v3378_v12 = vmul.f32 0.16666667, %v3346_v49  ;;  %v3348_v44 = vmul.f32 %v3316_v23, %v3220_v10  ;;  %v3286_v38 = vmax.f32 %v3254_v15, 0.0  ;;  %v10590_v23 = vld [vmem:[#allocation61_spill] sm:$0xff] }
 0x24a   : > { %v3381_v2 = vmul.f32 0.16666667, %v3349_v45  ;;  %v3319_v43 = vmin.f32 %v3287_v60, 6.0 }
 0x24b   : > { %3446 = vst.msk [vmem:[#allocation3 + $0xe0] sm:$0xff] %vm1402_vm0, %v3378_v12  ;;  %v3380_v31 = vmul.f32 0.16666667, %v3348_v44  ;;  %v3318_v63 = vmin.f32 %v3286_v38, 6.0  ;;  %7256 = vmatmul.mubr.msk.f32.gmra.mxu1 %vm1402_vm0, %v3377_v5  ;;  %7303 = vmatmul.mubr.msk.f32.gmra.mxu0 %vm1402_vm0, %v3475_v58  ;;  %v3479_v50 = vld [vmem:[#allocation3 + $0xd8] sm:$0xff] }
 0x24c   : > { %3449 = vst.msk [vmem:[#allocation3 + $0xf8] sm:$0xff] %vm1402_vm0, %v3381_v2  ;;  %v3351_v51 = vmul.f32 %v3319_v43, %v3223_v54  ;;  %7258 = vmatprep.mubr.msk.f32.mxu1 %vm1402_vm0, %v3378_v12  ;;  %7305 = vmatprep.mubr.msk.f32.mxu0 %vm1402_vm0, %v3476_v25  ;;  %v10588_v54 = vld [vmem:[#allocation58_spill] sm:$0xff]  ;;  %v10591_v12 = vld [vmem:[#allocation59_spill] sm:$0xff] }
 0x24d   : > { %3448 = vst.msk [vmem:[#allocation3 + $0xf0] sm:$0xff] %vm1402_vm0, %v3380_v31  ;;  %v3350_v0 = vmul.f32 %v3318_v63, %v3222_v59  ;;  %v3478_v42 = vld [vmem:[#allocation3 + $0xd0] sm:$0xff] }
 0x24e   : > { %v3383_v6 = vmul.f32 0.16666667, %v3351_v51 }
 0x24f   : > { %v3382_v4 = vmul.f32 0.16666667, %v3350_v0  ;;  %7259 = vmatmul.mubr.msk.f32.gmra.mxu1 %vm1402_vm0, %v3379_v16  ;;  %7306 = vmatmul.mubr.msk.f32.gmra.mxu0 %vm1402_vm0, %v3477_v1  ;;  %v10593_v0 = vld [vmem:[#allocation63_spill] sm:$0xff] }
 0x250   : > { %3451 = vst.msk [vmem:[#allocation3 + $0x108] sm:$0xff] %vm1402_vm0, %v3383_v6  ;;  %7261 = vmatprep.mubr.msk.f32.mxu1 %vm1402_vm0, %v3380_v31  ;;  %7308 = vmatprep.mubr.msk.f32.mxu0 %vm1402_vm0, %v3478_v42  ;;  %v3481_v10 = vld [vmem:[#allocation3 + $0xe8] sm:$0xff] }
 0x251   : > { %3450 = vst.msk [vmem:[#allocation3 + $0x100] sm:$0xff] %vm1402_vm0, %v3382_v4 }
 0x252   : > { %v3480_v62 = vld [vmem:[#allocation3 + $0xe0] sm:$0xff] }
 0x253   : > { %7262 = vmatmul.mubr.msk.f32.gmra.mxu1 %vm1402_vm0, %v3381_v2  ;;  %7309 = vmatmul.mubr.msk.f32.gmra.mxu0 %vm1402_vm0, %v3479_v50  ;;  %v3483_v9 = vld [vmem:[#allocation3 + $0xf8] sm:$0xff] }
 0x254   : > { %7264 = vmatprep.mubr.msk.f32.mxu1 %vm1402_vm0, %v3382_v4  ;;  %7311 = vmatprep.mubr.msk.f32.mxu0 %vm1402_vm0, %v3480_v62  ;;  %v3482_v14 = vld [vmem:[#allocation3 + $0xf0] sm:$0xff] }
 0x257   : > { %7265 = vmatmul.mubr.msk.f32.gmra.mxu1 %vm1402_vm0, %v3383_v6  ;;  %7312 = vmatmul.mubr.msk.f32.gmra.mxu0 %vm1402_vm0, %v3481_v10  ;;  %v3485_v7 = vld [vmem:[#allocation3 + $0x108] sm:$0xff] }
 0x258   : > { %7319 = vmatprep.mubr.msk.f32.mxu1 %vm1402_vm0, %v9426_v17  ;;  %7314 = vmatprep.mubr.msk.f32.mxu0 %vm1402_vm0, %v3482_v14  ;;  %v10580_v17 = vld [vmem:[#allocation44_spill] sm:$0xff] }
 0x25b   : > { %7315 = vmatmul.mubr.msk.f32.gmra.mxu0 %vm1402_vm0, %v3483_v9  ;;  %7320 = vmatmul.mubr.msk.f32.vlgmr.msra.gmra.mxu1 %vm1402_vm0, %v9433_v53  ;;  %v10581_v53 = vld [vmem:[#allocation16_spill] sm:$0xff] }
 0x25c   : > { %7322 = vmatprep.mubr.msk.f32.mxu1 %vm1402_vm0, %v9442_v33  ;;  %7418 = vmatpush3.msra.mxu1 %v9385_v55  ;;  %v4669_v55 = vld [vmem:[%s10379_s7] sm:$0xff]  ;;  %v5133_v33 = vmul.f32 %v10581_v53, %v10580_v17  ;;  %v5137_v40 = vmul.f32 %v10581_v53, %v10586_v26  ;;  %v5139_v27 = vmul.f32 %v10581_v53, %v10588_v54  ;;  %v10598_v26 = vld [vmem:[#allocation75_spill] sm:$0xff] }
 0x25d   : > { %7367 = vmatprep.subr.mxu0 %v4669_v55  ;;  %v5140_v47 = vmul.f32 %v10589_v18, %v10581_v53  ;;  %v5141_v15 = vmul.f32 %v10581_v53, %v10590_v23  ;;  %v5142_v44 = vmul.f32 %v10591_v12, %v10581_v53  ;;  %v5144_v6 = vmul.f32 %v10593_v0, %v10581_v53 }
 0x25e   : > { %7368 = vmatpush3.msra.mxu0 %v4669_v55  ;;  %v10595_v55 = vld [vmem:[#allocation67_spill] sm:$0xff] }
 0x25f   : > { %7323 = vmatmul.mubr.msk.f32.gmra.mxu1 %vm1402_vm0, %v9448_v29  ;;  %v10582_v29 = vld [vmem:[#allocation40_spill] sm:$0xff]  ;;  %v5146_v17 = vmul.f32 %v10595_v55, %v10581_v53 }
 0x260   : > { %7325 = vmatprep.mubr.msk.f32.mxu1 %vm1402_vm0, %v9458_v39  ;;  %v5134_v39 = vmul.f32 %v10582_v29, %v10581_v53 }
 0x263   : > { %7326 = vmatmul.mubr.msk.f32.gmra.mxu1 %vm1402_vm0, %v9471_v61  ;;  %v10583_v61 = vld [vmem:[#allocation17_spill] sm:$0xff] }
 0x264   : > { %7328 = vmatprep.mubr.msk.f32.mxu1 %vm1402_vm0, %v9492_v19  ;;  %v5169_v19 = vadd.f32 %v10583_v61, %v5133_v33  ;;  %v5173_v22 = vadd.f32 %v10583_v61, %v5137_v40  ;;  %v5175_v49 = vadd.f32 %v10583_v61, %v5139_v27  ;;  %v5176_v60 = vadd.f32 %v10583_v61, %v5140_v47 }
 0x265   : > { %v5177_v43 = vadd.f32 %v10583_v61, %v5141_v15  ;;  %v5178_v51 = vadd.f32 %v10583_v61, %v5142_v44  ;;  %v5149_v40 = vmul.f32 %v10581_v53, %v10598_v26 }
 0x266   : > { %v5205_v16 = vmul.f32 0.1, %v5173_v22  ;;  %v5207_v2 = vmul.f32 0.1, %v5175_v49 }
 0x267   : > { %7329 = vmatmul.mubr.msk.f32.gmra.mxu1 %vm1402_vm0, %v9497_v36  ;;  %v10584_v36 = vld [vmem:[#allocation49_spill] sm:$0xff]  ;;  %v5209_v4 = vmul.f32 0.1, %v5177_v43 }
 0x268   : > { %7331 = vmatprep.mubr.msk.f32.mxu1 %vm1402_vm0, %v9508_v35  ;;  %v5135_v35 = vmul.f32 %v10581_v53, %v10584_v36  ;;  %v5237_v38 = vmax.f32 %v5173_v22, %v5205_v16  ;;  %v10600_v22 = vld [vmem:[#allocation5_spill] sm:$0xff] }
 0x269   : > { %v5241_v33 = vmax.f32 %v5177_v43, %v5209_v4  ;;  %v5151_v54 = vmul.f32 %v10581_v53, %v10600_v22  ;;  %v10604_v43 = vld [vmem:[#allocation9_spill] sm:$0xff] }
 0x26a   : > { %v5171_v5 = vadd.f32 %v10583_v61, %v5135_v35 }
 0x26b   : > { %7332 = vmatmul.mubr.msk.f32.gmra.mxu1 %vm1402_vm0, %v9520_v41  ;;  %v3484_v41 = vld [vmem:[#allocation3 + $0x100] sm:$0xff]  ;;  %v5187_v16 = vadd.f32 %v10583_v61, %v5151_v54 }
 0x26c   : > { %7334 = vmatprep.mubr.msk.f32.mxu1 %vm1402_vm0, %v9528_v56  ;;  %v5170_v56 = vadd.f32 %v10583_v61, %v5134_v39  ;;  %v5203_v57 = vmul.f32 0.1, %v5171_v5 }
 0x26e   : > { %v5202_v30 = vmul.f32 0.1, %v5170_v56 }
 0x26f   : > { %7335 = vmatmul.mubr.msk.f32.gmra.mxu1 %vm1402_vm0, %v9541_v52  ;;  %v10585_v52 = vld [vmem:[#allocation46_spill] sm:$0xff] }
 0x270   : > { %7337 = vmatprep.mubr.msk.f32.mxu1 %vm1402_vm0, %v9555_v34  ;;  %v5136_v34 = vmul.f32 %v10585_v52, %v10581_v53  ;;  %v5234_v8 = vmax.f32 %v5170_v56, %v5202_v30  ;;  %v5182_v56 = vadd.f32 %v10583_v61, %v5146_v17  ;;  %v10597_v52 = vld [vmem:[#allocation71_spill] sm:$0xff] }
 0x272   : > { %v5172_v28 = vadd.f32 %v10583_v61, %v5136_v34  ;;  %v5148_v34 = vmul.f32 %v10597_v52, %v10581_v53 }
 0x273   : > { %7338 = vmatmul.mubr.msk.f32.gmra.mxu1 %vm1402_vm0, %v9564_v24  ;;  %v5201_v24 = vmul.f32 0.1, %v5169_v19 }
 0x274   : > { %7340 = vmatprep.mubr.msk.f32.mxu1 %vm1402_vm0, %v9561_v3  ;;  %v3486_v3 = vld [vmem:[#allocation3 + $0x110] sm:$0xff]  ;;  %v5204_v20 = vmul.f32 0.1, %v5172_v28  ;;  %v5184_v30 = vadd.f32 %v10583_v61, %v5148_v34 }
 0x275   : > { %v5233_v37 = vmax.f32 %v5169_v19, %v5201_v24  ;;  %v10596_v19 = vld [vmem:[#allocation73_spill] sm:$0xff] }
 0x276   : > { %v5147_v36 = vmul.f32 %v10581_v53, %v10596_v19 }
 0x277   : > { %7341 = vmatmul.mubr.msk.f32.gmra.mxu1 %vm1402_vm0, %v9583_v46  ;;  %v5138_v46 = vmul.f32 %v10587_v11, %v10581_v53 }
 0x278   : > { %7343 = vmatprep.mubr.msk.f32.mxu1 %vm1402_vm0, %v9581_v13  ;;  %v3487_v13 = vld [vmem:[#allocation3 + $0x118] sm:$0xff] }
 0x279   : > { %v5174_v59 = vadd.f32 %v10583_v61, %v5138_v46 }
 0x27b   : > { %7344 = vmatmul.mubr.msk.f32.gmra.mxu1 %vm1402_vm0, %v9599_v32  ;;  %v5236_v32 = vmax.f32 %v5172_v28, %v5204_v20  ;;  %v5206_v45 = vmul.f32 0.1, %v5174_v59  ;;  %v10599_v28 = vld [vmem:[#allocation74_spill] sm:$0xff] }
 0x27c   : > { %7346 = vmatprep.mubr.msk.f32.mxu1 %vm1402_vm0, %v9597_v48  ;;  %v5235_v48 = vmax.f32 %v5171_v5, %v5203_v57  ;;  %v5183_v5 = vadd.f32 %v10583_v61, %v5147_v36  ;;  %v5150_v11 = vmul.f32 %v10599_v28, %v10581_v53  ;;  %v5185_v57 = vadd.f32 %v10583_v61, %v5149_v40 }
 0x27d   : > { %v5238_v63 = vmax.f32 %v5174_v59, %v5206_v45  ;;  %v10601_v59 = vld [vmem:[#allocation4_spill] sm:$0xff] }
 0x27e   : > { %v5186_v20 = vadd.f32 %v10583_v61, %v5150_v11  ;;  %v5152_v18 = vmul.f32 %v10601_v59, %v10581_v53 }
 0x27f   : > { %7347 = vmatmul.mubr.msk.f32.gmra.mxu1 %vm1402_vm0, %v3475_v58  ;;  %v5208_v58 = vmul.f32 0.1, %v5176_v60 }
 0x280   : > { %7349 = vmatprep.mubr.msk.f32.mxu1 %vm1402_vm0, %v3476_v25  ;;  %v10592_v25 = vld [vmem:[#allocation65_spill] sm:$0xff]  ;;  %v5188_v45 = vadd.f32 %v10583_v61, %v5152_v18 }
 0x281   : > { %v5143_v31 = vmul.f32 %v10581_v53, %v10592_v25  ;;  %v5155_v25 = vmul.f32 %v10581_v53, %v10604_v43 }
 0x283   : > { %7350 = vmatmul.mubr.msk.f32.gmra.mxu1 %vm1402_vm0, %v3477_v1  ;;  %v5179_v1 = vadd.f32 %v10583_v61, %v5143_v31  ;;  %v5191_v4 = vadd.f32 %v10583_v61, %v5155_v25 }
 0x284   : > { %7352 = vmatprep.mubr.msk.f32.mxu1 %vm1402_vm0, %v3478_v42  ;;  %v5239_v42 = vmax.f32 %v5175_v49, %v5207_v2  ;;  %v10602_v49 = vld [vmem:[#allocation7_spill] sm:$0xff] }
 0x285   : > { %v5211_v29 = vmul.f32 0.1, %v5179_v1  ;;  %v5153_v23 = vmul.f32 %v10581_v53, %v10602_v49 }
 0x287   : > { %7353 = vmatmul.mubr.msk.f32.gmra.mxu1 %vm1402_vm0, %v3479_v50  ;;  %v5189_v2 = vadd.f32 %v10583_v61, %v5153_v23  ;;  %v10613_v23 = vld [vmem:[#allocation18_spill] sm:$0xff] }
 0x288   : > { %7355 = vmatprep.mubr.msk.f32.mxu1 %vm1402_vm0, %v3480_v62  ;;  %v10594_v62 = vld [vmem:[#allocation70_spill] sm:$0xff] }
 0x289   : > { %v5145_v50 = vmul.f32 %v10581_v53, %v10594_v62 }
 0x28b   : > { %7356 = vmatmul.mubr.msk.f32.gmra.mxu1 %vm1402_vm0, %v3481_v10  ;;  %v5210_v10 = vmul.f32 0.1, %v5178_v51  ;;  %v5181_v39 = vadd.f32 %v10583_v61, %v5145_v50 }
 0x28c   : > { %7358 = vmatprep.mubr.msk.f32.mxu1 %vm1402_vm0, %v3482_v14  ;;  %v5240_v14 = vmax.f32 %v5176_v60, %v5208_v58  ;;  %v10603_v60 = vld [vmem:[#allocation6_spill] sm:$0xff] }
 0x28d   : > { %v5242_v35 = vmax.f32 %v5178_v51, %v5210_v10  ;;  %v5213_v24 = vmul.f32 0.1, %v5181_v39  ;;  %v5154_v12 = vmul.f32 %v10603_v60, %v10581_v53  ;;  %v10605_v51 = vld [vmem:[#allocation8_spill] sm:$0xff]  ;;  %v7271_v60 = vpop.f32.mrf.mxu0 }
 0x28e   : > { %v5156_v0 = vmul.f32 %v10605_v51, %v10581_v53 }
 0x28f   : > { %7359 = vmatmul.mubr.msk.f32.gmra.mxu1 %vm1402_vm0, %v3483_v9  ;;  %v5180_v9 = vadd.f32 %v10583_v61, %v5144_v6  ;;  %v5245_v46 = vmax.f32 %v5181_v39, %v5213_v24  ;;  %v5190_v58 = vadd.f32 %v10583_v61, %v5154_v12  ;;  %v10608_v39 = vld [vmem:[#allocation13_spill] sm:$0xff] }
 0x290   : > { %7361 = vmatprep.mubr.msk.f32.mxu1 %vm1402_vm0, %v3484_v41  ;;  %v5192_v10 = vadd.f32 %v10583_v61, %v5156_v0  ;;  %v5159_v19 = vmul.f32 %v10581_v53, %v10608_v39 }
 0x291   : > { %v5212_v41 = vmul.f32 0.1, %v5180_v9 }
 0x292   : > { %v5195_v24 = vadd.f32 %v10583_v61, %v5159_v19 }
 0x293   : > { %7362 = vmatmul.mubr.msk.f32.gmra.mxu1 %vm1402_vm0, %v3485_v7  ;;  %v5244_v7 = vmax.f32 %v5180_v9, %v5212_v41  ;;  %v10607_v9 = vld [vmem:[#allocation10_spill] sm:$0xff] }
 0x294   : > { %7364 = vmatprep.mubr.msk.f32.mxu1 %vm1402_vm0, %v3486_v3  ;;  %v5243_v3 = vmax.f32 %v5179_v1, %v5211_v29  ;;  %v10606_v1 = vld [vmem:[#allocation11_spill] sm:$0xff]  ;;  %v5158_v55 = vmul.f32 %v10607_v9, %v10581_v53 }
 0x295   : > { %v5157_v62 = vmul.f32 %v10581_v53, %v10606_v1 }
 0x296   : > { %v5194_v41 = vadd.f32 %v10583_v61, %v5158_v55 }
 0x297   : > { %7365 = vmatmul.mubr.msk.f32.gmra.mxu1 %vm1402_vm0, %v3487_v13  ;;  %v5214_v13 = vmul.f32 0.1, %v5182_v56  ;;  %v5193_v29 = vadd.f32 %v10583_v61, %v5157_v62 }
 0x298   : > { %7419 = vmatprep.mubr.msk.f32.mxu1 %vm1402_vm0, %v5233_v37  ;;  %v5215_v37 = vmul.f32 0.1, %v5183_v5 }
 0x299   : > { %v5246_v27 = vmax.f32 %v5182_v56, %v5214_v13  ;;  %v10609_v56 = vld [vmem:[#allocation12_spill] sm:$0xff] }
 0x29a   : > { %v5247_v47 = vmax.f32 %v5183_v5, %v5215_v37  ;;  %v5160_v52 = vmul.f32 %v10609_v56, %v10581_v53  ;;  %v10610_v5 = vld [vmem:[#allocation15_spill] sm:$0xff] }
 0x29b   : > { %7420 = vmatmul.mubr.msk.f32.vlgmr.msra.gmra.mxu1 %vm1402_vm0, %v5234_v8  ;;  %v5216_v8 = vmul.f32 0.1, %v5184_v30  ;;  %v5161_v26 = vmul.f32 %v10581_v53, %v10610_v5 }
 0x29c   : > { %7422 = vmatprep.mubr.msk.f32.mxu1 %vm1402_vm0, %v5235_v48  ;;  %v5217_v48 = vmul.f32 0.1, %v5185_v57  ;;  %v5196_v13 = vadd.f32 %v10583_v61, %v5160_v52 }
 0x29d   : > { %v5248_v15 = vmax.f32 %v5184_v30, %v5216_v8  ;;  %v10611_v30 = vld [vmem:[#allocation14_spill] sm:$0xff]  ;;  %v5197_v37 = vadd.f32 %v10583_v61, %v5161_v26 }
 0x29e   : > { %v5249_v44 = vmax.f32 %v5185_v57, %v5217_v48  ;;  %v5162_v28 = vmul.f32 %v10611_v30, %v10581_v53  ;;  %v10612_v57 = vld [vmem:[#allocation45_spill] sm:$0xff] }
 0x29f   : > { %7423 = vmatmul.mubr.msk.f32.gmra.mxu1 %vm1402_vm0, %v5236_v32  ;;  %v5218_v32 = vmul.f32 0.1, %v5186_v20  ;;  %v5163_v22 = vmul.f32 %v10581_v53, %v10612_v57  ;;  %v5229_v59 = vmul.f32 0.1, %v5197_v37 }
 0x2a0   : > { %7425 = vmatprep.mubr.msk.f32.mxu1 %vm1402_vm0, %v5237_v38  ;;  %v5219_v38 = vmul.f32 0.1, %v5187_v16  ;;  %v5198_v8 = vadd.f32 %v10583_v61, %v5162_v28 }
 0x2a1   : > { %v5250_v31 = vmax.f32 %v5186_v20, %v5218_v32  ;;  %v5199_v18 = vadd.f32 %v10583_v61, %v5163_v22 }
 0x2a2   : > { %v5251_v6 = vmax.f32 %v5187_v16, %v5219_v38  ;;  %v5230_v48 = vmul.f32 0.1, %v5198_v8  ;;  %v5261_v16 = vmax.f32 %v5197_v37, %v5229_v59  ;;  %v3974_v38 = vpop.f32.mrf.mxu0 }
 0x2a3   : > { %7426 = vmatmul.mubr.msk.f32.gmra.mxu1 %vm1402_vm0, %v5238_v63  ;;  %v5220_v63 = vmul.f32 0.1, %v5188_v45  ;;  %v5231_v53 = vmul.f32 0.1, %v5199_v18 }
 0x2a4   : > { %7428 = vmatprep.mubr.msk.f32.mxu1 %vm1402_vm0, %v5239_v42  ;;  %v5221_v42 = vmul.f32 0.1, %v5189_v2  ;;  %v5262_v49 = vmax.f32 %v5198_v8, %v5230_v48 }
 0x2a5   : > { %v5252_v50 = vmax.f32 %v5188_v45, %v5220_v63  ;;  %v5263_v32 = vmax.f32 %v5199_v18, %v5231_v53  ;;  %v4404_v53 = vld [vmem:[%s10384_s12] sm:$0x3] }
 0x2a6   : > { %v5253_v17 = vmax.f32 %v5189_v2, %v5221_v42 }
 0x2a7   : > { %7429 = vmatmul.mubr.msk.f32.gmra.mxu1 %vm1402_vm0, %v5240_v14  ;;  %v5222_v14 = vmul.f32 0.1, %v5190_v58 }
 0x2a8   : > { %7431 = vmatprep.mubr.msk.f32.mxu1 %vm1402_vm0, %v5241_v33  ;;  %v5223_v33 = vmul.f32 0.1, %v5191_v4 }
 0x2a9   : > { %v5254_v36 = vmax.f32 %v5190_v58, %v5222_v14 }
 0x2aa   : > { %v5255_v34 = vmax.f32 %v5191_v4, %v5223_v33 }
 0x2ab   : > { %7432 = vmatmul.mubr.msk.f32.gmra.mxu1 %vm1402_vm0, %v5242_v35  ;;  %v5224_v35 = vmul.f32 0.1, %v5192_v10 }
 0x2ac   : > { %7434 = vmatprep.mubr.msk.f32.mxu1 %vm1402_vm0, %v5243_v3  ;;  %v5225_v3 = vmul.f32 0.1, %v5193_v29 }
 0x2ad   : > { %v5256_v40 = vmax.f32 %v5192_v10, %v5224_v35 }
 0x2ae   : > { %v5257_v11 = vmax.f32 %v5193_v29, %v5225_v3 }
 0x2af   : > { %7435 = vmatmul.mubr.msk.f32.gmra.mxu1 %vm1402_vm0, %v5244_v7  ;;  %v5226_v7 = vmul.f32 0.1, %v5194_v41 }
 0x2b0   : > { %7437 = vmatprep.mubr.msk.f32.mxu1 %vm1402_vm0, %v5245_v46  ;;  %v5227_v46 = vmul.f32 0.1, %v5195_v24 }
 0x2b1   : > { %v5258_v54 = vmax.f32 %v5194_v41, %v5226_v7 }
 0x2b2   : > { %v5259_v20 = vmax.f32 %v5195_v24, %v5227_v46 }
 0x2b3   : > { %7438 = vmatmul.mubr.msk.f32.gmra.mxu1 %vm1402_vm0, %v5246_v27  ;;  %v5228_v27 = vmul.f32 0.1, %v5196_v13 }
 0x2b4   : > { %7440 = vmatprep.mubr.msk.f32.mxu1 %vm1402_vm0, %v5247_v47 }
 0x2b5   : > { %v5260_v47 = vmax.f32 %v5196_v13, %v5228_v27 }
 0x2b7   : > { %7441 = vmatmul.mubr.msk.f32.gmra.mxu1 %vm1402_vm0, %v5248_v15  ;;  %v5232_v15 = vmul.f32 0.1, %v10613_v23 }
 0x2b8   : > { %7443 = vmatprep.mubr.msk.f32.mxu1 %vm1402_vm0, %v5249_v44 }
 0x2b9   : > { %v5264_v61 = vmax.f32 %v10613_v23, %v5232_v15  ;;  %v9843_v23 = vld [vmem:[%s10380_s8] sm:$0xff] }
 0x2ba   : > { %10622 = vst [vmem:[#allocation16_spill] sm:$0xff] %v9843_v23  ;;  %7467 = vmatprep.subr.mxu0 %v9843_v23 }
 0x2bb   : > { %7444 = vmatmul.mubr.msk.f32.gmra.mxu1 %vm1402_vm0, %v5250_v31 }
 0x2bc   : > { %7446 = vmatprep.mubr.msk.f32.mxu1 %vm1402_vm0, %v5251_v6 }
 0x2bf   : > { %7447 = vmatmul.mubr.msk.f32.gmra.mxu1 %vm1402_vm0, %v5252_v50 }
 0x2c0   : > { %7449 = vmatprep.mubr.msk.f32.mxu1 %vm1402_vm0, %v5253_v17 }
 0x2c3   : > { %7450 = vmatmul.mubr.msk.f32.gmra.mxu1 %vm1402_vm0, %v5254_v36 }
 0x2c4   : > { %7452 = vmatprep.mubr.msk.f32.mxu1 %vm1402_vm0, %v5255_v34 }
 0x2c7   : > { %7453 = vmatmul.mubr.msk.f32.gmra.mxu1 %vm1402_vm0, %v5256_v40 }
 0x2c8   : > { %7455 = vmatprep.mubr.msk.f32.mxu1 %vm1402_vm0, %v5257_v11 }
 0x2cb   : > { %7456 = vmatmul.mubr.msk.f32.gmra.mxu1 %vm1402_vm0, %v5258_v54 }
 0x2cc   : > { %7458 = vmatprep.mubr.msk.f32.mxu1 %vm1402_vm0, %v5259_v20 }
 0x2cf   : > { %7459 = vmatmul.mubr.msk.f32.gmra.mxu1 %vm1402_vm0, %v5260_v47 }
 0x2d0   : > { %7461 = vmatprep.mubr.msk.f32.mxu1 %vm1402_vm0, %v5261_v16 }
 0x2d3   : > { %7462 = vmatmul.mubr.msk.f32.gmra.mxu1 %vm1402_vm0, %v5262_v49 }
 0x2d4   : > { %7464 = vmatprep.mubr.msk.f32.mxu1 %vm1402_vm0, %v5263_v32  ;;  %v10623_v32 = vld [vmem:[#allocation19_spill] sm:$0xff] }
 0x2d7   : > { %7465 = vmatmul.mubr.msk.f32.gmra.mxu1 %vm1402_vm0, %v5264_v61  ;;  %v9846_v61 = vrot.slane %v4404_v53, %v10623_v32 }
 0x2d9   : > { %v7221_v45 = vpop.f32.mrf.mxu1  ;;  %10624 = vst [vmem:[#allocation40_spill] sm:$0xff] %v9846_v61 }
 0x2da   : > { %v3980_v15 = vadd.f32 %v7271_v60, %v7221_v45 }
 0x2db   : > { %v9811_v12 = vpop.f32.mrf.mxu1 }
 0x2de   : > { %v9813_v44 = vpop.f32.mrf.mxu1 }
 0x2e0   : > { %v9815_v2 = vpop.f32.mrf.mxu1 }
 0x2e1   : > { %v7274_v25 = vpop.f32.mrf.mxu0 }
 0x2e2   : > { %v9817_v43 = vpop.f32.mrf.mxu1 }
 0x2e3   : > { %v3984_v63 = vpop.f32.mrf.mxu0 }
 0x2e4   : > { %v9819_v31 = vpop.f32.mrf.mxu1 }
 0x2e6   : > { %v7230_v58 = vpop.f32.mrf.mxu1  ;;  %v7277_v51 = vpop.f32.mrf.mxu0 }
 0x2e8   : > { %v3683_v0 = vpop.f32.mrf.mxu1  ;;  %v3994_v6 = vpop.f32.mrf.mxu0 }
 0x2e9   : > { %v3995_v45 = vadd.f32 %v3994_v6, %v9819_v31 }
 0x2ea   : > { %v7280_v42 = vpop.f32.mrf.mxu0  ;;  %v7233_v4 = vpop.f32.mrf.mxu1 }
 0x2eb   : > { %v4010_v60 = vadd.f32 %v7280_v42, %v7230_v58 }
 0x2ec   : > { %v4004_v1 = vpop.f32.mrf.mxu0  ;;  %v3693_v62 = vpop.f32.mrf.mxu1 }
 0x2ed   : > { %v9857_v32 = vadd.f32 %v4004_v1, %v3683_v0 }
 0x2ee   : > { %v7283_v50 = vpop.f32.mrf.mxu0  ;;  %v7236_v14 = vpop.f32.mrf.mxu1 }
 0x2ef   : > { %v9859_v61 = vadd.f32 %v7283_v50, %v7233_v4 }
 0x2f0   : > { %v4014_v10 = vpop.f32.mrf.mxu0  ;;  %v3703_v9 = vpop.f32.mrf.mxu1 }
 0x2f2   : > { %v7239_v55 = vpop.f32.mrf.mxu1  ;;  %v7286_v17 = vpop.f32.mrf.mxu0 }
 0x2f4   : > { %v3713_v33 = vpop.f32.mrf.mxu1  ;;  %v4024_v29 = vpop.f32.mrf.mxu0 }
 0x2f6   : > { %v7289_v19 = vpop.f32.mrf.mxu0 }
 0x2f7   : > { %v7242_v39 = vpop.f32.mrf.mxu1 }
 0x2f8   : > { %v4034_v35 = vpop.f32.mrf.mxu0 }
 0x2f9   : > { %v3723_v36 = vpop.f32.mrf.mxu1 }
 0x2fa   : > { %v7292_v56 = vpop.f32.mrf.mxu0 }
 0x2fb   : > { %v7245_v41 = vpop.f32.mrf.mxu1 }
 0x2fc   : > { %v4044_v34 = vpop.f32.mrf.mxu0 }
 0x2fd   : > { %v3733_v52 = vpop.f32.mrf.mxu1  ;;  %v9876_v42 = vadd.f32 %v4044_v34, %v3723_v36 }
 0x2ff   : > { %v7248_v3 = vpop.f32.mrf.mxu1  ;;  %v7295_v24 = vpop.f32.mrf.mxu0 }
 0x300   : > { %v9878_v4 = vadd.f32 %v7295_v24, %v7245_v41 }
 0x301   : > { %v3743_v5 = vpop.f32.mrf.mxu1  ;;  %v4054_v26 = vpop.f32.mrf.mxu0 }
 0x302   : > { %v9880_v1 = vadd.f32 %v4054_v26, %v3733_v52 }
 0x303   : > { %v7251_v40 = vpop.f32.mrf.mxu1  ;;  %v7298_v7 = vpop.f32.mrf.mxu0 }
 0x305   : > { %v3753_v13 = vpop.f32.mrf.mxu1  ;;  %v4064_v30 = vpop.f32.mrf.mxu0 }
 0x307   : > { %v7254_v28 = vpop.f32.mrf.mxu1  ;;  %v7301_v11 = vpop.f32.mrf.mxu0 }
 0x309   : > { %v9821_v46 = vpop.f32.mrf.mxu1  ;;  %v4074_v37 = vpop.f32.mrf.mxu0 }
 0x30a   : > { %10614 = vst [vmem:[#allocation42_spill] sm:$0xff] %v9821_v46  ;;  %v4000_v46 = vadd.f32 %v7277_v51, %v9817_v43  ;;  %v9870_v43 = vadd.f32 %v4034_v35, %v3713_v33  ;;  %v9888_v33 = vadd.f32 %v7301_v11, %v7251_v40 }
 0x30b   : > { %v9823_v57 = vpop.f32.mrf.mxu1  ;;  %v7304_v22 = vpop.f32.mrf.mxu0 }
 0x30c   : > { %10615 = vst [vmem:[#allocation55_spill] sm:$0xff] %v9823_v57 }
 0x30d   : > { %v3773_v54 = vpop.f32.mrf.mxu1  ;;  %v4084_v27 = vpop.f32.mrf.mxu0 }
 0x30f   : > { %v9825_v8 = vpop.f32.mrf.mxu1  ;;  %v7307_v59 = vpop.f32.mrf.mxu0 }
 0x310   : > { %10616 = vst [vmem:[#allocation72_spill] sm:$0xff] %v9825_v8  ;;  %v3985_v8 = vadd.f32 %v3984_v63, %v9815_v2  ;;  %v9868_v2 = vadd.f32 %v7289_v19, %v7239_v55  ;;  %v9872_v63 = vadd.f32 %v7292_v56, %v7242_v39  ;;  %v9892_v39 = vadd.f32 %v7304_v22, %v7254_v28 }
 0x311   : > { %v9827_v20 = vpop.f32.mrf.mxu1  ;;  %v4094_v48 = vpop.f32.mrf.mxu0  ;;  %v10628_v34 = vld [vmem:[#allocation42_spill] sm:$0xff] }
 0x312   : > { %10617 = vst [vmem:[#allocation76_spill] sm:$0xff] %v9827_v20  ;;  %v3975_v20 = vadd.f32 %v3974_v38, %v9811_v12  ;;  %v9864_v38 = vadd.f32 %v7286_v17, %v7236_v14  ;;  %v9886_v17 = vadd.f32 %v4064_v30, %v3743_v5  ;;  %v9902_v26 = vadd.f32 %v4094_v48, %v3773_v54 }
 0x313   : > { %v9829_v18 = vpop.f32.mrf.mxu1  ;;  %v10629_v24 = vld [vmem:[#allocation55_spill] sm:$0xff] }
 0x314   : > { %10618 = vst [vmem:[#allocation77_spill] sm:$0xff] %v9829_v18  ;;  %v9900_v5 = vadd.f32 %v7307_v59, %v10629_v24 }
 0x315   : > { %v9831_v47 = vpop.f32.mrf.mxu1 }
 0x316   : > { %10619 = vst [vmem:[#allocation78_spill] sm:$0xff] %v9831_v47  ;;  %v7310_v47 = vpop.f32.mrf.mxu0 }
 0x317   : > { %v9833_v16 = vpop.f32.mrf.mxu1 }
 0x318   : > { %10620 = vst [vmem:[#allocation35_spill] sm:$0xff] %v9833_v16  ;;  %v9850_v16 = vrot.slane %v4404_v53, %v10562_v21  ;;  %v9861_v21 = vadd.f32 %v4014_v10, %v3693_v62  ;;  %v10626_v53 = vld [vmem:[#allocation40_spill] sm:$0xff]  ;;  %v9882_v62 = vadd.f32 %v7298_v7, %v7248_v3  ;;  %v9897_v3 = vadd.f32 %v4084_v27, %v10628_v34 }
 0x319   : > { %v9838_v49 = vpop.f32.mrf.mxu1  ;;  %v10631_v22 = vld [vmem:[#allocation76_spill] sm:$0xff] }
 0x31a   : > { %10621 = vst [vmem:[#allocation44_spill] sm:$0xff] %v9838_v49  ;;  %10625 = vst [vmem:[#allocation17_spill] sm:$0xff] %v9850_v16  ;;  %v3990_v49 = vadd.f32 %v7274_v25, %v9813_v44  ;;  %v9866_v44 = vadd.f32 %v4024_v29, %v3703_v9  ;;  %v4104_v25 = vpop.f32.mrf.mxu0  ;;  %v9890_v29 = vadd.f32 %v4074_v37, %v3753_v13  ;;  %v10630_v37 = vld [vmem:[#allocation72_spill] sm:$0xff] }
 0x31b   : > { %v7321_v18 = vpop.f32.mrf.mxu1 }
 0x31c   : > { %v4373_v57 = vadd.f32 %v7321_v18, %v3980_v15  ;;  %v7313_v19 = vpop.f32.mrf.mxu0 }
 0x31d   : > { %v4213_v23 = vpop.f32.mrf.mxu1 }
 0x31e   : > { %v4410_v16 = vmul.f32 %v10626_v53, %v4373_v57  ;;  %v4372_v12 = vadd.f32 %v4213_v23, %v3975_v20  ;;  %v9906_v57 = vadd.f32 %v7310_v47, %v10630_v37  ;;  %v4114_v27 = vpop.f32.mrf.mxu0 }
 0x31f   : > { %v7324_v31 = vpop.f32.mrf.mxu1 }
 0x320   : > { %v4409_v0 = vmul.f32 %v10626_v53, %v4372_v12  ;;  %v4375_v6 = vadd.f32 %v7324_v31, %v3990_v49  ;;  %v10632_v49 = vld [vmem:[#allocation77_spill] sm:$0xff] }
 0x321   : > { %v10627_v58 = vld [vmem:[#allocation17_spill] sm:$0xff]  ;;  %v4223_v50 = vpop.f32.mrf.mxu1  ;;  %v9913_v23 = vadd.f32 %v7313_v19, %v10632_v49 }
 0x322   : > { %v4446_v51 = vadd.f32 %v10627_v58, %v4410_v16  ;;  %v4445_v10 = vadd.f32 %v10627_v58, %v4409_v0  ;;  %v4412_v9 = vmul.f32 %v10626_v53, %v4375_v6  ;;  %v4374_v55 = vadd.f32 %v4223_v50, %v3985_v8 }
 0x323   : > { %v7327_v36 = vpop.f32.mrf.mxu1  ;;  %v9909_v8 = vadd.f32 %v4104_v25, %v10631_v22  ;;  %v10633_v25 = vld [vmem:[#allocation78_spill] sm:$0xff] }
 0x324   : > { %v4478_v14 = vadd.f32 3.0, %v4446_v51  ;;  %v4477_v41 = vadd.f32 3.0, %v4445_v10  ;;  %v4448_v56 = vadd.f32 %v10627_v58, %v4412_v9  ;;  %v4411_v52 = vmul.f32 %v10626_v53, %v4374_v55 }
 0x325   : > { %v4377_v40 = vadd.f32 %v7327_v36, %v4000_v46  ;;  %v4233_v7 = vpop.f32.mrf.mxu1  ;;  %v9918_v0 = vadd.f32 %v4114_v27, %v10633_v25  ;;  %v10636_v25 = vld [vmem:[#allocation23_spill] sm:$0xff] }
 0x326   : > { %v4510_v35 = vmax.f32 %v4478_v14, 0.0  ;;  %v4509_v30 = vmax.f32 %v4477_v41, 0.0  ;;  %v4480_v28 = vadd.f32 3.0, %v4448_v56  ;;  %v4447_v11 = vadd.f32 %v10627_v58, %v4411_v52 }
 0x327   : > { %v4414_v20 = vmul.f32 %v10626_v53, %v4377_v40  ;;  %v4376_v59 = vadd.f32 %v4233_v7, %v3995_v45  ;;  %v7330_v18 = vpop.f32.mrf.mxu1 }
 0x328   : > { %v4542_v13 = vmin.f32 %v4510_v35, 6.0  ;;  %v4541_v48 = vmin.f32 %v4509_v30, 6.0  ;;  %v4512_v46 = vmax.f32 %v4480_v28, 0.0  ;;  %v4479_v16 = vadd.f32 3.0, %v4447_v11 }
 0x329   : > { %v4450_v15 = vadd.f32 %v10627_v58, %v4414_v20  ;;  %v4413_v47 = vmul.f32 %v10626_v53, %v4376_v59  ;;  %v4379_v12 = vadd.f32 %v7330_v18, %v4010_v60  ;;  %v4243_v31 = vpop.f32.mrf.mxu1  ;;  %v10634_v20 = vld [vmem:[#allocation21_spill] sm:$0xff] }
 0x32a   : > { %v4574_v54 = vmul.f32 %v4542_v13, %v4446_v51  ;;  %v4573_v6 = vmul.f32 %v4541_v48, %v4445_v10  ;;  %v4544_v50 = vmin.f32 %v4512_v46, 6.0  ;;  %v4511_v45 = vmax.f32 %v4479_v16, 0.0  ;;  %v10635_v18 = vld [vmem:[#allocation25_spill] sm:$0xff] }
 0x32b   : > { %v4482_v14 = vadd.f32 3.0, %v4450_v15  ;;  %v4449_v51 = vadd.f32 %v10627_v58, %v4413_v47  ;;  %v4416_v9 = vmul.f32 %v10626_v53, %v4379_v12  ;;  %v4378_v55 = vadd.f32 %v4243_v31, %v9857_v32  ;;  %v7333_v19 = vpop.f32.mrf.mxu1 }
 0x32c   : > { %v4606_v36 = vmul.f32 0.16666667, %v4574_v54  ;;  %v4605_v35 = vmul.f32 0.16666667, %v4573_v6  ;;  %v4576_v41 = vmul.f32 %v4544_v50, %v4448_v56  ;;  %v4543_v52 = vmin.f32 %v4511_v45, 6.0 }
 0x32d   : > { %v4514_v60 = vmax.f32 %v4482_v14, 0.0  ;;  %v4481_v34 = vadd.f32 3.0, %v4449_v51  ;;  %v4452_v24 = vadd.f32 %v10627_v58, %v4416_v9  ;;  %v4415_v10 = vmul.f32 %v10626_v53, %v4378_v55  ;;  %v4253_v40 = vpop.f32.mrf.mxu1 }
 0x32e   : > { %v4608_v7 = vmul.f32 0.16666667, %v4576_v41  ;;  %v4575_v13 = vmul.f32 %v4543_v52, %v4447_v11  ;;  %v4381_v30 = vadd.f32 %v7333_v19, %v9859_v61  ;;  %v4380_v28 = vadd.f32 %v4253_v40, %v9861_v21 }
 0x32f   : > { %v4546_v37 = vmin.f32 %v4514_v60, 6.0  ;;  %v4513_v32 = vmax.f32 %v4481_v34, 0.0  ;;  %v4484_v22 = vadd.f32 3.0, %v4452_v24  ;;  %v4451_v27 = vadd.f32 %v10627_v58, %v4415_v10  ;;  %v7336_v56 = vpop.f32.mrf.mxu1 }
 0x330   : > { %v4638_v59 = vadd.f32 %v4606_v36, %v10634_v20  ;;  %v4640_v54 = vadd.f32 %v4608_v7, %v10635_v18  ;;  %v4418_v48 = vmul.f32 %v10626_v53, %v4381_v30  ;;  %v4417_v46 = vmul.f32 %v10626_v53, %v4380_v28  ;;  %v10637_v30 = vld [vmem:[#allocation16_spill] sm:$0xff] }
 0x331   : > { %v4578_v16 = vmul.f32 %v4546_v37, %v4450_v15  ;;  %v4545_v11 = vmin.f32 %v4513_v32, 6.0  ;;  %v4516_v49 = vmax.f32 %v4484_v22, 0.0  ;;  %v4483_v61 = vadd.f32 3.0, %v4451_v27  ;;  %v4263_v47 = vpop.f32.mrf.mxu1  ;;  %v10638_v32 = vld [vmem:[#allocation27_spill] sm:$0xff] }
 0x332   : > { %v4454_v21 = vadd.f32 %v10627_v58, %v4418_v48  ;;  %v4453_v12 = vadd.f32 %v10627_v58, %v4417_v46  ;;  %v4383_v31 = vadd.f32 %v7336_v56, %v9864_v38  ;;  %v4637_v6 = vadd.f32 %v4605_v35, %v10636_v25  ;;  %v7316_v35 = vpop.f32.mrf.mxu0  ;;  %v10639_v48 = vld [vmem:[#allocation35_spill] sm:$0xff] }
 0x333   : > { %v4607_v50 = vmul.f32 0.16666667, %v4575_v13  ;;  %v4577_v45 = vmul.f32 %v4545_v11, %v4449_v51  ;;  %v4548_v14 = vmin.f32 %v4516_v49, 6.0  ;;  %v4515_v9 = vmax.f32 %v4483_v61, 0.0  ;;  %v7339_v55 = vpop.f32.mrf.mxu1  ;;  %v10641_v61 = vld [vmem:[#allocation33_spill] sm:$0xff] }
 0x334   : > { %v4486_v19 = vadd.f32 3.0, %v4454_v21  ;;  %v4485_v36 = vadd.f32 3.0, %v4453_v12  ;;  %v4420_v15 = vmul.f32 %v10626_v53, %v4383_v31  ;;  %7369 = vmatprep.mubr.msk.f32.mxu0 %vm1402_vm0, %v4637_v6  ;;  %v4382_v41 = vadd.f32 %v4263_v47, %v9866_v44 }
 0x335   : > { %v4610_v52 = vmul.f32 0.16666667, %v4578_v16  ;;  %v4609_v60 = vmul.f32 0.16666667, %v4577_v45  ;;  %v4580_v34 = vmul.f32 %v4548_v14, %v4452_v24  ;;  %v4547_v10 = vmin.f32 %v4515_v9, 6.0  ;;  %7370 = vmatmul.mubr.msk.f32.vlgmr.msra.gmra.mxu0 %vm1402_vm0, %v4638_v59  ;;  %v4273_v38 = vpop.f32.mrf.mxu1  ;;  %v10640_v16 = vld [vmem:[#allocation29_spill] sm:$0xff] }
 0x336   : > { %v4518_v51 = vmax.f32 %v4486_v19, 0.0  ;;  %v4517_v40 = vmax.f32 %v4485_v36, 0.0  ;;  %v4456_v7 = vadd.f32 %v10627_v58, %v4420_v15  ;;  %v4419_v13 = vmul.f32 %v10626_v53, %v4382_v41  ;;  %7468 = vmatpush3.msra.mxu0 %v10637_v30  ;;  %v10642_v9 = vld [vmem:[#allocation31_spill] sm:$0xff] }
 0x337   : > { %v4612_v28 = vmul.f32 0.16666667, %v4580_v34  ;;  %v4579_v37 = vmul.f32 %v4547_v10, %v4451_v27  ;;  %v4385_v44 = vadd.f32 %v7339_v55, %v9868_v2  ;;  %v4639_v22 = vadd.f32 %v4607_v50, %v10638_v32  ;;  %v7342_v24 = vpop.f32.mrf.mxu1 }
 0x338   : > { %v4550_v56 = vmin.f32 %v4518_v51, 6.0  ;;  %v4549_v20 = vmin.f32 %v4517_v40, 6.0  ;;  %v4488_v59 = vadd.f32 3.0, %v4456_v7  ;;  %v4455_v18 = vadd.f32 %v10627_v58, %v4419_v13 }
 0x339   : > { %v9947_v46 = vadd.f32 %v7316_v35, %v10639_v48  ;;  %v4642_v11 = vadd.f32 %v4610_v52, %v10640_v16  ;;  %v4422_v49 = vmul.f32 %v10626_v53, %v4385_v44  ;;  %7372 = vmatprep.mubr.msk.f32.mxu0 %vm1402_vm0, %v4639_v22  ;;  %v4384_v27 = vadd.f32 %v4273_v38, %v9870_v43  ;;  %v4283_v2 = vpop.f32.mrf.mxu1 }
 0x33a   : > { %v4644_v47 = vadd.f32 %v4612_v28, %v10641_v61  ;;  %v4582_v31 = vmul.f32 %v4550_v56, %v4454_v21  ;;  %v4520_v25 = vmax.f32 %v4488_v59, 0.0  ;;  %v4487_v6 = vadd.f32 3.0, %v4455_v18  ;;  %7373 = vmatmul.mubr.msk.f32.gmra.mxu0 %vm1402_vm0, %v4640_v54 }
 0x33b   : > { %v4458_v50 = vadd.f32 %v10627_v58, %v4422_v49  ;;  %v4421_v45 = vmul.f32 %v10626_v53, %v4384_v27  ;;  %v4387_v14 = vadd.f32 %v7342_v24, %v9872_v63  ;;  %v4641_v55 = vadd.f32 %v4609_v60, %v10642_v9  ;;  %v7345_v19 = vpop.f32.mrf.mxu1 }
 0x33c   : > { %v4611_v36 = vmul.f32 0.16666667, %v4579_v37  ;;  %v4581_v15 = vmul.f32 %v4549_v20, %v4453_v12  ;;  %v4552_v43 = vmin.f32 %v4520_v25, 6.0  ;;  %v4519_v41 = vmax.f32 %v4487_v6, 0.0 }
 0x33d   : > { %v4490_v52 = vadd.f32 3.0, %v4458_v50  ;;  %v4457_v21 = vadd.f32 %v10627_v58, %v4421_v45  ;;  %v4424_v34 = vmul.f32 %v10626_v53, %v4387_v14  ;;  %7375 = vmatprep.mubr.msk.f32.mxu0 %vm1402_vm0, %v4641_v55  ;;  %v4386_v54 = vadd.f32 %v4283_v2, %v9876_v42  ;;  %v4293_v10 = vpop.f32.mrf.mxu1  ;;  %v10643_v42 = vld [vmem:[#allocation36_spill] sm:$0xff]  ;;  %v10645_v45 = vld [vmem:[#allocation41_spill] sm:$0xff] }
 0x33e   : > { %v4614_v38 = vmul.f32 0.16666667, %v4582_v31  ;;  %v4584_v35 = vmul.f32 %v4552_v43, %v4456_v7  ;;  %v4551_v63 = vmin.f32 %v4519_v41, 6.0  ;;  %7376 = vmatmul.mubr.msk.f32.gmra.mxu0 %vm1402_vm0, %v4642_v11  ;;  %v4389_v60 = vadd.f32 %v7345_v19, %v9878_v4  ;;  %v10644_v4 = vld [vmem:[#allocation38_spill] sm:$0xff]  ;;  %v10646_v41 = vld [vmem:[#allocation47_spill] sm:$0xff] }
 0x33f   : > { %v4522_v12 = vmax.f32 %v4490_v52, 0.0  ;;  %v4489_v51 = vadd.f32 3.0, %v4457_v21  ;;  %v4460_v40 = vadd.f32 %v10627_v58, %v4424_v34  ;;  %v4423_v13 = vmul.f32 %v10626_v53, %v4386_v54  ;;  %v7348_v30 = vpop.f32.mrf.mxu1 }
 0x340   : > { %v4613_v28 = vmul.f32 0.16666667, %v4581_v15  ;;  %v4583_v37 = vmul.f32 %v4551_v63, %v4455_v18  ;;  %v4426_v44 = vmul.f32 %v10626_v53, %v4389_v60  ;;  %v4643_v32 = vadd.f32 %v4611_v36, %v10643_v42  ;;  %v10648_v42 = vld [vmem:[#allocation56_spill] sm:$0xff] }
 0x341   : > { %v4554_v22 = vmin.f32 %v4522_v12, 6.0  ;;  %v4521_v7 = vmax.f32 %v4489_v51, 0.0  ;;  %v4492_v24 = vadd.f32 3.0, %v4460_v40  ;;  %v4459_v56 = vadd.f32 %v10627_v58, %v4423_v13  ;;  %v4303_v20 = vpop.f32.mrf.mxu1  ;;  %v10647_v13 = vld [vmem:[#allocation51_spill] sm:$0xff] }
 0x342   : > { %v4646_v59 = vadd.f32 %v4614_v38, %v10644_v4  ;;  %v4616_v48 = vmul.f32 0.16666667, %v4584_v35  ;;  %v4462_v16 = vadd.f32 %v10627_v58, %v4426_v44  ;;  %7378 = vmatprep.mubr.msk.f32.mxu0 %vm1402_vm0, %v4643_v32  ;;  %v4388_v11 = vadd.f32 %v4293_v10, %v9880_v1  ;;  %v10649_v4 = vld [vmem:[#allocation64_spill] sm:$0xff] }
 0x343   : > { %v4586_v18 = vmul.f32 %v4554_v22, %v4458_v50  ;;  %v4553_v49 = vmin.f32 %v4521_v7, 6.0  ;;  %v4524_v27 = vmax.f32 %v4492_v24, 0.0  ;;  %v4491_v2 = vadd.f32 3.0, %v4459_v56  ;;  %7379 = vmatmul.mubr.msk.f32.gmra.mxu0 %vm1402_vm0, %v4644_v47  ;;  %v7351_v61 = vpop.f32.mrf.mxu1 }
 0x344   : > { %v4494_v31 = vadd.f32 3.0, %v4462_v16  ;;  %v4425_v25 = vmul.f32 %v10626_v53, %v4388_v11  ;;  %v4391_v6 = vadd.f32 %v7348_v30, %v9882_v62  ;;  %v4645_v14 = vadd.f32 %v4613_v28, %v10645_v45 }
 0x345   : > { %v4615_v9 = vmul.f32 0.16666667, %v4583_v37  ;;  %v4585_v55 = vmul.f32 %v4553_v49, %v4457_v21  ;;  %v4556_v19 = vmin.f32 %v4524_v27, 6.0  ;;  %v4523_v36 = vmax.f32 %v4491_v2, 0.0  ;;  %v4313_v15 = vpop.f32.mrf.mxu1  ;;  %v10650_v49 = vld [vmem:[#allocation60_spill] sm:$0xff] }
 0x346   : > { %v4526_v1 = vmax.f32 %v4494_v31, 0.0  ;;  %v4461_v50 = vadd.f32 %v10627_v58, %v4425_v25  ;;  %v4428_v43 = vmul.f32 %v10626_v53, %v4391_v6  ;;  %7381 = vmatprep.mubr.msk.f32.mxu0 %vm1402_vm0, %v4645_v14  ;;  %v4390_v47 = vadd.f32 %v4303_v20, %v9886_v17 }
 0x347   : > { %v4648_v52 = vadd.f32 %v4616_v48, %v10646_v41  ;;  %v4618_v34 = vmul.f32 0.16666667, %v4586_v18  ;;  %v4588_v62 = vmul.f32 %v4556_v19, %v4460_v40  ;;  %v4555_v54 = vmin.f32 %v4523_v36, 6.0  ;;  %7382 = vmatmul.mubr.msk.f32.gmra.mxu0 %vm1402_vm0, %v4646_v59  ;;  %v7354_v21 = vpop.f32.mrf.mxu1 }
 0x348   : > { %v4558_v10 = vmin.f32 %v4526_v1, 6.0  ;;  %v4493_v38 = vadd.f32 3.0, %v4461_v50  ;;  %v4464_v35 = vadd.f32 %v10627_v58, %v4428_v43  ;;  %v4427_v63 = vmul.f32 %v10626_v53, %v4390_v47 }
 0x349   : > { %v4617_v60 = vmul.f32 0.16666667, %v4585_v55  ;;  %v4620_v12 = vmul.f32 0.16666667, %v4588_v62  ;;  %v4393_v51 = vadd.f32 %v7351_v61, %v9888_v33  ;;  %v4647_v17 = vadd.f32 %v4615_v9, %v10647_v13  ;;  %v4323_v30 = vpop.f32.mrf.mxu1 }
 0x34a   : > { %v4587_v28 = vmul.f32 %v4555_v54, %v4459_v56  ;;  %v4525_v37 = vmax.f32 %v4493_v38, 0.0  ;;  %v4496_v40 = vadd.f32 3.0, %v4464_v35  ;;  %v4463_v44 = vadd.f32 %v10627_v58, %v4427_v63 }
 0x34b   : > { %v4650_v32 = vadd.f32 %v4618_v34, %v10648_v42  ;;  %v4590_v22 = vmul.f32 %v4558_v10, %v4462_v16  ;;  %v4430_v7 = vmul.f32 %v10626_v53, %v4393_v51  ;;  %7384 = vmatprep.mubr.msk.f32.mxu0 %vm1402_vm0, %v4647_v17  ;;  %v4392_v24 = vadd.f32 %v4313_v15, %v9890_v29  ;;  %v7357_v20 = vpop.f32.mrf.mxu1 }
 0x34c   : > { %v4652_v33 = vadd.f32 %v4620_v12, %v10649_v4  ;;  %v4557_v59 = vmin.f32 %v4525_v37, 6.0  ;;  %v4528_v48 = vmax.f32 %v4496_v40, 0.0  ;;  %v4495_v11 = vadd.f32 3.0, %v4463_v44  ;;  %7385 = vmatmul.mubr.msk.f32.gmra.mxu0 %vm1402_vm0, %v4648_v52  ;;  %v4124_v40 = vpop.f32.mrf.mxu0 }
 0x34d   : > { %v4466_v56 = vadd.f32 %v10627_v58, %v4430_v7  ;;  %v4429_v18 = vmul.f32 %v10626_v53, %v4392_v24  ;;  %v4395_v16 = vadd.f32 %v7354_v21, %v9892_v39  ;;  %v4649_v27 = vadd.f32 %v4617_v60, %v10650_v49  ;;  %v4333_v2 = vpop.f32.mrf.mxu1 }
 0x34e   : > { %v4619_v61 = vmul.f32 0.16666667, %v4587_v28  ;;  %v4589_v31 = vmul.f32 %v4557_v59, %v4461_v50  ;;  %v4560_v29 = vmin.f32 %v4528_v48, 6.0  ;;  %v4527_v25 = vmax.f32 %v4495_v11, 0.0 }
 0x34f   : > { %v4498_v6 = vadd.f32 3.0, %v4466_v56  ;;  %v4465_v45 = vadd.f32 %v10627_v58, %v4429_v18  ;;  %v4432_v14 = vmul.f32 %v10626_v53, %v4395_v16  ;;  %7387 = vmatprep.mubr.msk.f32.mxu0 %vm1402_vm0, %v4649_v27  ;;  %v4394_v9 = vadd.f32 %v4323_v30, %v9897_v3  ;;  %v7360_v55 = vpop.f32.mrf.mxu1  ;;  %v10651_v3 = vld [vmem:[#allocation68_spill] sm:$0xff] }
 0x350   : > { %v4622_v19 = vmul.f32 0.16666667, %v4590_v22  ;;  %v4592_v36 = vmul.f32 %v4560_v29, %v4464_v35  ;;  %v4559_v39 = vmin.f32 %v4527_v25, 6.0  ;;  %7388 = vmatmul.mubr.msk.f32.gmra.mxu0 %vm1402_vm0, %v4650_v32  ;;  %v4397_v15 = vadd.f32 %v7357_v20, %v9900_v5  ;;  %v10652_v5 = vld [vmem:[#allocation22_spill] sm:$0xff]  ;;  %v10653_v22 = vld [vmem:[#allocation24_spill] sm:$0xff] }
 0x351   : > { %v4530_v1 = vmax.f32 %v4498_v6, 0.0  ;;  %v4497_v50 = vadd.f32 3.0, %v4465_v45  ;;  %v4468_v43 = vadd.f32 %v10627_v58, %v4432_v14  ;;  %v4431_v47 = vmul.f32 %v10626_v53, %v4394_v9  ;;  %v4343_v41 = vpop.f32.mrf.mxu1  ;;  %v10654_v18 = vld [vmem:[#allocation44_spill] sm:$0xff] }
 0x352   : > { %v4621_v52 = vmul.f32 0.16666667, %v4589_v31  ;;  %v4591_v34 = vmul.f32 %v4559_v39, %v4463_v44  ;;  %v4434_v62 = vmul.f32 %v10626_v53, %v4397_v15  ;;  %v4651_v54 = vadd.f32 %v4619_v61, %v10651_v3 }
 0x353   : > { %v4562_v21 = vmin.f32 %v4530_v1, 6.0  ;;  %v4529_v10 = vmax.f32 %v4497_v50, 0.0  ;;  %v4500_v38 = vadd.f32 3.0, %v4468_v43  ;;  %v4467_v35 = vadd.f32 %v10627_v58, %v4431_v47  ;;  %v7363_v63 = vpop.f32.mrf.mxu1  ;;  %v10657_v1 = vld [vmem:[#allocation30_spill] sm:$0xff] }
 0x354   : > { %v4654_v60 = vadd.f32 %v4622_v19, %v10652_v5  ;;  %v4624_v12 = vmul.f32 0.16666667, %v4592_v36  ;;  %v4470_v51 = vadd.f32 %v10627_v58, %v4434_v62  ;;  %7390 = vmatprep.mubr.msk.f32.mxu0 %vm1402_vm0, %v4651_v54  ;;  %v4396_v13 = vadd.f32 %v4333_v2, %v9902_v26  ;;  %v10655_v2 = vld [vmem:[#allocation26_spill] sm:$0xff] }
 0x355   : > { %v4594_v17 = vmul.f32 %v4562_v21, %v4466_v56  ;;  %v4561_v30 = vmin.f32 %v4529_v10, 6.0  ;;  %v4532_v28 = vmax.f32 %v4500_v38, 0.0  ;;  %v4499_v37 = vadd.f32 3.0, %v4467_v35  ;;  %7391 = vmatmul.mubr.msk.f32.gmra.mxu0 %vm1402_vm0, %v4652_v33  ;;  %v4353_v24 = vpop.f32.mrf.mxu1  ;;  %v10658_v38 = vld [vmem:[#allocation32_spill] sm:$0xff] }
 0x356   : > { %v4502_v44 = vadd.f32 3.0, %v4470_v51  ;;  %v4433_v42 = vmul.f32 %v10626_v53, %v4396_v13  ;;  %v4399_v32 = vadd.f32 %v7360_v55, %v9906_v57  ;;  %v4653_v7 = vadd.f32 %v4621_v52, %v10653_v22 }
 0x357   : > { %v4623_v20 = vmul.f32 0.16666667, %v4591_v34  ;;  %v4593_v4 = vmul.f32 %v4561_v30, %v4465_v45  ;;  %v4564_v59 = vmin.f32 %v4532_v28, 6.0  ;;  %v4531_v48 = vmax.f32 %v4499_v37, 0.0  ;;  %v7366_v6 = vpop.f32.mrf.mxu1  ;;  %v10659_v28 = vld [vmem:[#allocation34_spill] sm:$0xff] }
 0x358   : > { %v4534_v26 = vmax.f32 %v4502_v44, 0.0  ;;  %v4469_v11 = vadd.f32 %v10627_v58, %v4433_v42  ;;  %v4436_v56 = vmul.f32 %v10626_v53, %v4399_v32  ;;  %7393 = vmatprep.mubr.msk.f32.mxu0 %vm1402_vm0, %v4653_v7  ;;  %v4398_v33 = vadd.f32 %v4343_v41, %v9909_v8  ;;  %v10656_v8 = vld [vmem:[#allocation28_spill] sm:$0xff] }
 0x359   : > { %v4125_v16 = vadd.f32 %v4124_v40, %v10654_v18  ;;  %v4626_v49 = vmul.f32 0.16666667, %v4594_v17  ;;  %v4596_v57 = vmul.f32 %v4564_v59, %v4468_v43  ;;  %v4563_v27 = vmin.f32 %v4531_v48, 6.0  ;;  %7394 = vmatmul.mubr.msk.f32.gmra.mxu0 %vm1402_vm0, %v4654_v60  ;;  %v4363_v3 = vpop.f32.mrf.mxu1  ;;  %v10661_v59 = vld [vmem:[#allocation43_spill] sm:$0xff] }
 0x35a   : > { %v4656_v61 = vadd.f32 %v4624_v12, %v10655_v2  ;;  %v4501_v31 = vadd.f32 3.0, %v4469_v11  ;;  %v4472_v29 = vadd.f32 %v10627_v58, %v4436_v56  ;;  %v4435_v25 = vmul.f32 %v10626_v53, %v4398_v33 }
 0x35b   : > { %v4625_v45 = vmul.f32 0.16666667, %v4593_v4  ;;  %v4595_v14 = vmul.f32 %v4563_v27, %v4467_v35  ;;  %v4401_v9 = vadd.f32 %v7363_v63, %v9913_v23  ;;  %v4655_v55 = vadd.f32 %v4623_v20, %v10656_v8 }
 0x35c   : > { %v4566_v19 = vmin.f32 %v4534_v26, 6.0  ;;  %v4533_v36 = vmax.f32 %v4501_v31, 0.0  ;;  %v4504_v39 = vadd.f32 3.0, %v4472_v29  ;;  %v4471_v15 = vadd.f32 %v10627_v58, %v4435_v25  ;;  %v10663_v31 = vld [vmem:[#allocation52_spill] sm:$0xff] }
 0x35d   : > { %v4658_v50 = vadd.f32 %v4626_v49, %v10657_v1  ;;  %v4628_v43 = vmul.f32 0.16666667, %v4596_v57  ;;  %v4438_v47 = vmul.f32 %v10626_v53, %v4401_v9  ;;  %7396 = vmatprep.mubr.msk.f32.mxu0 %vm1402_vm0, %v4655_v55  ;;  %v4400_v41 = vadd.f32 %v4353_v24, %v9918_v0  ;;  %v10664_v9 = vld [vmem:[#allocation48_spill] sm:$0xff] }
 0x35e   : > { %v4627_v52 = vmul.f32 0.16666667, %v4595_v14  ;;  %v4565_v34 = vmin.f32 %v4533_v36, 6.0  ;;  %v4536_v62 = vmax.f32 %v4504_v39, 0.0  ;;  %v4503_v23 = vadd.f32 3.0, %v4471_v15  ;;  %7397 = vmatmul.mubr.msk.f32.gmra.mxu0 %vm1402_vm0, %v4656_v61  ;;  %v10665_v39 = vld [vmem:[#allocation62_spill] sm:$0xff] }
 0x35f   : > { %v4474_v54 = vadd.f32 %v10627_v58, %v4438_v47  ;;  %v4437_v21 = vmul.f32 %v10626_v53, %v4400_v41  ;;  %v4403_v10 = vadd.f32 %v7366_v6, %v9947_v46  ;;  %v4657_v35 = vadd.f32 %v4625_v45, %v10658_v38  ;;  %v10660_v46 = vld [vmem:[#allocation37_spill] sm:$0xff] }
 0x360   : > { %v4598_v63 = vmul.f32 %v4566_v19, %v4470_v51  ;;  %v4597_v5 = vmul.f32 %v4565_v34, %v4469_v11  ;;  %v4568_v60 = vmin.f32 %v4536_v62, 6.0  ;;  %v4535_v12 = vmax.f32 %v4503_v23, 0.0  ;;  %v10667_v41 = vld [vmem:[#allocation69_spill] sm:$0xff]  ;;  %v10668_v34 = vld [vmem:[#allocation66_spill] sm:$0xff] }
 0x361   : > { %v4506_v0 = vadd.f32 3.0, %v4474_v54  ;;  %v4473_v13 = vadd.f32 %v10627_v58, %v4437_v21  ;;  %v4440_v17 = vmul.f32 %v10626_v53, %v4403_v10  ;;  %7399 = vmatprep.mubr.msk.f32.mxu0 %vm1402_vm0, %v4657_v35  ;;  %v4402_v30 = vadd.f32 %v4363_v3, %v4125_v16  ;;  %v4991_v23 = vld [vmem:[%s10385_s13] sm:$0x3]  ;;  %v10669_v3 = vld [vmem:[#allocation19_spill] sm:$0xff]  ;;  %v10670_v21 = vld [vmem:[#allocation20_spill] sm:$0xff] }
 0x362   : > { %v4660_v37 = vadd.f32 %v4628_v43, %v10659_v28  ;;  %v4629_v40 = vmul.f32 0.16666667, %v4597_v5  ;;  %v4567_v44 = vmin.f32 %v4535_v12, 6.0  ;;  %7400 = vmatmul.mubr.msk.f32.gmra.mxu0 %vm1402_vm0, %v4658_v50  ;;  %v4659_v42 = vadd.f32 %v4627_v52, %v10660_v46  ;;  %v10666_v50 = vld [vmem:[#allocation57_spill] sm:$0xff] }
 0x363   : > { %v4538_v51 = vmax.f32 %v4506_v0, 0.0  ;;  %v4505_v32 = vadd.f32 3.0, %v4473_v13  ;;  %v4476_v22 = vadd.f32 %v10627_v58, %v4440_v17  ;;  %v4439_v7 = vmul.f32 %v10626_v53, %v4402_v30  ;;  %v10662_v53 = vld [vmem:[#allocation39_spill] sm:$0xff] }
 0x364   : > { %v4630_v24 = vmul.f32 0.16666667, %v4598_v63  ;;  %v4600_v20 = vmul.f32 %v4568_v60, %v4472_v29  ;;  %v4599_v4 = vmul.f32 %v4567_v44, %v4471_v15  ;;  %7402 = vmatprep.mubr.msk.f32.mxu0 %vm1402_vm0, %v4659_v42  ;;  %v4661_v48 = vadd.f32 %v4629_v40, %v10661_v59 }
 0x365   : > { %v4570_v26 = vmin.f32 %v4538_v51, 6.0  ;;  %v4537_v11 = vmax.f32 %v4505_v32, 0.0  ;;  %v4508_v56 = vadd.f32 3.0, %v4476_v22  ;;  %v4475_v33 = vadd.f32 %v10627_v58, %v4439_v7 }
 0x366   : > { %v4631_v18 = vmul.f32 0.16666667, %v4599_v4  ;;  %7403 = vmatmul.mubr.msk.f32.gmra.mxu0 %vm1402_vm0, %v4660_v37  ;;  %v4662_v27 = vadd.f32 %v4630_v24, %v10662_v53  ;;  %v4632_v2 = vmul.f32 0.16666667, %v4600_v20  ;;  %v10073_v10 = vrot.slane %v4991_v23, %v10670_v21 }
 0x367   : > { %v4569_v16 = vmin.f32 %v4537_v11, 6.0  ;;  %v4540_v49 = vmax.f32 %v4508_v56, 0.0  ;;  %v4507_v57 = vadd.f32 3.0, %v4475_v33  ;;  %7405 = vmatprep.mubr.msk.f32.mxu0 %vm1402_vm0, %v4661_v48  ;;  %v4602_v61 = vmul.f32 %v4570_v26, %v4474_v54 }
 0x368   : > { %v4663_v29 = vadd.f32 %v4631_v18, %v10663_v31  ;;  %v4664_v8 = vadd.f32 %v4632_v2, %v10664_v9  ;;  %v10070_v54 = vrot.slane %v4991_v23, %v10669_v3 }
 0x369   : > { %v4601_v25 = vmul.f32 %v4569_v16, %v4473_v13  ;;  %v4572_v6 = vmin.f32 %v4540_v49, 6.0  ;;  %v4539_v45 = vmax.f32 %v4507_v57, 0.0  ;;  %v4634_v55 = vmul.f32 0.16666667, %v4602_v61 }
 0x36a   : > { %7406 = vmatmul.mubr.msk.f32.gmra.mxu0 %vm1402_vm0, %v4662_v27 }
 0x36b   : > { %v4633_v58 = vmul.f32 0.16666667, %v4601_v25  ;;  %v4571_v14 = vmin.f32 %v4539_v45, 6.0  ;;  %7408 = vmatprep.mubr.msk.f32.mxu0 %vm1402_vm0, %v4663_v29  ;;  %v4604_v19 = vmul.f32 %v4572_v6, %v4476_v22  ;;  %v4666_v43 = vadd.f32 %v4634_v55, %v10666_v50 }
 0x36d   : > { %v4603_v36 = vmul.f32 %v4571_v14, %v4475_v33  ;;  %v4665_v15 = vadd.f32 %v4633_v58, %v10665_v39  ;;  %v4636_v47 = vmul.f32 0.16666667, %v4604_v19 }
 0x36e   : > { %7409 = vmatmul.mubr.msk.f32.gmra.mxu0 %vm1402_vm0, %v4664_v8 }
 0x36f   : > { %v4635_v1 = vmul.f32 0.16666667, %v4603_v36  ;;  %7411 = vmatprep.mubr.msk.f32.mxu0 %vm1402_vm0, %v4665_v15  ;;  %v4668_v62 = vadd.f32 %v4636_v47, %v10668_v34 }
 0x371   : > { %v4667_v52 = vadd.f32 %v4635_v1, %v10667_v41 }
 0x372   : > { %7412 = vmatmul.mubr.msk.f32.gmra.mxu0 %vm1402_vm0, %v4666_v43 }
 0x373   : > { %7414 = vmatprep.mubr.msk.f32.mxu0 %vm1402_vm0, %v4667_v52 }
 0x376   : > { %7415 = vmatmul.mubr.msk.f32.gmra.mxu0 %vm1402_vm0, %v4668_v62 }
 0x3f5   : > { %v7371_v38 = vpop.f32.mrf.mxu0 }
 0x3f6   : > { %v4997_v35 = vmul.f32 %v7371_v38, %v10070_v54 }
 0x3f7   : > { %v4832_v63 = vpop.f32.mrf.mxu0 }
 0x3f8   : > { %v5033_v5 = vadd.f32 %v10073_v10, %v4997_v35  ;;  %v4996_v60 = vmul.f32 %v10070_v54, %v4832_v63 }
 0x3fa   : > { %v5032_v12 = vadd.f32 %v10073_v10, %v4996_v60  ;;  %v7374_v0 = vpop.f32.mrf.mxu0  ;;  %v5065_v13 = vmul.f32 0.1, %v5033_v5 }
 0x3fb   : > { %v4999_v17 = vmul.f32 %v7374_v0, %v10070_v54 }
 0x3fc   : > { %v5064_v30 = vmul.f32 0.1, %v5032_v12  ;;  %v4842_v28 = vpop.f32.mrf.mxu0  ;;  %v5097_v42 = vmax.f32 %v5033_v5, %v5065_v13 }
 0x3fd   : > { %v5035_v37 = vadd.f32 %v10073_v10, %v4999_v17  ;;  %v4998_v40 = vmul.f32 %v10070_v54, %v4842_v28 }
 0x3fe   : > { %v5096_v44 = vmax.f32 %v5032_v12, %v5064_v30  ;;  %v7377_v46 = vpop.f32.mrf.mxu0 }
 0x3ff   : > { %v5034_v51 = vadd.f32 %v10073_v10, %v4998_v40  ;;  %v5001_v32 = vmul.f32 %v7377_v46, %v10070_v54  ;;  %v5067_v22 = vmul.f32 0.1, %v5035_v37 }
 0x400   : > { %v4852_v7 = vpop.f32.mrf.mxu0  ;;  %7469 = vmatprep.mubr.msk.f32.mxu0 %vm1402_vm0, %v5096_v44 }
 0x401   : > { %v5066_v24 = vmul.f32 0.1, %v5034_v51  ;;  %v5037_v20 = vadd.f32 %v10073_v10, %v5001_v32  ;;  %v5000_v4 = vmul.f32 %v10070_v54, %v4852_v7  ;;  %7470 = vmatmul.mubr.msk.f32.vlgmr.msra.gmra.mxu0 %vm1402_vm0, %v5097_v42  ;;  %v5099_v11 = vmax.f32 %v5035_v37, %v5067_v22 }
 0x403   : > { %v5098_v59 = vmax.f32 %v5034_v51, %v5066_v24  ;;  %v5036_v48 = vadd.f32 %v10073_v10, %v5000_v4  ;;  %v7380_v26 = vpop.f32.mrf.mxu0  ;;  %v5069_v56 = vmul.f32 0.1, %v5037_v20 }
 0x404   : > { %v5003_v33 = vmul.f32 %v7380_v26, %v10070_v54 }
 0x405   : > { %v5068_v18 = vmul.f32 0.1, %v5036_v48  ;;  %v4862_v16 = vpop.f32.mrf.mxu0  ;;  %7472 = vmatprep.mubr.msk.f32.mxu0 %vm1402_vm0, %v5098_v59  ;;  %v5101_v2 = vmax.f32 %v5037_v20, %v5069_v56 }
 0x406   : > { %v5039_v49 = vadd.f32 %v10073_v10, %v5003_v33  ;;  %v5002_v57 = vmul.f32 %v10070_v54, %v4862_v16  ;;  %7473 = vmatmul.mubr.msk.f32.gmra.mxu0 %vm1402_vm0, %v5099_v11 }
 0x407   : > { %v5100_v53 = vmax.f32 %v5036_v48, %v5068_v18  ;;  %v7383_v27 = vpop.f32.mrf.mxu0 }
 0x408   : > { %v5038_v61 = vadd.f32 %v10073_v10, %v5002_v57  ;;  %v5005_v31 = vmul.f32 %v7383_v27, %v10070_v54  ;;  %v5071_v29 = vmul.f32 0.1, %v5039_v49 }
 0x409   : > { %v4872_v25 = vpop.f32.mrf.mxu0  ;;  %7475 = vmatprep.mubr.msk.f32.mxu0 %vm1402_vm0, %v5100_v53 }
 0x40a   : > { %v5070_v6 = vmul.f32 0.1, %v5038_v61  ;;  %v5041_v45 = vadd.f32 %v10073_v10, %v5005_v31  ;;  %v5004_v58 = vmul.f32 %v10070_v54, %v4872_v25  ;;  %7476 = vmatmul.mubr.msk.f32.gmra.mxu0 %vm1402_vm0, %v5101_v2  ;;  %v5103_v55 = vmax.f32 %v5039_v49, %v5071_v29 }
 0x40c   : > { %v5102_v14 = vmax.f32 %v5038_v61, %v5070_v6  ;;  %v5040_v9 = vadd.f32 %v10073_v10, %v5004_v58  ;;  %v7386_v8 = vpop.f32.mrf.mxu0  ;;  %v5073_v19 = vmul.f32 0.1, %v5041_v45 }
 0x40d   : > { %v5007_v36 = vmul.f32 %v7386_v8, %v10070_v54 }
 0x40e   : > { %v5072_v39 = vmul.f32 0.1, %v5040_v9  ;;  %v4882_v15 = vpop.f32.mrf.mxu0  ;;  %7478 = vmatprep.mubr.msk.f32.mxu0 %vm1402_vm0, %v5102_v14  ;;  %v5105_v41 = vmax.f32 %v5041_v45, %v5073_v19 }
 0x40f   : > { %v5043_v1 = vadd.f32 %v10073_v10, %v5007_v36  ;;  %v5006_v50 = vmul.f32 %v10070_v54, %v4882_v15  ;;  %7479 = vmatmul.mubr.msk.f32.gmra.mxu0 %vm1402_vm0, %v5103_v55 }
 0x410   : > { %v5104_v43 = vmax.f32 %v5040_v9, %v5072_v39  ;;  %v7389_v47 = vpop.f32.mrf.mxu0 }
 0x411   : > { %v5042_v52 = vadd.f32 %v10073_v10, %v5006_v50  ;;  %v5009_v34 = vmul.f32 %v7389_v47, %v10070_v54  ;;  %v5075_v62 = vmul.f32 0.1, %v5043_v1 }
 0x412   : > { %v4892_v23 = vpop.f32.mrf.mxu0  ;;  %7481 = vmatprep.mubr.msk.f32.mxu0 %vm1402_vm0, %v5104_v43 }
 0x413   : > { %v5074_v38 = vmul.f32 0.1, %v5042_v52  ;;  %v5045_v35 = vadd.f32 %v10073_v10, %v5009_v34  ;;  %v5008_v63 = vmul.f32 %v10070_v54, %v4892_v23  ;;  %7482 = vmatmul.mubr.msk.f32.gmra.mxu0 %vm1402_vm0, %v5105_v41  ;;  %v5107_v0 = vmax.f32 %v5043_v1, %v5075_v62 }
 0x415   : > { %v5106_v5 = vmax.f32 %v5042_v52, %v5074_v38  ;;  %v5044_v60 = vadd.f32 %v10073_v10, %v5008_v63  ;;  %v7392_v12 = vpop.f32.mrf.mxu0  ;;  %v5077_v13 = vmul.f32 0.1, %v5045_v35 }
 0x416   : > { %v5011_v17 = vmul.f32 %v7392_v12, %v10070_v54 }
 0x417   : > { %v5076_v30 = vmul.f32 0.1, %v5044_v60  ;;  %v4902_v28 = vpop.f32.mrf.mxu0  ;;  %7484 = vmatprep.mubr.msk.f32.mxu0 %vm1402_vm0, %v5106_v5  ;;  %v5109_v42 = vmax.f32 %v5045_v35, %v5077_v13 }
 0x418   : > { %v5047_v37 = vadd.f32 %v10073_v10, %v5011_v17  ;;  %v5010_v40 = vmul.f32 %v10070_v54, %v4902_v28  ;;  %7485 = vmatmul.mubr.msk.f32.gmra.mxu0 %vm1402_vm0, %v5107_v0 }
 0x419   : > { %v5108_v44 = vmax.f32 %v5044_v60, %v5076_v30  ;;  %v7395_v46 = vpop.f32.mrf.mxu0 }
 0x41a   : > { %v5046_v51 = vadd.f32 %v10073_v10, %v5010_v40  ;;  %v5013_v32 = vmul.f32 %v7395_v46, %v10070_v54  ;;  %v5079_v22 = vmul.f32 0.1, %v5047_v37 }
 0x41b   : > { %v4912_v7 = vpop.f32.mrf.mxu0  ;;  %7487 = vmatprep.mubr.msk.f32.mxu0 %vm1402_vm0, %v5108_v44 }
 0x41c   : > { %v5078_v24 = vmul.f32 0.1, %v5046_v51  ;;  %v5049_v20 = vadd.f32 %v10073_v10, %v5013_v32  ;;  %v5012_v4 = vmul.f32 %v10070_v54, %v4912_v7  ;;  %7488 = vmatmul.mubr.msk.f32.gmra.mxu0 %vm1402_vm0, %v5109_v42  ;;  %v5111_v11 = vmax.f32 %v5047_v37, %v5079_v22 }
 0x41e   : > { %v5110_v59 = vmax.f32 %v5046_v51, %v5078_v24  ;;  %v5048_v48 = vadd.f32 %v10073_v10, %v5012_v4  ;;  %v7398_v26 = vpop.f32.mrf.mxu0  ;;  %v5081_v56 = vmul.f32 0.1, %v5049_v20 }
 0x41f   : > { %v5015_v33 = vmul.f32 %v7398_v26, %v10070_v54 }
 0x420   : > { %v5080_v18 = vmul.f32 0.1, %v5048_v48  ;;  %v4922_v16 = vpop.f32.mrf.mxu0  ;;  %7490 = vmatprep.mubr.msk.f32.mxu0 %vm1402_vm0, %v5110_v59  ;;  %v5113_v2 = vmax.f32 %v5049_v20, %v5081_v56 }
 0x421   : > { %v5051_v49 = vadd.f32 %v10073_v10, %v5015_v33  ;;  %v5014_v57 = vmul.f32 %v10070_v54, %v4922_v16  ;;  %7491 = vmatmul.mubr.msk.f32.gmra.mxu0 %vm1402_vm0, %v5111_v11 }
 0x422   : > { %v5112_v53 = vmax.f32 %v5048_v48, %v5080_v18  ;;  %v7401_v27 = vpop.f32.mrf.mxu0 }
 0x423   : > { %v5050_v61 = vadd.f32 %v10073_v10, %v5014_v57  ;;  %v5017_v31 = vmul.f32 %v7401_v27, %v10070_v54  ;;  %v5083_v29 = vmul.f32 0.1, %v5051_v49 }
 0x424   : > { %v4932_v25 = vpop.f32.mrf.mxu0  ;;  %7493 = vmatprep.mubr.msk.f32.mxu0 %vm1402_vm0, %v5112_v53 }
 0x425   : > { %v5082_v6 = vmul.f32 0.1, %v5050_v61  ;;  %v5053_v45 = vadd.f32 %v10073_v10, %v5017_v31  ;;  %v5016_v58 = vmul.f32 %v10070_v54, %v4932_v25  ;;  %7494 = vmatmul.mubr.msk.f32.gmra.mxu0 %vm1402_vm0, %v5113_v2  ;;  %v5115_v19 = vmax.f32 %v5051_v49, %v5083_v29 }
 0x426   : > { %v7404_v14 = vpop.f32.mrf.mxu0 }
 0x427   : > { %v5114_v9 = vmax.f32 %v5050_v61, %v5082_v6  ;;  %v5052_v8 = vadd.f32 %v10073_v10, %v5016_v58  ;;  %v5019_v55 = vmul.f32 %v7404_v14, %v10070_v54  ;;  %v5085_v36 = vmul.f32 0.1, %v5053_v45 }
 0x428   : > { %v4942_v39 = vpop.f32.mrf.mxu0 }
 0x429   : > { %v5084_v15 = vmul.f32 0.1, %v5052_v8  ;;  %v5055_v1 = vadd.f32 %v10073_v10, %v5019_v55  ;;  %v5018_v50 = vmul.f32 %v10070_v54, %v4942_v39  ;;  %7496 = vmatprep.mubr.msk.f32.mxu0 %vm1402_vm0, %v5114_v9  ;;  %v5117_v34 = vmax.f32 %v5053_v45, %v5085_v36 }
 0x42a   : > { %v7407_v43 = vpop.f32.mrf.mxu0  ;;  %7497 = vmatmul.mubr.msk.f32.gmra.mxu0 %vm1402_vm0, %v5115_v19 }
 0x42b   : > { %v5116_v47 = vmax.f32 %v5052_v8, %v5084_v15  ;;  %v5054_v41 = vadd.f32 %v10073_v10, %v5018_v50  ;;  %v5021_v52 = vmul.f32 %v7407_v43, %v10070_v54  ;;  %v5087_v62 = vmul.f32 0.1, %v5055_v1  ;;  %v5909_v50 = vld [vmem:[%s10387_s15] sm:$0x3] }
 0x42c   : > { %v4952_v23 = vpop.f32.mrf.mxu0  ;;  %v10187_v43 = vrot.slane %v5909_v50, %v10669_v3 }
 0x42d   : > { %v5086_v38 = vmul.f32 0.1, %v5054_v41  ;;  %v5057_v35 = vadd.f32 %v10073_v10, %v5021_v52  ;;  %v5020_v63 = vmul.f32 %v10070_v54, %v4952_v23  ;;  %7499 = vmatprep.mubr.msk.f32.mxu0 %vm1402_vm0, %v5116_v47  ;;  %v5119_v13 = vmax.f32 %v5055_v1, %v5087_v62 }
 0x42e   : > { %v7410_v5 = vpop.f32.mrf.mxu0  ;;  %7500 = vmatmul.mubr.msk.f32.gmra.mxu0 %vm1402_vm0, %v5117_v34  ;;  %v10192_v34 = vrot.slane %v5909_v50, %v10670_v21 }
 0x42f   : > { %v5118_v60 = vmax.f32 %v5054_v41, %v5086_v38  ;;  %v5056_v12 = vadd.f32 %v10073_v10, %v5020_v63  ;;  %v5023_v0 = vmul.f32 %v7410_v5, %v10070_v54  ;;  %v5089_v17 = vmul.f32 0.1, %v5057_v35 }
 0x430   : > { %v4962_v30 = vpop.f32.mrf.mxu0 }
 0x431   : > { %v5088_v28 = vmul.f32 0.1, %v5056_v12  ;;  %v5059_v37 = vadd.f32 %v10073_v10, %v5023_v0  ;;  %v5022_v40 = vmul.f32 %v10070_v54, %v4962_v30  ;;  %7502 = vmatprep.mubr.msk.f32.mxu0 %vm1402_vm0, %v5118_v60  ;;  %v5121_v32 = vmax.f32 %v5057_v35, %v5089_v17 }
 0x432   : > { %v7413_v44 = vpop.f32.mrf.mxu0  ;;  %7503 = vmatmul.mubr.msk.f32.gmra.mxu0 %vm1402_vm0, %v5119_v13 }
 0x433   : > { %v5120_v46 = vmax.f32 %v5056_v12, %v5088_v28  ;;  %v5058_v42 = vadd.f32 %v10073_v10, %v5022_v40  ;;  %v5025_v51 = vmul.f32 %v7413_v44, %v10070_v54  ;;  %v5091_v22 = vmul.f32 0.1, %v5059_v37 }
 0x434   : > { %v4972_v7 = vpop.f32.mrf.mxu0 }
 0x435   : > { %v5090_v24 = vmul.f32 0.1, %v5058_v42  ;;  %v5061_v20 = vadd.f32 %v10073_v10, %v5025_v51  ;;  %v5024_v4 = vmul.f32 %v10070_v54, %v4972_v7  ;;  %7505 = vmatprep.mubr.msk.f32.mxu0 %vm1402_vm0, %v5120_v46  ;;  %v5123_v56 = vmax.f32 %v5059_v37, %v5091_v22 }
 0x436   : > { %v7416_v59 = vpop.f32.mrf.mxu0  ;;  %7506 = vmatmul.mubr.msk.f32.gmra.mxu0 %vm1402_vm0, %v5121_v32 }
 0x437   : > { %v5122_v48 = vmax.f32 %v5058_v42, %v5090_v24  ;;  %v5060_v26 = vadd.f32 %v10073_v10, %v5024_v4  ;;  %v5027_v11 = vmul.f32 %v7416_v59, %v10070_v54  ;;  %v5093_v33 = vmul.f32 0.1, %v5061_v20 }
 0x438   : > { %v4982_v18 = vpop.f32.mrf.mxu0 }
 0x439   : > { %v5092_v16 = vmul.f32 0.1, %v5060_v26  ;;  %v5063_v49 = vadd.f32 %v10073_v10, %v5027_v11  ;;  %v5026_v57 = vmul.f32 %v10070_v54, %v4982_v18  ;;  %7508 = vmatprep.mubr.msk.f32.mxu0 %vm1402_vm0, %v5122_v48  ;;  %v5125_v2 = vmax.f32 %v5061_v20, %v5093_v33  ;;  %v7421_v54 = vpop.f32.mrf.mxu1 }
 0x43a   : > { %7509 = vmatmul.mubr.msk.f32.gmra.mxu0 %vm1402_vm0, %v5123_v56 }
 0x43b   : > { %v5124_v53 = vmax.f32 %v5060_v26, %v5092_v16  ;;  %v5062_v27 = vadd.f32 %v10073_v10, %v5026_v57  ;;  %v5095_v61 = vmul.f32 0.1, %v5063_v49  ;;  %v5429_v6 = vpop.f32.mrf.mxu1 }
 0x43d   : > { %v5094_v31 = vmul.f32 0.1, %v5062_v27  ;;  %7511 = vmatprep.mubr.msk.f32.mxu0 %vm1402_vm0, %v5124_v53  ;;  %v5127_v25 = vmax.f32 %v5063_v49, %v5095_v61  ;;  %v7424_v45 = vpop.f32.mrf.mxu1 }
 0x43e   : > { %7512 = vmatmul.mubr.msk.f32.gmra.mxu0 %vm1402_vm0, %v5125_v2 }
 0x43f   : > { %v5126_v29 = vmax.f32 %v5062_v27, %v5094_v31  ;;  %v5439_v58 = vpop.f32.mrf.mxu1 }
 0x441   : > { %7514 = vmatprep.mubr.msk.f32.mxu0 %vm1402_vm0, %v5126_v29  ;;  %v7427_v14 = vpop.f32.mrf.mxu1 }
 0x442   : > { %7515 = vmatmul.mubr.msk.f32.gmra.mxu0 %vm1402_vm0, %v5127_v25 }
 0x443   : > { %v5449_v9 = vpop.f32.mrf.mxu1 }
 0x445   : > { %v7430_v10 = vpop.f32.mrf.mxu1 }
 0x447   : > { %v5459_v8 = vpop.f32.mrf.mxu1 }
 0x449   : > { %v10171_v55 = vpop.f32.mrf.mxu1 }
 0x44b   : > { %v10173_v19 = vpop.f32.mrf.mxu1 }
 0x44d   : > { %v10175_v36 = vpop.f32.mrf.mxu1 }
 0x44f   : > { %v10177_v39 = vpop.f32.mrf.mxu1 }
 0x451   : > { %v10179_v15 = vpop.f32.mrf.mxu1 }
 0x453   : > { %v10181_v1 = vpop.f32.mrf.mxu1 }
 0x455   : > { %v10189_v47 = vpop.f32.mrf.mxu1 }
 0x457   : > { %v10195_v35 = vpop.f32.mrf.mxu1 }
 0x459   : > { %v10200_v17 = vpop.f32.mrf.mxu1 }
 0x45b   : > { %v10205_v7 = vpop.f32.mrf.mxu1 }
 0x45d   : > { %v10218_v27 = vpop.f32.mrf.mxu1 }
 0x4c1   : > { %v7471_v41 = vpop.f32.mrf.mxu0 }
 0x4c2   : > { %v5756_v52 = vadd.f32 %v7471_v41, %v7421_v54 }
 0x4c3   : > { %v5750_v62 = vpop.f32.mrf.mxu0 }
 0x4c4   : > { %v5915_v23 = vmul.f32 %v10187_v43, %v5756_v52  ;;  %v5751_v38 = vadd.f32 %v5750_v62, %v5429_v6 }
 0x4c6   : > { %v5951_v63 = vadd.f32 %v10192_v34, %v5915_v23  ;;  %v5914_v5 = vmul.f32 %v10187_v43, %v5751_v38  ;;  %v7474_v60 = vpop.f32.mrf.mxu0  ;;  %v10229_v23 = vpop.f32.mrf.mxu1 }
 0x4c7   : > { %v5766_v3 = vadd.f32 %v7474_v60, %v7424_v45 }
 0x4c8   : > { %v5983_v12 = vadd.f32 3.0, %v5951_v63  ;;  %v5950_v0 = vadd.f32 %v10192_v34, %v5914_v5  ;;  %v5760_v13 = vpop.f32.mrf.mxu0 }
 0x4c9   : > { %v5917_v21 = vmul.f32 %v10187_v43, %v5766_v3  ;;  %v5761_v30 = vadd.f32 %v5760_v13, %v5439_v58 }
 0x4ca   : > { %v6015_v28 = vmax.f32 %v5983_v12, 0.0  ;;  %v5982_v37 = vadd.f32 3.0, %v5950_v0  ;;  %v7477_v40 = vpop.f32.mrf.mxu0 }
 0x4cb   : > { %v5953_v44 = vadd.f32 %v10192_v34, %v5917_v21  ;;  %v5916_v46 = vmul.f32 %v10187_v43, %v5761_v30  ;;  %v5776_v42 = vadd.f32 %v7477_v40, %v7427_v14 }
 0x4cc   : > { %v6047_v51 = vmin.f32 %v6015_v28, 6.0  ;;  %v6014_v32 = vmax.f32 %v5982_v37, 0.0  ;;  %v5770_v22 = vpop.f32.mrf.mxu0 }
 0x4cd   : > { %v5985_v24 = vadd.f32 3.0, %v5953_v44  ;;  %v5952_v20 = vadd.f32 %v10192_v34, %v5916_v46  ;;  %v5919_v4 = vmul.f32 %v10187_v43, %v5776_v42  ;;  %v5771_v59 = vadd.f32 %v5770_v22, %v5449_v9  ;;  %v10238_v42 = vpop.f32.mrf.mxu1 }
 0x4ce   : > { %v6079_v48 = vmul.f32 %v6047_v51, %v5951_v63  ;;  %v6046_v26 = vmin.f32 %v6014_v32, 6.0 }
 0x4cf   : > { %v6017_v11 = vmax.f32 %v5985_v24, 0.0  ;;  %v5984_v56 = vadd.f32 3.0, %v5952_v20  ;;  %v5955_v33 = vadd.f32 %v10192_v34, %v5919_v4  ;;  %v5918_v18 = vmul.f32 %v10187_v43, %v5771_v59  ;;  %v7480_v16 = vpop.f32.mrf.mxu0 }
 0x4d0   : > { %v6111_v49 = vmul.f32 0.16666667, %v6079_v48  ;;  %v6078_v57 = vmul.f32 %v6046_v26, %v5950_v0  ;;  %v5786_v53 = vadd.f32 %v7480_v16, %v7430_v10 }
 0x4d1   : > { %v6049_v2 = vmin.f32 %v6017_v11, 6.0  ;;  %v6016_v61 = vmax.f32 %v5984_v56, 0.0  ;;  %v5987_v31 = vadd.f32 3.0, %v5955_v33  ;;  %v5954_v29 = vadd.f32 %v10192_v34, %v5918_v18  ;;  %v5780_v25 = vpop.f32.mrf.mxu0 }
 0x4d2   : > { %6143 = vst.msk [vmem:[%s10214_s29 + $0x8] sm:$0xff] %vm620_vm1, %v6111_v49  ;;  %v6110_v54 = vmul.f32 0.16666667, %v6078_v57  ;;  %v5921_v6 = vmul.f32 %v10187_v43, %v5786_v53  ;;  %v5781_v45 = vadd.f32 %v5780_v25, %v5459_v8  ;;  %v10248_v49 = vpop.f32.mrf.mxu1 }
 0x4d3   : > { %v6081_v58 = vmul.f32 %v6049_v2, %v5953_v44  ;;  %v6048_v14 = vmin.f32 %v6016_v61, 6.0  ;;  %v6019_v9 = vmax.f32 %v5987_v31, 0.0  ;;  %v5986_v50 = vadd.f32 3.0, %v5954_v29  ;;  %v7483_v10 = vpop.f32.mrf.mxu0 }
 0x4d4   : > { %6142 = vst.msk [vmem:[%s10214_s29] sm:$0xff] %vm620_vm1, %v6110_v54  ;;  %v5957_v41 = vadd.f32 %v10192_v34, %v5921_v6  ;;  %v5920_v52 = vmul.f32 %v10187_v43, %v5781_v45  ;;  %v5796_v62 = vadd.f32 %v7483_v10, %v10171_v55 }
 0x4d5   : > { %v6113_v38 = vmul.f32 0.16666667, %v6081_v58  ;;  %v6080_v63 = vmul.f32 %v6048_v14, %v5952_v20  ;;  %v6051_v5 = vmin.f32 %v6019_v9, 6.0  ;;  %v6018_v8 = vmax.f32 %v5986_v50, 0.0  ;;  %v5790_v60 = vpop.f32.mrf.mxu0 }
 0x4d6   : > { %v5989_v3 = vadd.f32 3.0, %v5957_v41  ;;  %v5956_v12 = vadd.f32 %v10192_v34, %v5920_v52  ;;  %v5923_v0 = vmul.f32 %v10187_v43, %v5796_v62  ;;  %v5791_v13 = vadd.f32 %v5790_v60, %v10173_v19 }
 0x4d7   : > { %6145 = vst.msk [vmem:[%s10214_s29 + $0x18] sm:$0xff] %vm620_vm1, %v6113_v38  ;;  %v6112_v21 = vmul.f32 0.16666667, %v6080_v63  ;;  %v6083_v30 = vmul.f32 %v6051_v5, %v5955_v33  ;;  %v6050_v55 = vmin.f32 %v6018_v8, 6.0 }
 0x4d8   : > { %v6021_v28 = vmax.f32 %v5989_v3, 0.0  ;;  %v5988_v37 = vadd.f32 3.0, %v5956_v12  ;;  %v5959_v40 = vadd.f32 %v10192_v34, %v5923_v0  ;;  %v5922_v44 = vmul.f32 %v10187_v43, %v5791_v13  ;;  %v7486_v46 = vpop.f32.mrf.mxu0 }
 0x4d9   : > { %6144 = vst.msk [vmem:[%s10214_s29 + $0x10] sm:$0xff] %vm620_vm1, %v6112_v21  ;;  %v6115_v51 = vmul.f32 0.16666667, %v6083_v30  ;;  %v6082_v32 = vmul.f32 %v6050_v55, %v5954_v29  ;;  %v5806_v19 = vadd.f32 %v7486_v46, %v10175_v36 }
 0x4da   : > { %v6053_v22 = vmin.f32 %v6021_v28, 6.0  ;;  %v6020_v24 = vmax.f32 %v5988_v37, 0.0  ;;  %v5991_v20 = vadd.f32 3.0, %v5959_v40  ;;  %v5958_v4 = vadd.f32 %v10192_v34, %v5922_v44  ;;  %v5800_v59 = vpop.f32.mrf.mxu0 }
 0x4db   : > { %6147 = vst.msk [vmem:[%s10214_s29 + $0x28] sm:$0xff] %vm620_vm1, %v6115_v51  ;;  %v6114_v48 = vmul.f32 0.16666667, %v6082_v32  ;;  %v5925_v26 = vmul.f32 %v10187_v43, %v5806_v19  ;;  %v5801_v11 = vadd.f32 %v5800_v59, %v10177_v39 }
 0x4dc   : > { %v6085_v56 = vmul.f32 %v6053_v22, %v5957_v41  ;;  %v6052_v33 = vmin.f32 %v6020_v24, 6.0  ;;  %v6023_v18 = vmax.f32 %v5991_v20, 0.0  ;;  %v5990_v16 = vadd.f32 3.0, %v5958_v4  ;;  %v7489_v36 = vpop.f32.mrf.mxu0 }
 0x4dd   : > { %6146 = vst.msk [vmem:[%s10214_s29 + $0x20] sm:$0xff] %vm620_vm1, %v6114_v48  ;;  %v5961_v57 = vadd.f32 %v10192_v34, %v5925_v26  ;;  %v5924_v53 = vmul.f32 %v10187_v43, %v5801_v11  ;;  %v5816_v2 = vadd.f32 %v7489_v36, %v10179_v15  ;;  %v10260_v15 = vpop.f32.mrf.mxu1 }
 0x4de   : > { %v6117_v61 = vmul.f32 0.16666667, %v6085_v56  ;;  %v6084_v31 = vmul.f32 %v6052_v33, %v5956_v12  ;;  %v6055_v29 = vmin.f32 %v6023_v18, 6.0  ;;  %v6022_v39 = vmax.f32 %v5990_v16, 0.0  ;;  %v5810_v25 = vpop.f32.mrf.mxu0 }
 0x4df   : > { %v5993_v54 = vadd.f32 3.0, %v5961_v57  ;;  %v5960_v6 = vadd.f32 %v10192_v34, %v5924_v53  ;;  %v5927_v45 = vmul.f32 %v10187_v43, %v5816_v2  ;;  %v5811_v58 = vadd.f32 %v5810_v25, %v10181_v1  ;;  %v10272_v55 = vpop.f32.mrf.mxu1 }
 0x4e0   : > { %6149 = vst.msk [vmem:[%s10214_s29 + $0x38] sm:$0xff] %vm620_vm1, %v6117_v61  ;;  %v6116_v14 = vmul.f32 0.16666667, %v6084_v31  ;;  %v6087_v9 = vmul.f32 %v6055_v29, %v5959_v40  ;;  %v6054_v50 = vmin.f32 %v6022_v39, 6.0 }
 0x4e1   : > { %v6025_v10 = vmax.f32 %v5993_v54, 0.0  ;;  %v5992_v41 = vadd.f32 3.0, %v5960_v6  ;;  %v5963_v52 = vadd.f32 %v10192_v34, %v5927_v45  ;;  %v5926_v62 = vmul.f32 %v10187_v43, %v5811_v58  ;;  %v7492_v38 = vpop.f32.mrf.mxu0  ;;  %v10282_v11 = vpop.f32.mrf.mxu1 }
 0x4e2   : > { %6148 = vst.msk [vmem:[%s10214_s29 + $0x30] sm:$0xff] %vm620_vm1, %v6116_v14  ;;  %v6119_v63 = vmul.f32 0.16666667, %v6087_v9  ;;  %v6086_v5 = vmul.f32 %v6054_v50, %v5958_v4  ;;  %v5826_v1 = vadd.f32 %v7492_v38, %v10189_v47 }
 0x4e3   : > { %v6057_v8 = vmin.f32 %v6025_v10, 6.0  ;;  %v6024_v60 = vmax.f32 %v5992_v41, 0.0  ;;  %v5995_v3 = vadd.f32 3.0, %v5963_v52  ;;  %v5962_v12 = vadd.f32 %v10192_v34, %v5926_v62  ;;  %v5820_v0 = vpop.f32.mrf.mxu0 }
 0x4e4   : > { %6151 = vst.msk [vmem:[%s10214_s29 + $0x48] sm:$0xff] %vm620_vm1, %v6119_v63  ;;  %v6118_v13 = vmul.f32 0.16666667, %v6086_v5  ;;  %v5929_v21 = vmul.f32 %v10187_v43, %v5826_v1  ;;  %v5821_v30 = vadd.f32 %v5820_v0, %v10195_v35 }
 0x4e5   : > { %v6089_v28 = vmul.f32 %v6057_v8, %v5961_v57  ;;  %v6056_v37 = vmin.f32 %v6024_v60, 6.0  ;;  %v6027_v40 = vmax.f32 %v5995_v3, 0.0  ;;  %v5994_v47 = vadd.f32 3.0, %v5962_v12  ;;  %v7495_v44 = vpop.f32.mrf.mxu0 }
 0x4e6   : > { %6150 = vst.msk [vmem:[%s10214_s29 + $0x40] sm:$0xff] %vm620_vm1, %v6118_v13  ;;  %v5965_v46 = vadd.f32 %v10192_v34, %v5929_v21  ;;  %v5928_v51 = vmul.f32 %v10187_v43, %v5821_v30  ;;  %v5836_v32 = vadd.f32 %v7495_v44, %v10200_v17 }
 0x4e7   : > { %v6121_v19 = vmul.f32 0.16666667, %v6089_v28  ;;  %v6088_v22 = vmul.f32 %v6056_v37, %v5960_v6  ;;  %v6059_v24 = vmin.f32 %v6027_v40, 6.0  ;;  %v6026_v35 = vmax.f32 %v5994_v47, 0.0  ;;  %v5830_v20 = vpop.f32.mrf.mxu0  ;;  %v10292_v6 = vpop.f32.mrf.mxu1 }
 0x4e8   : > { %v5997_v4 = vadd.f32 3.0, %v5965_v46  ;;  %v5964_v59 = vadd.f32 %v10192_v34, %v5928_v51  ;;  %v5931_v48 = vmul.f32 %v10187_v43, %v5836_v32  ;;  %v5831_v26 = vadd.f32 %v5830_v20, %v10205_v7 }
 0x4e9   : > { %6153 = vst.msk [vmem:[%s10214_s29 + $0x58] sm:$0xff] %vm620_vm1, %v6121_v19  ;;  %v6120_v56 = vmul.f32 0.16666667, %v6088_v22  ;;  %v6091_v33 = vmul.f32 %v6059_v24, %v5963_v52  ;;  %v6058_v17 = vmin.f32 %v6026_v35, 6.0  ;;  %v7460_v60 = vpop.f32.mrf.mxu1 }
 0x4ea   : > { %v6029_v18 = vmax.f32 %v5997_v4, 0.0  ;;  %v5996_v16 = vadd.f32 3.0, %v5964_v59  ;;  %v5967_v36 = vadd.f32 %v10192_v34, %v5931_v48  ;;  %v5930_v57 = vmul.f32 %v10187_v43, %v5831_v26  ;;  %v7498_v53 = vpop.f32.mrf.mxu0 }
 0x4eb   : > { %6152 = vst.msk [vmem:[%s10214_s29 + $0x50] sm:$0xff] %vm620_vm1, %v6120_v56  ;;  %v6123_v2 = vmul.f32 0.16666667, %v6091_v33  ;;  %v6090_v61 = vmul.f32 %v6058_v17, %v5962_v12  ;;  %v5846_v7 = vadd.f32 %v7498_v53, %v10218_v27  ;;  %v5559_v19 = vpop.f32.mrf.mxu1 }
 0x4ec   : > { %v6061_v31 = vmin.f32 %v6029_v18, 6.0  ;;  %v6028_v29 = vmax.f32 %v5996_v16, 0.0  ;;  %v5999_v39 = vadd.f32 3.0, %v5967_v36  ;;  %v5966_v25 = vadd.f32 %v10192_v34, %v5930_v57  ;;  %v5840_v54 = vpop.f32.mrf.mxu0 }
 0x4ed   : > { %6155 = vst.msk [vmem:[%s10214_s29 + $0x68] sm:$0xff] %vm620_vm1, %v6123_v2  ;;  %v6122_v45 = vmul.f32 0.16666667, %v6090_v61  ;;  %v5933_v58 = vmul.f32 %v10187_v43, %v5846_v7  ;;  %v5841_v14 = vadd.f32 %v5840_v54, %v10229_v23  ;;  %v7463_v53 = vpop.f32.mrf.mxu1 }
 0x4ee   : > { %v6093_v9 = vmul.f32 %v6061_v31, %v5965_v46  ;;  %v6060_v50 = vmin.f32 %v6028_v29, 6.0  ;;  %v6031_v10 = vmax.f32 %v5999_v39, 0.0  ;;  %v5998_v27 = vadd.f32 3.0, %v5966_v25  ;;  %v7501_v41 = vpop.f32.mrf.mxu0 }
 0x4ef   : > { %6154 = vst.msk [vmem:[%s10214_s29 + $0x60] sm:$0xff] %vm620_vm1, %v6122_v45  ;;  %v5969_v52 = vadd.f32 %v10192_v34, %v5933_v58  ;;  %v5932_v62 = vmul.f32 %v10187_v43, %v5841_v14  ;;  %v5856_v38 = vadd.f32 %v7501_v41, %v10238_v42 }
 0x4f0   : > { %v6125_v63 = vmul.f32 0.16666667, %v6093_v9  ;;  %v6092_v5 = vmul.f32 %v6060_v50, %v5964_v59  ;;  %v6063_v1 = vmin.f32 %v6031_v10, 6.0  ;;  %v6030_v8 = vmax.f32 %v5998_v27, 0.0  ;;  %v5850_v23 = vpop.f32.mrf.mxu0 }
 0x4f1   : > { %v6001_v3 = vadd.f32 3.0, %v5969_v52  ;;  %v5968_v12 = vadd.f32 %v10192_v34, %v5932_v62  ;;  %v5935_v0 = vmul.f32 %v10187_v43, %v5856_v38  ;;  %v5851_v13 = vadd.f32 %v5850_v23, %v10248_v49 }
 0x4f2   : > { %6157 = vst.msk [vmem:[%s10214_s29 + $0x78] sm:$0xff] %vm620_vm1, %v6125_v63  ;;  %v6124_v21 = vmul.f32 0.16666667, %v6092_v5  ;;  %v6095_v30 = vmul.f32 %v6063_v1, %v5967_v36  ;;  %v6062_v28 = vmin.f32 %v6030_v8, 6.0  ;;  %v7504_v42 = vpop.f32.mrf.mxu0 }
 0x4f3   : > { %v6033_v37 = vmax.f32 %v6001_v3, 0.0  ;;  %v6000_v40 = vadd.f32 3.0, %v5968_v12  ;;  %v5971_v47 = vadd.f32 %v10192_v34, %v5935_v0  ;;  %v5934_v44 = vmul.f32 %v10187_v43, %v5851_v13 }
 0x4f4   : > { %6156 = vst.msk [vmem:[%s10214_s29 + $0x70] sm:$0xff] %vm620_vm1, %v6124_v21  ;;  %v6127_v46 = vmul.f32 0.16666667, %v6095_v30  ;;  %v6094_v51 = vmul.f32 %v6062_v28, %v5966_v25  ;;  %v5866_v32 = vadd.f32 %v7504_v42, %v10260_v15  ;;  %v5860_v49 = vpop.f32.mrf.mxu0 }
 0x4f5   : > { %v6065_v22 = vmin.f32 %v6033_v37, 6.0  ;;  %v6032_v24 = vmax.f32 %v6000_v40, 0.0  ;;  %v6003_v35 = vadd.f32 3.0, %v5971_v47  ;;  %v5970_v20 = vadd.f32 %v10192_v34, %v5934_v44 }
 0x4f6   : > { %6159 = vst.msk [vmem:[%s10214_s29 + $0x88] sm:$0xff] %vm620_vm1, %v6127_v46  ;;  %v6126_v4 = vmul.f32 0.16666667, %v6094_v51  ;;  %v5937_v59 = vmul.f32 %v10187_v43, %v5866_v32  ;;  %v5861_v48 = vadd.f32 %v5860_v49, %v10272_v55  ;;  %v7507_v26 = vpop.f32.mrf.mxu0 }
 0x4f7   : > { %v6097_v56 = vmul.f32 %v6065_v22, %v5969_v52  ;;  %v6064_v33 = vmin.f32 %v6032_v24, 6.0  ;;  %v6035_v17 = vmax.f32 %v6003_v35, 0.0  ;;  %v6002_v15 = vadd.f32 3.0, %v5970_v20  ;;  %v5569_v52 = vpop.f32.mrf.mxu1 }
 0x4f8   : > { %6158 = vst.msk [vmem:[%s10214_s29 + $0x80] sm:$0xff] %vm620_vm1, %v6126_v4  ;;  %v5973_v18 = vadd.f32 %v10192_v34, %v5937_v59  ;;  %v5936_v16 = vmul.f32 %v10187_v43, %v5861_v48  ;;  %v5876_v36 = vadd.f32 %v7507_v26, %v10282_v11  ;;  %v5870_v57 = vpop.f32.mrf.mxu0 }
 0x4f9   : > { %v6129_v2 = vmul.f32 0.16666667, %v6097_v56  ;;  %v6096_v61 = vmul.f32 %v6064_v33, %v5968_v12  ;;  %v6067_v7 = vmin.f32 %v6035_v17, 6.0  ;;  %v6034_v55 = vmax.f32 %v6002_v15, 0.0  ;;  %v7466_v40 = vpop.f32.mrf.mxu1 }
 0x4fa   : > { %v6005_v31 = vadd.f32 3.0, %v5973_v18  ;;  %v5972_v29 = vadd.f32 %v10192_v34, %v5936_v16  ;;  %v5939_v39 = vmul.f32 %v10187_v43, %v5876_v36  ;;  %v5871_v25 = vadd.f32 %v5870_v57, %v10292_v6  ;;  %v7510_v54 = vpop.f32.mrf.mxu0 }
 0x4fb   : > { %6161 = vst.msk [vmem:[%s10214_s29 + $0x98] sm:$0xff] %vm620_vm1, %v6129_v2  ;;  %v6128_v45 = vmul.f32 0.16666667, %v6096_v61  ;;  %v6099_v58 = vmul.f32 %v6067_v7, %v5971_v47  ;;  %v6066_v11 = vmin.f32 %v6034_v55, 6.0  ;;  %v5886_v14 = vadd.f32 %v7510_v54, %v7460_v60  ;;  %v5579_v15 = vpop.f32.mrf.mxu1 }
 0x4fc   : > { %v6037_v9 = vmax.f32 %v6005_v31, 0.0  ;;  %v6004_v50 = vadd.f32 3.0, %v5972_v29  ;;  %v5975_v10 = vadd.f32 %v10192_v34, %v5939_v39  ;;  %v5938_v27 = vmul.f32 %v10187_v43, %v5871_v25  ;;  %v5880_v41 = vpop.f32.mrf.mxu0 }
 0x4fd   : > { %6160 = vst.msk [vmem:[%s10214_s29 + $0x90] sm:$0xff] %vm620_vm1, %v6128_v45  ;;  %v6131_v62 = vmul.f32 0.16666667, %v6099_v58  ;;  %v6098_v6 = vmul.f32 %v6066_v11, %v5970_v20  ;;  %v5941_v38 = vmul.f32 %v10187_v43, %v5886_v14  ;;  %v5881_v63 = vadd.f32 %v5880_v41, %v5559_v19 }
 0x4fe   : > { %v6069_v5 = vmin.f32 %v6037_v9, 6.0  ;;  %v6036_v1 = vmax.f32 %v6004_v50, 0.0  ;;  %v6007_v8 = vadd.f32 3.0, %v5975_v10  ;;  %v5974_v23 = vadd.f32 %v10192_v34, %v5938_v27  ;;  %v7513_v60 = vpop.f32.mrf.mxu0 }
 0x4ff   : > { %6163 = vst.msk [vmem:[%s10214_s29 + $0xa8] sm:$0xff] %vm620_vm1, %v6131_v62  ;;  %v6130_v3 = vmul.f32 0.16666667, %v6098_v6  ;;  %v5977_v12 = vadd.f32 %v10192_v34, %v5941_v38  ;;  %v5940_v0 = vmul.f32 %v10187_v43, %v5881_v63  ;;  %v5896_v13 = vadd.f32 %v7513_v60, %v7463_v53 }
 0x500   : > { %v6101_v21 = vmul.f32 %v6069_v5, %v5973_v18  ;;  %v6068_v30 = vmin.f32 %v6036_v1, 6.0  ;;  %v6039_v28 = vmax.f32 %v6007_v8, 0.0  ;;  %v6006_v42 = vadd.f32 3.0, %v5974_v23  ;;  %v5890_v37 = vpop.f32.mrf.mxu0 }
 0x501   : > { %6162 = vst.msk [vmem:[%s10214_s29 + $0xa0] sm:$0xff] %vm620_vm1, %v6130_v3  ;;  %v6009_v47 = vadd.f32 3.0, %v5977_v12  ;;  %v5976_v44 = vadd.f32 %v10192_v34, %v5940_v0  ;;  %v5943_v46 = vmul.f32 %v10187_v43, %v5896_v13  ;;  %v5891_v51 = vadd.f32 %v5890_v37, %v5569_v52 }
 0x502   : > { %v6133_v32 = vmul.f32 0.16666667, %v6101_v21  ;;  %v6100_v49 = vmul.f32 %v6068_v30, %v5972_v29  ;;  %v6071_v19 = vmin.f32 %v6039_v28, 6.0  ;;  %v6038_v22 = vmax.f32 %v6006_v42, 0.0  ;;  %v7516_v24 = vpop.f32.mrf.mxu0 }
 0x503   : > { %v6041_v35 = vmax.f32 %v6009_v47, 0.0  ;;  %v6008_v20 = vadd.f32 3.0, %v5976_v44  ;;  %v5979_v4 = vadd.f32 %v10192_v34, %v5943_v46  ;;  %v5942_v59 = vmul.f32 %v10187_v43, %v5891_v51 }
 0x504   : > { %6165 = vst.msk [vmem:[%s10214_s29 + $0xb8] sm:$0xff] %vm620_vm1, %v6133_v32  ;;  %v6132_v48 = vmul.f32 0.16666667, %v6100_v49  ;;  %v6103_v26 = vmul.f32 %v6071_v19, %v5975_v10  ;;  %v6070_v56 = vmin.f32 %v6038_v22, 6.0  ;;  %v5906_v33 = vadd.f32 %v7516_v24, %v7466_v40  ;;  %v5900_v17 = vpop.f32.mrf.mxu0 }
 0x505   : > { %v6073_v18 = vmin.f32 %v6041_v35, 6.0  ;;  %v6040_v16 = vmax.f32 %v6008_v20, 0.0  ;;  %v6011_v36 = vadd.f32 3.0, %v5979_v4  ;;  %v5978_v57 = vadd.f32 %v10192_v34, %v5942_v59 }
 0x506   : > { %6164 = vst.msk [vmem:[%s10214_s29 + $0xb0] sm:$0xff] %vm620_vm1, %v6132_v48  ;;  %v6135_v53 = vmul.f32 0.16666667, %v6103_v26  ;;  %v6102_v2 = vmul.f32 %v6070_v56, %v5974_v23  ;;  %v5945_v61 = vmul.f32 %v10187_v43, %v5906_v33  ;;  %v5901_v7 = vadd.f32 %v5900_v17, %v5579_v15 }
 0x507   : > { %v6105_v55 = vmul.f32 %v6073_v18, %v5977_v12  ;;  %v6072_v31 = vmin.f32 %v6040_v16, 6.0  ;;  %v6043_v29 = vmax.f32 %v6011_v36, 0.0  ;;  %v6010_v39 = vadd.f32 3.0, %v5978_v57 }
 0x508   : > { %6167 = vst.msk [vmem:[%s10214_s29 + $0xc8] sm:$0xff] %vm620_vm1, %v6135_v53  ;;  %v6134_v25 = vmul.f32 0.16666667, %v6102_v2  ;;  %v5981_v54 = vadd.f32 %v10192_v34, %v5945_v61  ;;  %v5944_v45 = vmul.f32 %v10187_v43, %v5901_v7 }
 0x509   : > { %v6137_v58 = vmul.f32 0.16666667, %v6105_v55  ;;  %v6104_v11 = vmul.f32 %v6072_v31, %v5976_v44  ;;  %v6075_v14 = vmin.f32 %v6043_v29, 6.0  ;;  %v6042_v9 = vmax.f32 %v6010_v39, 0.0 }
 0x50a   : > { %6166 = vst.msk [vmem:[%s10214_s29 + $0xc0] sm:$0xff] %vm620_vm1, %v6134_v25  ;;  %v6013_v50 = vadd.f32 3.0, %v5981_v54  ;;  %v5980_v10 = vadd.f32 %v10192_v34, %v5944_v45 }
 0x50b   : > { %6169 = vst.msk [vmem:[%s10214_s29 + $0xd8] sm:$0xff] %vm620_vm1, %v6137_v58  ;;  %v6136_v27 = vmul.f32 0.16666667, %v6104_v11  ;;  %v6107_v41 = vmul.f32 %v6075_v14, %v5979_v4  ;;  %v6074_v52 = vmin.f32 %v6042_v9, 6.0 }
 0x50c   : > { %v6045_v62 = vmax.f32 %v6013_v50, 0.0  ;;  %v6012_v43 = vadd.f32 3.0, %v5980_v10 }
 0x50d   : > { %6168 = vst.msk [vmem:[%s10214_s29 + $0xd0] sm:$0xff] %vm620_vm1, %v6136_v27  ;;  %v6139_v6 = vmul.f32 0.16666667, %v6107_v41  ;;  %v6106_v38 = vmul.f32 %v6074_v52, %v5978_v57 }
 0x50e   : > { %v6077_v63 = vmin.f32 %v6045_v62, 6.0  ;;  %v6044_v5 = vmax.f32 %v6012_v43, 0.0 }
 0x50f   : > { %6171 = vst.msk [vmem:[%s10214_s29 + $0xe8] sm:$0xff] %vm620_vm1, %v6139_v6  ;;  %v6138_v1 = vmul.f32 0.16666667, %v6106_v38 }
 0x510   : > { %v6109_v34 = vmul.f32 %v6077_v63, %v5981_v54  ;;  %v6076_v8 = vmin.f32 %v6044_v5, 6.0 }
 0x511   : > { %6170 = vst.msk [vmem:[%s10214_s29 + $0xe0] sm:$0xff] %vm620_vm1, %v6138_v1 }
 0x512   : > { %v6141_v23 = vmul.f32 0.16666667, %v6109_v34  ;;  %v6108_v60 = vmul.f32 %v6076_v8, %v5980_v10 }
 0x514   : > { %6173 = vst.msk [vmem:[%s10214_s29 + $0xf8] sm:$0xff] %vm620_vm1, %v6141_v23  ;;  %v6140_v3 = vmul.f32 0.16666667, %v6108_v60 }
 0x516   : > { %6172 = vst.msk [vmem:[%s10214_s29 + $0xf0] sm:$0xff] %vm620_vm1, %v6140_v3 }
 0x517 PF: > { %s26_s21 = sadd.s32 1, %s7539_s21  }
 0x518   : > { %p23_p4 = scmp.ge.s32.totalorder %s26_s21, 6  }
 0x51a   :  { %25 = sbr.rel (!%p23_p4) target bundleno = 2 (0x2), region = 118 }

</bundles_post_ra>
